<compile_context>
chip_gen: v5e
topology: v5e:2x2
jax: 0.10.0
libtpu: 0.0.40
codegen_flags: <defaults>
</compile_context>

<pallas_src>
import functools

import jax
import jax.numpy as jnp
from jax.experimental import pallas as pl
from jax.experimental.pallas import tpu as pltpu

_LANE = 128  # channel padding target (lane width)


# ---------------------------------------------------------------------------
# Helpers
# ---------------------------------------------------------------------------

def _pad_to(v, m):
    return ((v + m - 1) // m) * m


def _choose_th(H, W):
    """Row-tile height TH: divides H, TH*W a multiple of 8, ~>=128 rows."""
    cands = [t for t in range(1, H + 1) if H % t == 0 and (t * W) % 8 == 0]
    if not cands:
        return H                      # block rows == full H*W dim (always legal)
    for t in cands:
        if t * W >= 128:
            return t
    return cands[-1]


# ---------------------------------------------------------------------------
# Pallas kernels
# ---------------------------------------------------------------------------

def _conv3x3_kernel(xp_hbm, w_ref, b_ref, o_ref, win, sem, *, TH, W, C):
    """One (batch, row-block) output tile of a 3x3 / stride-1 convolution.

    xp_hbm : [N, H+2, W+2, C]  padded input, stays in HBM (manual DMA)
    w_ref  : [9, C, Coutp]     resident VMEM weights (tap-major)
    b_ref  : [1, Coutp]        bias
    o_ref  : [1, TH*W, Coutp]  output tile (lane-dense)
    win    : [2, TH+2, W+2, C] double-buffered input window (VMEM scratch)
    sem    : DMA semaphores, one per buffer slot
    """
    n = pl.program_id(0)
    hb = pl.program_id(1)
    nb = pl.num_programs(1)
    slot = hb % 2

    def start(row_block, slot_):
        h0 = pl.multiple_of(row_block * TH, TH)
        pltpu.make_async_copy(
            xp_hbm.at[n, pl.ds(h0, TH + 2)], win.at[slot_], sem.at[slot_]
        ).start()

    # Prime the pipeline for the first row block of this image.
    @pl.when(hb == 0)
    def _():
        start(hb, slot)

    # Wait for the current window (started by the prime or by the previous step).
    h0 = pl.multiple_of(hb * TH, TH)
    pltpu.make_async_copy(
        xp_hbm.at[n, pl.ds(h0, TH + 2)], win.at[slot], sem.at[slot]
    ).wait()

    # Prefetch the next row block's window while computing on this one.
    @pl.when(hb + 1 < nb)
    def _():
        start(hb + 1, 1 - slot)

    coutp = o_ref.shape[-1]
    wv = win.at[slot]
    acc = jnp.zeros((TH * W, coutp), jnp.float32)
    for di in range(3):            # statically unrolled 3x3 taps
        for dj in range(3):
            lhs = wv[pl.ds(di, TH), pl.ds(dj, W), :].reshape(TH * W, C)
            acc = acc + jnp.dot(lhs, w_ref[di * 3 + dj],
                                preferred_element_type=jnp.float32)
    o_ref[0] = acc + b_ref[...]


def _inorm_kernel(x_ref, o_ref, *, eps, relu):
    x = x_ref[...]                                   # (1, HW, TC)
    mean = jnp.mean(x, axis=1, keepdims=True)
    xc = x - mean
    var = jnp.mean(xc * xc, axis=1, keepdims=True)   # biased var (PyTorch IN)
    y = xc * jax.lax.rsqrt(var + eps)
    if relu:
        y = jnp.maximum(y, 0.0)
    o_ref[...] = y


def _inorm_add_kernel(x_ref, r_ref, o_ref, *, eps):
    x = x_ref[...]
    mean = jnp.mean(x, axis=1, keepdims=True)
    xc = x - mean
    var = jnp.mean(xc * xc, axis=1, keepdims=True)
    o_ref[...] = xc * jax.lax.rsqrt(var + eps) + r_ref[...]   # fused residual add


# ---------------------------------------------------------------------------
# Pallas wrappers
# ---------------------------------------------------------------------------

def conv3x3(xp, w9, b2):
    """xp [N, H+2, W+2, Cp], w9 [9, Cp, Coutp], b2 [1, Coutp] -> [N, H*W, Coutp]."""
    N, Hp, Wp, Cp = xp.shape
    H, W = Hp - 2, Wp - 2
    Coutp = w9.shape[-1]
    TH = _choose_th(H, W)
    nb = H // TH

    kernel = functools.partial(_conv3x3_kernel, TH=TH, W=W, C=Cp)
    flops = 2 * N * H * W * Cp * Coutp * 9
    bytes_accessed = 4 * (N * Hp * Wp * Cp + int(w9.size) + int(b2.size)
                          + N * H * W * Coutp)

    return pl.pallas_call(
        kernel,
        out_shape=jax.ShapeDtypeStruct((N, H * W, Coutp), jnp.float32),
        grid_spec=pltpu.PrefetchScalarGridSpec(
            num_scalar_prefetch=0,
            grid=(N, nb),
            in_specs=[
                pl.BlockSpec(memory_space=pl.ANY),                   # xp in HBM
                pl.BlockSpec((9, Cp, Coutp), lambda n, h: (0, 0, 0)),  # resident
                pl.BlockSpec((1, Coutp), lambda n, h: (0, 0)),
            ],
            out_specs=pl.BlockSpec((1, TH * W, Coutp), lambda n, h: (n, h, 0)),
            scratch_shapes=[
                pltpu.VMEM((2, TH + 2, Wp, Cp), jnp.float32),
                pltpu.SemaphoreType.DMA((2,)),
            ],
        ),
        compiler_params=pltpu.CompilerParams(
            dimension_semantics=("parallel", "arbitrary")),
        cost_estimate=pl.CostEstimate(flops=flops, transcendentals=0,
                                      bytes_accessed=bytes_accessed),
    )(xp, w9, b2)


def instance_norm(y, residual=None, relu=False, eps=1e-5):
    """InstanceNorm2d(affine=False) on a [N, H*W, Cp] NHWC view.
    Optionally fuses ReLU or a residual add into the same kernel."""
    N, HW, Cp = y.shape
    TC = _LANE
    spec = pl.BlockSpec((1, HW, TC), lambda n, c: (n, 0, c))
    if residual is None:
        kernel = functools.partial(_inorm_kernel, eps=eps, relu=relu)
        in_specs, args = [spec], (y,)
    else:
        kernel = functools.partial(_inorm_add_kernel, eps=eps)
        in_specs, args = [spec, spec], (y, residual)
    return pl.pallas_call(
        kernel,
        out_shape=jax.ShapeDtypeStruct((N, HW, Cp), jnp.float32),
        grid_spec=pltpu.PrefetchScalarGridSpec(
            num_scalar_prefetch=0,
            grid=(N, Cp // TC),
            in_specs=in_specs,
            out_specs=spec,
        ),
        compiler_params=pltpu.CompilerParams(
            dimension_semantics=("parallel", "parallel")),
    )(*args)


# ---------------------------------------------------------------------------
# ResidualBlock forward (matches the PyTorch module)
# ---------------------------------------------------------------------------

def _prep_conv_params(w, b, cin_p, cout_p):
    """Torch-layout [Cout, Cin, 3, 3] -> tap-major, channel-padded [9, Cin_p, Cout_p]."""
    cout, cin, kh, kw = w.shape
    w9 = jnp.transpose(w, (2, 3, 1, 0)).reshape(kh * kw, cin, cout)
    w9 = jnp.pad(w9, ((0, 0), (0, cin_p - cin), (0, cout_p - cout)))
    b2 = jnp.pad(b.reshape(1, cout), ((0, 0), (0, cout_p - cout)))
    return w9.astype(jnp.float32), b2.astype(jnp.float32)


def residual_block(x_nchw, params, eps=1e-5):
    """y = IN(conv2(pad(relu(IN(conv1(pad(x))))))) + x   (PyTorch ResidualBlock)."""
    (w1, b1), (w2, b2) = params
    N, C, H, W = x_nchw.shape
    Cp = _pad_to(C, _LANE)

    # NCHW -> NHWC, zero-pad channels to a lane-dense width.  Padded channels
    # stay exactly zero through conv / IN / ReLU / add, so they are inert.
    x = jnp.transpose(x_nchw, (0, 2, 3, 1)).astype(jnp.float32)
    if Cp != C:
        x = jnp.pad(x, ((0, 0), (0, 0), (0, 0), (0, Cp - C)))

    w1p, b1p = _prep_conv_params(w1, b1, Cp, Cp)
    w2p, b2p = _prep_conv_params(w2, b2, Cp, Cp)

    # conv1 -> InstanceNorm -> ReLU
    xp = jnp.pad(x, ((0, 0), (1, 1), (1, 1), (0, 0)), mode="reflect")
    y = conv3x3(xp, w1p, b1p)                              # [N, H*W, Cp]
    y = instance_norm(y, relu=True, eps=eps)

    # conv2 -> InstanceNorm (+ fused residual add)
    yp = jnp.pad(y.reshape(N, H, W, Cp),
                 ((0, 0), (1, 1), (1, 1), (0, 0)), mode="reflect")
    y = conv3x3(yp, w2p, b2p)
    out = instance_norm(y, residual=x.reshape(N, H * W, Cp), eps=eps)

    # strip channel padding, back to NCHW
    out = out.reshape(N, H, W, Cp)[..., :C]
    return jnp.transpose(out, (0, 3, 1, 2))


# ---------------------------------------------------------------------------
# Pure-JAX reference (for a correctness check)
# ---------------------------------------------------------------------------

def _residual_block_ref(x, params, eps=1e-5):
    def conv(x, w, b):
        xp = jnp.pad(x, ((0, 0), (0, 0), (1, 1), (1, 1)), mode="reflect")
        y = jax.lax.conv_general_dilated(
            xp, w, window_strides=(1, 1), padding="VALID",
            dimension_numbers=("NCHW", "OIHW", "NCHW"),
            precision=jax.lax.Precision.HIGHEST)
        return y + b.reshape(1, -1, 1, 1)

    def inorm(x):
        m = x.mean(axis=(2, 3), keepdims=True)
        v = ((x - m) ** 2).mean(axis=(2, 3), keepdims=True)
        return (x - m) * jax.lax.rsqrt(v + eps)

    (w1, b1), (w2, b2) = params
    y = jnp.maximum(inorm(conv(x, w1, b1)), 0.0)
    y = inorm(conv(y, w2, b2))
    return y + x


# ---------------------------------------------------------------------------
# Main
# ---------------------------------------------------------------------------

if __name__ == "__main__":
    key = jax.random.PRNGKey(0)
    kx, kw1, kb1, kw2, kb2 = jax.random.split(key, 5)

    N, C, H, W = 2, 64, 16, 16        # small ResidualBlock(channels=64) config
    x = jax.random.normal(kx, (N, C, H, W), jnp.float32)
    w1 = jax.random.normal(kw1, (C, C, 3, 3), jnp.float32) / (C * 9) ** 0.5
    b1 = 0.01 * jax.random.normal(kb1, (C,), jnp.float32)
    w2 = jax.random.normal(kw2, (C, C, 3, 3), jnp.float32) / (C * 9) ** 0.5
    b2 = 0.01 * jax.random.normal(kb2, (C,), jnp.float32)
    params = ((w1, b1), (w2, b2))

    fwd = jax.jit(lambda inp: residual_block(inp, params))
    out = jax.block_until_ready(fwd(x))

    assert out.shape == (N, C, H, W), out.shape
    assert out.dtype == jnp.float32
    assert bool(jnp.all(jnp.isfinite(out)))

    ref = _residual_block_ref(x, params)
    max_err = float(jnp.max(jnp.abs(out - ref)))
    assert max_err < 5e-2, f"max abs err vs reference: {max_err}"

    print("KERNEL_OK")
</pallas_src>

<mosaic_0001>
module attributes {stable_mosaic.version = 11 : i64} {
  func.func @_conv3x3_kernel(%arg0: i32, %arg1: i32, %arg2: memref<2x18x18x128xf32, #tpu.memory_space<any>>, %arg3: memref<9x128x128xf32, #tpu.memory_space<vmem>>, %arg4: memref<1x128xf32, #tpu.memory_space<vmem>>, %arg5: memref<1x128x128xf32, #tpu.memory_space<vmem>>, %arg6: memref<2x10x18x128xf32, #tpu.memory_space<vmem>>, %arg7: memref<2x!tpu.dma_semaphore, #tpu.memory_space<semaphore_mem>>) attributes {dimension_semantics = [#tpu.dimension_semantics<parallel>, #tpu.dimension_semantics<arbitrary>], iteration_bounds = array<i64: 2, 2>, scalar_prefetch = 0 : i64, scratch_operands = 2 : i64, tpu.core_type = #tpu.core_type<tc>, window_params = [{}, {pipeline_mode = #tpu.pipeline_mode<synchronous>, transform_indices = @transform_1, window_bounds = array<i64: 9, 128, 128>}, {pipeline_mode = #tpu.pipeline_mode<synchronous>, transform_indices = @transform_2, window_bounds = array<i64: 1, 128>}, {transform_indices = @transform_3, window_bounds = array<i64: 1, 128, 128>}]} {
    %c2_i32 = arith.constant 2 : i32
    %c0_i32 = arith.constant 0 : i32
    %0 = arith.cmpi eq, %c2_i32, %c0_i32 : i32
    %c1_i32 = arith.constant 1 : i32
    %1 = arith.select %0, %c1_i32, %c2_i32 : i32
    %2 = arith.remsi %arg1, %1 : i32
    %c0_i32_0 = arith.constant 0 : i32
    %3 = arith.cmpi ne, %2, %c0_i32_0 : i32
    %c0_i32_1 = arith.constant 0 : i32
    %4 = arith.cmpi slt, %2, %c0_i32_1 : i32
    %c0_i32_2 = arith.constant 0 : i32
    %5 = arith.cmpi slt, %1, %c0_i32_2 : i32
    %6 = arith.xori %4, %5 : i1
    %7 = arith.andi %6, %3 : i1
    %8 = arith.addi %2, %1 : i32
    %9 = arith.select %7, %8, %2 : i32
    %c0_i32_3 = arith.constant 0 : i32
    %10 = arith.cmpi eq, %arg1, %c0_i32_3 : i32
    %11 = arith.extui %10 : i1 to i32
    %c0_i32_4 = arith.constant 0 : i32
    %12 = arith.cmpi ne, %11, %c0_i32_4 : i32
    scf.if %12 {
      %c8_i32_99 = arith.constant 8 : i32
      %104 = arith.muli %arg1, %c8_i32_99 : i32
      %105 = tpu.assume_multiple %104, 8 : i32
      %c0_i32_100 = arith.constant 0 : i32
      %c0_i32_101 = arith.constant 0 : i32
      %106 = tpu.memref_slice %arg2[%arg0, %105, %c0_i32_100, %c0_i32_101] : memref<2x18x18x128xf32, #tpu.memory_space<any>> -> memref<1x10x18x128xf32, #tpu.memory_space<any>>
      %107 = tpu.memref_squeeze %106 : memref<1x10x18x128xf32, #tpu.memory_space<any>> -> memref<10x18x128xf32, #tpu.memory_space<any>>
      %c0_i32_102 = arith.constant 0 : i32
      %c0_i32_103 = arith.constant 0 : i32
      %c0_i32_104 = arith.constant 0 : i32
      %108 = tpu.memref_slice %arg6[%9, %c0_i32_102, %c0_i32_103, %c0_i32_104] : memref<2x10x18x128xf32, #tpu.memory_space<vmem>> -> memref<1x10x18x128xf32, #tpu.memory_space<vmem>>
      %109 = tpu.memref_squeeze %108 : memref<1x10x18x128xf32, #tpu.memory_space<vmem>> -> memref<10x18x128xf32, #tpu.memory_space<vmem>>
      %110 = tpu.memref_slice %arg7[%9] : memref<2x!tpu.dma_semaphore, #tpu.memory_space<semaphore_mem>> -> memref<1x!tpu.dma_semaphore, #tpu.memory_space<semaphore_mem>>
      %111 = tpu.memref_squeeze %110 : memref<1x!tpu.dma_semaphore, #tpu.memory_space<semaphore_mem>> -> memref<!tpu.dma_semaphore, #tpu.memory_space<semaphore_mem>>
      tpu.enqueue_dma source(%107 : memref<10x18x128xf32, #tpu.memory_space<any>>) target(%109 : memref<10x18x128xf32, #tpu.memory_space<vmem>>) target_semaphore(%111 : memref<!tpu.dma_semaphore, #tpu.memory_space<semaphore_mem>>)
    } else {
    }
    %c8_i32 = arith.constant 8 : i32
    %13 = arith.muli %arg1, %c8_i32 : i32
    %14 = tpu.assume_multiple %13, 8 : i32
    %c0_i32_5 = arith.constant 0 : i32
    %c0_i32_6 = arith.constant 0 : i32
    %15 = tpu.memref_slice %arg2[%arg0, %14, %c0_i32_5, %c0_i32_6] : memref<2x18x18x128xf32, #tpu.memory_space<any>> -> memref<1x10x18x128xf32, #tpu.memory_space<any>>
    %16 = tpu.memref_squeeze %15 : memref<1x10x18x128xf32, #tpu.memory_space<any>> -> memref<10x18x128xf32, #tpu.memory_space<any>>
    %c0_i32_7 = arith.constant 0 : i32
    %c0_i32_8 = arith.constant 0 : i32
    %c0_i32_9 = arith.constant 0 : i32
    %17 = tpu.memref_slice %arg6[%9, %c0_i32_7, %c0_i32_8, %c0_i32_9] : memref<2x10x18x128xf32, #tpu.memory_space<vmem>> -> memref<1x10x18x128xf32, #tpu.memory_space<vmem>>
    %18 = tpu.memref_squeeze %17 : memref<1x10x18x128xf32, #tpu.memory_space<vmem>> -> memref<10x18x128xf32, #tpu.memory_space<vmem>>
    %19 = tpu.memref_slice %arg7[%9] : memref<2x!tpu.dma_semaphore, #tpu.memory_space<semaphore_mem>> -> memref<1x!tpu.dma_semaphore, #tpu.memory_space<semaphore_mem>>
    %20 = tpu.memref_squeeze %19 : memref<1x!tpu.dma_semaphore, #tpu.memory_space<semaphore_mem>> -> memref<!tpu.dma_semaphore, #tpu.memory_space<semaphore_mem>>
    tpu.wait_dma2 semaphore(%20 : memref<!tpu.dma_semaphore, #tpu.memory_space<semaphore_mem>>) src(%16 : memref<10x18x128xf32, #tpu.memory_space<any>>) dst(%18 : memref<10x18x128xf32, #tpu.memory_space<vmem>>)
    %c1_i32_10 = arith.constant 1 : i32
    %21 = arith.addi %arg1, %c1_i32_10 : i32
    %c2_i32_11 = arith.constant 2 : i32
    %22 = arith.cmpi slt, %21, %c2_i32_11 : i32
    %23 = arith.extui %22 : i1 to i32
    %c0_i32_12 = arith.constant 0 : i32
    %24 = arith.cmpi ne, %23, %c0_i32_12 : i32
    scf.if %24 {
      %c1_i32_99 = arith.constant 1 : i32
      %104 = arith.addi %arg1, %c1_i32_99 : i32
      %c1_i32_100 = arith.constant 1 : i32
      %105 = arith.subi %c1_i32_100, %9 : i32
      %c8_i32_101 = arith.constant 8 : i32
      %106 = arith.muli %104, %c8_i32_101 : i32
      %107 = tpu.assume_multiple %106, 8 : i32
      %c0_i32_102 = arith.constant 0 : i32
      %c0_i32_103 = arith.constant 0 : i32
      %108 = tpu.memref_slice %arg2[%arg0, %107, %c0_i32_102, %c0_i32_103] : memref<2x18x18x128xf32, #tpu.memory_space<any>> -> memref<1x10x18x128xf32, #tpu.memory_space<any>>
      %109 = tpu.memref_squeeze %108 : memref<1x10x18x128xf32, #tpu.memory_space<any>> -> memref<10x18x128xf32, #tpu.memory_space<any>>
      %c0_i32_104 = arith.constant 0 : i32
      %c0_i32_105 = arith.constant 0 : i32
      %c0_i32_106 = arith.constant 0 : i32
      %110 = tpu.memref_slice %arg6[%105, %c0_i32_104, %c0_i32_105, %c0_i32_106] : memref<2x10x18x128xf32, #tpu.memory_space<vmem>> -> memref<1x10x18x128xf32, #tpu.memory_space<vmem>>
      %111 = tpu.memref_squeeze %110 : memref<1x10x18x128xf32, #tpu.memory_space<vmem>> -> memref<10x18x128xf32, #tpu.memory_space<vmem>>
      %112 = tpu.memref_slice %arg7[%105] : memref<2x!tpu.dma_semaphore, #tpu.memory_space<semaphore_mem>> -> memref<1x!tpu.dma_semaphore, #tpu.memory_space<semaphore_mem>>
      %113 = tpu.memref_squeeze %112 : memref<1x!tpu.dma_semaphore, #tpu.memory_space<semaphore_mem>> -> memref<!tpu.dma_semaphore, #tpu.memory_space<semaphore_mem>>
      tpu.enqueue_dma source(%109 : memref<10x18x128xf32, #tpu.memory_space<any>>) target(%111 : memref<10x18x128xf32, #tpu.memory_space<vmem>>) target_semaphore(%113 : memref<!tpu.dma_semaphore, #tpu.memory_space<semaphore_mem>>)
    } else {
    }
    %cst = arith.constant 0.000000e+00 : f32
    %25 = vector.broadcast %cst : f32 to vector<128x128xf32>
    %c0_i32_13 = arith.constant 0 : i32
    %c0_i32_14 = arith.constant 0 : i32
    %c0_i32_15 = arith.constant 0 : i32
    %26 = tpu.memref_slice %arg6[%9, %c0_i32_13, %c0_i32_14, %c0_i32_15] : memref<2x10x18x128xf32, #tpu.memory_space<vmem>> -> memref<1x10x18x128xf32, #tpu.memory_space<vmem>>
    %27 = tpu.memref_squeeze %26 : memref<1x10x18x128xf32, #tpu.memory_space<vmem>> -> memref<10x18x128xf32, #tpu.memory_space<vmem>>
    %c0 = arith.constant 0 : index
    %c0_16 = arith.constant 0 : index
    %c0_17 = arith.constant 0 : index
    %28 = vector.load %27[%c0, %c0_16, %c0_17] : memref<10x18x128xf32, #tpu.memory_space<vmem>>, vector<8x16x128xf32>
    %29 = vector.shape_cast %28 : vector<8x16x128xf32> to vector<128x128xf32>
    %c0_18 = arith.constant 0 : index
    %c0_19 = arith.constant 0 : index
    %c0_20 = arith.constant 0 : index
    %30 = vector.load %arg3[%c0_18, %c0_19, %c0_20] : memref<9x128x128xf32, #tpu.memory_space<vmem>>, vector<1x128x128xf32>
    %31 = vector.shape_cast %30 : vector<1x128x128xf32> to vector<128x128xf32>
    %cst_21 = arith.constant dense<0.000000e+00> : vector<128x128xf32>
    %32 = tpu.matmul %29, %31, %cst_21 {dimension_numbers = #tpu.dot_dimension_numbers<[1], [0], [0], [1], [0, 0, 1, 1], [], []>} : vector<128x128xf32>, vector<128x128xf32>, vector<128x128xf32> -> vector<128x128xf32>
    %33 = arith.addf %25, %32 : vector<128x128xf32>
    %c0_i32_22 = arith.constant 0 : i32
    %c0_i32_23 = arith.constant 0 : i32
    %c0_i32_24 = arith.constant 0 : i32
    %34 = tpu.memref_slice %arg6[%9, %c0_i32_22, %c0_i32_23, %c0_i32_24] : memref<2x10x18x128xf32, #tpu.memory_space<vmem>> -> memref<1x10x18x128xf32, #tpu.memory_space<vmem>>
    %35 = tpu.memref_squeeze %34 : memref<1x10x18x128xf32, #tpu.memory_space<vmem>> -> memref<10x18x128xf32, #tpu.memory_space<vmem>>
    %c0_25 = arith.constant 0 : index
    %c1 = arith.constant 1 : index
    %c0_26 = arith.constant 0 : index
    %36 = vector.load %35[%c0_25, %c1, %c0_26] : memref<10x18x128xf32, #tpu.memory_space<vmem>>, vector<8x16x128xf32>
    %37 = vector.shape_cast %36 : vector<8x16x128xf32> to vector<128x128xf32>
    %c1_27 = arith.constant 1 : index
    %c0_28 = arith.constant 0 : index
    %c0_29 = arith.constant 0 : index
    %38 = vector.load %arg3[%c1_27, %c0_28, %c0_29] : memref<9x128x128xf32, #tpu.memory_space<vmem>>, vector<1x128x128xf32>
    %39 = vector.shape_cast %38 : vector<1x128x128xf32> to vector<128x128xf32>
    %cst_30 = arith.constant dense<0.000000e+00> : vector<128x128xf32>
    %40 = tpu.matmul %37, %39, %cst_30 {dimension_numbers = #tpu.dot_dimension_numbers<[1], [0], [0], [1], [0, 0, 1, 1], [], []>} : vector<128x128xf32>, vector<128x128xf32>, vector<128x128xf32> -> vector<128x128xf32>
    %41 = arith.addf %33, %40 : vector<128x128xf32>
    %c0_i32_31 = arith.constant 0 : i32
    %c0_i32_32 = arith.constant 0 : i32
    %c0_i32_33 = arith.constant 0 : i32
    %42 = tpu.memref_slice %arg6[%9, %c0_i32_31, %c0_i32_32, %c0_i32_33] : memref<2x10x18x128xf32, #tpu.memory_space<vmem>> -> memref<1x10x18x128xf32, #tpu.memory_space<vmem>>
    %43 = tpu.memref_squeeze %42 : memref<1x10x18x128xf32, #tpu.memory_space<vmem>> -> memref<10x18x128xf32, #tpu.memory_space<vmem>>
    %c0_34 = arith.constant 0 : index
    %c2 = arith.constant 2 : index
    %c0_35 = arith.constant 0 : index
    %44 = vector.load %43[%c0_34, %c2, %c0_35] : memref<10x18x128xf32, #tpu.memory_space<vmem>>, vector<8x16x128xf32>
    %45 = vector.shape_cast %44 : vector<8x16x128xf32> to vector<128x128xf32>
    %c2_36 = arith.constant 2 : index
    %c0_37 = arith.constant 0 : index
    %c0_38 = arith.constant 0 : index
    %46 = vector.load %arg3[%c2_36, %c0_37, %c0_38] : memref<9x128x128xf32, #tpu.memory_space<vmem>>, vector<1x128x128xf32>
    %47 = vector.shape_cast %46 : vector<1x128x128xf32> to vector<128x128xf32>
    %cst_39 = arith.constant dense<0.000000e+00> : vector<128x128xf32>
    %48 = tpu.matmul %45, %47, %cst_39 {dimension_numbers = #tpu.dot_dimension_numbers<[1], [0], [0], [1], [0, 0, 1, 1], [], []>} : vector<128x128xf32>, vector<128x128xf32>, vector<128x128xf32> -> vector<128x128xf32>
    %49 = arith.addf %41, %48 : vector<128x128xf32>
    %c0_i32_40 = arith.constant 0 : i32
    %c0_i32_41 = arith.constant 0 : i32
    %c0_i32_42 = arith.constant 0 : i32
    %50 = tpu.memref_slice %arg6[%9, %c0_i32_40, %c0_i32_41, %c0_i32_42] : memref<2x10x18x128xf32, #tpu.memory_space<vmem>> -> memref<1x10x18x128xf32, #tpu.memory_space<vmem>>
    %51 = tpu.memref_squeeze %50 : memref<1x10x18x128xf32, #tpu.memory_space<vmem>> -> memref<10x18x128xf32, #tpu.memory_space<vmem>>
    %c1_43 = arith.constant 1 : index
    %c0_44 = arith.constant 0 : index
    %c0_45 = arith.constant 0 : index
    %52 = vector.load %51[%c1_43, %c0_44, %c0_45] : memref<10x18x128xf32, #tpu.memory_space<vmem>>, vector<8x16x128xf32>
    %53 = vector.shape_cast %52 : vector<8x16x128xf32> to vector<128x128xf32>
    %c3 = arith.constant 3 : index
    %c0_46 = arith.constant 0 : index
    %c0_47 = arith.constant 0 : index
    %54 = vector.load %arg3[%c3, %c0_46, %c0_47] : memref<9x128x128xf32, #tpu.memory_space<vmem>>, vector<1x128x128xf32>
    %55 = vector.shape_cast %54 : vector<1x128x128xf32> to vector<128x128xf32>
    %cst_48 = arith.constant dense<0.000000e+00> : vector<128x128xf32>
    %56 = tpu.matmul %53, %55, %cst_48 {dimension_numbers = #tpu.dot_dimension_numbers<[1], [0], [0], [1], [0, 0, 1, 1], [], []>} : vector<128x128xf32>, vector<128x128xf32>, vector<128x128xf32> -> vector<128x128xf32>
    %57 = arith.addf %49, %56 : vector<128x128xf32>
    %c0_i32_49 = arith.constant 0 : i32
    %c0_i32_50 = arith.constant 0 : i32
    %c0_i32_51 = arith.constant 0 : i32
    %58 = tpu.memref_slice %arg6[%9, %c0_i32_49, %c0_i32_50, %c0_i32_51] : memref<2x10x18x128xf32, #tpu.memory_space<vmem>> -> memref<1x10x18x128xf32, #tpu.memory_space<vmem>>
    %59 = tpu.memref_squeeze %58 : memref<1x10x18x128xf32, #tpu.memory_space<vmem>> -> memref<10x18x128xf32, #tpu.memory_space<vmem>>
    %c1_52 = arith.constant 1 : index
    %c1_53 = arith.constant 1 : index
    %c0_54 = arith.constant 0 : index
    %60 = vector.load %59[%c1_52, %c1_53, %c0_54] : memref<10x18x128xf32, #tpu.memory_space<vmem>>, vector<8x16x128xf32>
    %61 = vector.shape_cast %60 : vector<8x16x128xf32> to vector<128x128xf32>
    %c4 = arith.constant 4 : index
    %c0_55 = arith.constant 0 : index
    %c0_56 = arith.constant 0 : index
    %62 = vector.load %arg3[%c4, %c0_55, %c0_56] : memref<9x128x128xf32, #tpu.memory_space<vmem>>, vector<1x128x128xf32>
    %63 = vector.shape_cast %62 : vector<1x128x128xf32> to vector<128x128xf32>
    %cst_57 = arith.constant dense<0.000000e+00> : vector<128x128xf32>
    %64 = tpu.matmul %61, %63, %cst_57 {dimension_numbers = #tpu.dot_dimension_numbers<[1], [0], [0], [1], [0, 0, 1, 1], [], []>} : vector<128x128xf32>, vector<128x128xf32>, vector<128x128xf32> -> vector<128x128xf32>
    %65 = arith.addf %57, %64 : vector<128x128xf32>
    %c0_i32_58 = arith.constant 0 : i32
    %c0_i32_59 = arith.constant 0 : i32
    %c0_i32_60 = arith.constant 0 : i32
    %66 = tpu.memref_slice %arg6[%9, %c0_i32_58, %c0_i32_59, %c0_i32_60] : memref<2x10x18x128xf32, #tpu.memory_space<vmem>> -> memref<1x10x18x128xf32, #tpu.memory_space<vmem>>
    %67 = tpu.memref_squeeze %66 : memref<1x10x18x128xf32, #tpu.memory_space<vmem>> -> memref<10x18x128xf32, #tpu.memory_space<vmem>>
    %c1_61 = arith.constant 1 : index
    %c2_62 = arith.constant 2 : index
    %c0_63 = arith.constant 0 : index
    %68 = vector.load %67[%c1_61, %c2_62, %c0_63] : memref<10x18x128xf32, #tpu.memory_space<vmem>>, vector<8x16x128xf32>
    %69 = vector.shape_cast %68 : vector<8x16x128xf32> to vector<128x128xf32>
    %c5 = arith.constant 5 : index
    %c0_64 = arith.constant 0 : index
    %c0_65 = arith.constant 0 : index
    %70 = vector.load %arg3[%c5, %c0_64, %c0_65] : memref<9x128x128xf32, #tpu.memory_space<vmem>>, vector<1x128x128xf32>
    %71 = vector.shape_cast %70 : vector<1x128x128xf32> to vector<128x128xf32>
    %cst_66 = arith.constant dense<0.000000e+00> : vector<128x128xf32>
    %72 = tpu.matmul %69, %71, %cst_66 {dimension_numbers = #tpu.dot_dimension_numbers<[1], [0], [0], [1], [0, 0, 1, 1], [], []>} : vector<128x128xf32>, vector<128x128xf32>, vector<128x128xf32> -> vector<128x128xf32>
    %73 = arith.addf %65, %72 : vector<128x128xf32>
    %c0_i32_67 = arith.constant 0 : i32
    %c0_i32_68 = arith.constant 0 : i32
    %c0_i32_69 = arith.constant 0 : i32
    %74 = tpu.memref_slice %arg6[%9, %c0_i32_67, %c0_i32_68, %c0_i32_69] : memref<2x10x18x128xf32, #tpu.memory_space<vmem>> -> memref<1x10x18x128xf32, #tpu.memory_space<vmem>>
    %75 = tpu.memref_squeeze %74 : memref<1x10x18x128xf32, #tpu.memory_space<vmem>> -> memref<10x18x128xf32, #tpu.memory_space<vmem>>
    %c2_70 = arith.constant 2 : index
    %c0_71 = arith.constant 0 : index
    %c0_72 = arith.constant 0 : index
    %76 = vector.load %75[%c2_70, %c0_71, %c0_72] : memref<10x18x128xf32, #tpu.memory_space<vmem>>, vector<8x16x128xf32>
    %77 = vector.shape_cast %76 : vector<8x16x128xf32> to vector<128x128xf32>
    %c6 = arith.constant 6 : index
    %c0_73 = arith.constant 0 : index
    %c0_74 = arith.constant 0 : index
    %78 = vector.load %arg3[%c6, %c0_73, %c0_74] : memref<9x128x128xf32, #tpu.memory_space<vmem>>, vector<1x128x128xf32>
    %79 = vector.shape_cast %78 : vector<1x128x128xf32> to vector<128x128xf32>
    %cst_75 = arith.constant dense<0.000000e+00> : vector<128x128xf32>
    %80 = tpu.matmul %77, %79, %cst_75 {dimension_numbers = #tpu.dot_dimension_numbers<[1], [0], [0], [1], [0, 0, 1, 1], [], []>} : vector<128x128xf32>, vector<128x128xf32>, vector<128x128xf32> -> vector<128x128xf32>
    %81 = arith.addf %73, %80 : vector<128x128xf32>
    %c0_i32_76 = arith.constant 0 : i32
    %c0_i32_77 = arith.constant 0 : i32
    %c0_i32_78 = arith.constant 0 : i32
    %82 = tpu.memref_slice %arg6[%9, %c0_i32_76, %c0_i32_77, %c0_i32_78] : memref<2x10x18x128xf32, #tpu.memory_space<vmem>> -> memref<1x10x18x128xf32, #tpu.memory_space<vmem>>
    %83 = tpu.memref_squeeze %82 : memref<1x10x18x128xf32, #tpu.memory_space<vmem>> -> memref<10x18x128xf32, #tpu.memory_space<vmem>>
    %c2_79 = arith.constant 2 : index
    %c1_80 = arith.constant 1 : index
    %c0_81 = arith.constant 0 : index
    %84 = vector.load %83[%c2_79, %c1_80, %c0_81] : memref<10x18x128xf32, #tpu.memory_space<vmem>>, vector<8x16x128xf32>
    %85 = vector.shape_cast %84 : vector<8x16x128xf32> to vector<128x128xf32>
    %c7 = arith.constant 7 : index
    %c0_82 = arith.constant 0 : index
    %c0_83 = arith.constant 0 : index
    %86 = vector.load %arg3[%c7, %c0_82, %c0_83] : memref<9x128x128xf32, #tpu.memory_space<vmem>>, vector<1x128x128xf32>
    %87 = vector.shape_cast %86 : vector<1x128x128xf32> to vector<128x128xf32>
    %cst_84 = arith.constant dense<0.000000e+00> : vector<128x128xf32>
    %88 = tpu.matmul %85, %87, %cst_84 {dimension_numbers = #tpu.dot_dimension_numbers<[1], [0], [0], [1], [0, 0, 1, 1], [], []>} : vector<128x128xf32>, vector<128x128xf32>, vector<128x128xf32> -> vector<128x128xf32>
    %89 = arith.addf %81, %88 : vector<128x128xf32>
    %c0_i32_85 = arith.constant 0 : i32
    %c0_i32_86 = arith.constant 0 : i32
    %c0_i32_87 = arith.constant 0 : i32
    %90 = tpu.memref_slice %arg6[%9, %c0_i32_85, %c0_i32_86, %c0_i32_87] : memref<2x10x18x128xf32, #tpu.memory_space<vmem>> -> memref<1x10x18x128xf32, #tpu.memory_space<vmem>>
    %91 = tpu.memref_squeeze %90 : memref<1x10x18x128xf32, #tpu.memory_space<vmem>> -> memref<10x18x128xf32, #tpu.memory_space<vmem>>
    %c2_88 = arith.constant 2 : index
    %c2_89 = arith.constant 2 : index
    %c0_90 = arith.constant 0 : index
    %92 = vector.load %91[%c2_88, %c2_89, %c0_90] : memref<10x18x128xf32, #tpu.memory_space<vmem>>, vector<8x16x128xf32>
    %93 = vector.shape_cast %92 : vector<8x16x128xf32> to vector<128x128xf32>
    %c8 = arith.constant 8 : index
    %c0_91 = arith.constant 0 : index
    %c0_92 = arith.constant 0 : index
    %94 = vector.load %arg3[%c8, %c0_91, %c0_92] : memref<9x128x128xf32, #tpu.memory_space<vmem>>, vector<1x128x128xf32>
    %95 = vector.shape_cast %94 : vector<1x128x128xf32> to vector<128x128xf32>
    %cst_93 = arith.constant dense<0.000000e+00> : vector<128x128xf32>
    %96 = tpu.matmul %93, %95, %cst_93 {dimension_numbers = #tpu.dot_dimension_numbers<[1], [0], [0], [1], [0, 0, 1, 1], [], []>} : vector<128x128xf32>, vector<128x128xf32>, vector<128x128xf32> -> vector<128x128xf32>
    %97 = arith.addf %89, %96 : vector<128x128xf32>
    %c0_94 = arith.constant 0 : index
    %c0_95 = arith.constant 0 : index
    %98 = vector.load %arg4[%c0_94, %c0_95] : memref<1x128xf32, #tpu.memory_space<vmem>>, vector<1x128xf32>
    %99 = vector.broadcast %98 : vector<1x128xf32> to vector<128x128xf32>
    %100 = arith.addf %97, %99 : vector<128x128xf32>
    %c0_96 = arith.constant 0 : index
    %c0_97 = arith.constant 0 : index
    %c0_98 = arith.constant 0 : index
    %101 = vector.load %arg5[%c0_96, %c0_97, %c0_98] : memref<1x128x128xf32, #tpu.memory_space<vmem>>, vector<1x128x128xf32>
    %102 = vector.shape_cast %101 : vector<1x128x128xf32> to vector<128x128xf32>
    %103 = vector.shape_cast %100 : vector<128x128xf32> to vector<1x128x128xf32>
    tpu.vector_store %arg5[%c0_96, %c0_97, %c0_98], %103 {strides = array<i32>} : memref<1x128x128xf32, #tpu.memory_space<vmem>>, vector<1x128x128xf32>,
    return
  }
  func.func @transform_1(%arg0: i32, %arg1: i32) -> (i32, i32, i32) {
    %c0_i32 = arith.constant 0 : i32
    %c0_i32_0 = arith.constant 0 : i32
    %c0_i32_1 = arith.constant 0 : i32
    %c0_i32_2 = arith.constant 0 : i32
    return %c0_i32, %c0_i32_0, %c0_i32_1 : i32, i32, i32
  }
  func.func @transform_2(%arg0: i32, %arg1: i32) -> (i32, i32) {
    %c0_i32 = arith.constant 0 : i32
    %c0_i32_0 = arith.constant 0 : i32
    %c0_i32_1 = arith.constant 0 : i32
    return %c0_i32, %c0_i32_0 : i32, i32
  }
  func.func @transform_3(%arg0: i32, %arg1: i32) -> (i32, i32, i32) {
    %c0_i32 = arith.constant 0 : i32
    %c0_i32_0 = arith.constant 0 : i32
    return %arg0, %arg1, %c0_i32 : i32, i32, i32
  }
}

module attributes {stable_mosaic.version = 11 : i64} {
  func.func @_inorm_kernel(%arg0: i32, %arg1: i32, %arg2: memref<1x256x128xf32, #tpu.memory_space<vmem>>, %arg3: memref<1x256x128xf32, #tpu.memory_space<vmem>>) attributes {dimension_semantics = [#tpu.dimension_semantics<parallel>, #tpu.dimension_semantics<parallel>], iteration_bounds = array<i64: 2, 1>, scalar_prefetch = 0 : i64, scratch_operands = 0 : i64, tpu.core_type = #tpu.core_type<tc>, window_params = [{transform_indices = @transform_0, window_bounds = array<i64: 1, 256, 128>}, {transform_indices = @transform_1, window_bounds = array<i64: 1, 256, 128>}]} {
    %c0 = arith.constant 0 : index
    %c0_0 = arith.constant 0 : index
    %c0_1 = arith.constant 0 : index
    %0 = vector.load %arg2[%c0, %c0_0, %c0_1] : memref<1x256x128xf32, #tpu.memory_space<vmem>>, vector<1x256x128xf32>
    %cst = arith.constant dense<0.000000e+00> : vector<1x128xf32>
    %1 = vector.multi_reduction <add>, %0, %cst [1] : vector<1x256x128xf32> to vector<1x128xf32>
    %2 = vector.shape_cast %1 : vector<1x128xf32> to vector<1x1x128xf32>
    %cst_2 = arith.constant 2.560000e+02 : f32
    %3 = vector.broadcast %cst_2 : f32 to vector<1x1x128xf32>
    %4 = arith.divf %2, %3 : vector<1x1x128xf32>
    %5 = vector.broadcast %4 : vector<1x1x128xf32> to vector<1x256x128xf32>
    %6 = arith.subf %0, %5 : vector<1x256x128xf32>
    %7 = arith.mulf %6, %6 : vector<1x256x128xf32>
    %cst_3 = arith.constant dense<0.000000e+00> : vector<1x128xf32>
    %8 = vector.multi_reduction <add>, %7, %cst_3 [1] : vector<1x256x128xf32> to vector<1x128xf32>
    %9 = vector.shape_cast %8 : vector<1x128xf32> to vector<1x1x128xf32>
    %cst_4 = arith.constant 2.560000e+02 : f32
    %10 = vector.broadcast %cst_4 : f32 to vector<1x1x128xf32>
    %11 = arith.divf %9, %10 : vector<1x1x128xf32>
    %cst_5 = arith.constant 9.99999974E-6 : f32
    %12 = vector.broadcast %cst_5 : f32 to vector<1x1x128xf32>
    %13 = arith.addf %11, %12 : vector<1x1x128xf32>
    %14 = math.rsqrt %13 : vector<1x1x128xf32>
    %15 = vector.broadcast %14 : vector<1x1x128xf32> to vector<1x256x128xf32>
    %16 = arith.mulf %6, %15 : vector<1x256x128xf32>
    %cst_6 = arith.constant 0.000000e+00 : f32
    %17 = vector.broadcast %cst_6 : f32 to vector<1x256x128xf32>
    %18 = arith.maximumf %16, %17 : vector<1x256x128xf32>
    %c0_7 = arith.constant 0 : index
    %c0_8 = arith.constant 0 : index
    %c0_9 = arith.constant 0 : index
    %19 = vector.load %arg3[%c0_7, %c0_8, %c0_9] : memref<1x256x128xf32, #tpu.memory_space<vmem>>, vector<1x256x128xf32>
    tpu.vector_store %arg3[%c0_7, %c0_8, %c0_9], %18 {strides = array<i32>} : memref<1x256x128xf32, #tpu.memory_space<vmem>>, vector<1x256x128xf32>,
    return
  }
  func.func @transform_0(%arg0: i32, %arg1: i32) -> (i32, i32, i32) {
    %c0_i32 = arith.constant 0 : i32
    %c0_i32_0 = arith.constant 0 : i32
    return %arg0, %c0_i32, %arg1 : i32, i32, i32
  }
  func.func @transform_1(%arg0: i32, %arg1: i32) -> (i32, i32, i32) {
    %c0_i32 = arith.constant 0 : i32
    %c0_i32_0 = arith.constant 0 : i32
    return %arg0, %c0_i32, %arg1 : i32, i32, i32
  }
}

module attributes {stable_mosaic.version = 11 : i64} {
  func.func @_inorm_add_kernel(%arg0: i32, %arg1: i32, %arg2: memref<1x256x128xf32, #tpu.memory_space<vmem>>, %arg3: memref<1x256x128xf32, #tpu.memory_space<vmem>>, %arg4: memref<1x256x128xf32, #tpu.memory_space<vmem>>) attributes {dimension_semantics = [#tpu.dimension_semantics<parallel>, #tpu.dimension_semantics<parallel>], iteration_bounds = array<i64: 2, 1>, scalar_prefetch = 0 : i64, scratch_operands = 0 : i64, tpu.core_type = #tpu.core_type<tc>, window_params = [{transform_indices = @transform_0, window_bounds = array<i64: 1, 256, 128>}, {transform_indices = @transform_1, window_bounds = array<i64: 1, 256, 128>}, {transform_indices = @transform_2, window_bounds = array<i64: 1, 256, 128>}]} {
    %c0 = arith.constant 0 : index
    %c0_0 = arith.constant 0 : index
    %c0_1 = arith.constant 0 : index
    %0 = vector.load %arg2[%c0, %c0_0, %c0_1] : memref<1x256x128xf32, #tpu.memory_space<vmem>>, vector<1x256x128xf32>
    %cst = arith.constant dense<0.000000e+00> : vector<1x128xf32>
    %1 = vector.multi_reduction <add>, %0, %cst [1] : vector<1x256x128xf32> to vector<1x128xf32>
    %2 = vector.shape_cast %1 : vector<1x128xf32> to vector<1x1x128xf32>
    %cst_2 = arith.constant 2.560000e+02 : f32
    %3 = vector.broadcast %cst_2 : f32 to vector<1x1x128xf32>
    %4 = arith.divf %2, %3 : vector<1x1x128xf32>
    %5 = vector.broadcast %4 : vector<1x1x128xf32> to vector<1x256x128xf32>
    %6 = arith.subf %0, %5 : vector<1x256x128xf32>
    %7 = arith.mulf %6, %6 : vector<1x256x128xf32>
    %cst_3 = arith.constant dense<0.000000e+00> : vector<1x128xf32>
    %8 = vector.multi_reduction <add>, %7, %cst_3 [1] : vector<1x256x128xf32> to vector<1x128xf32>
    %9 = vector.shape_cast %8 : vector<1x128xf32> to vector<1x1x128xf32>
    %cst_4 = arith.constant 2.560000e+02 : f32
    %10 = vector.broadcast %cst_4 : f32 to vector<1x1x128xf32>
    %11 = arith.divf %9, %10 : vector<1x1x128xf32>
    %cst_5 = arith.constant 9.99999974E-6 : f32
    %12 = vector.broadcast %cst_5 : f32 to vector<1x1x128xf32>
    %13 = arith.addf %11, %12 : vector<1x1x128xf32>
    %14 = math.rsqrt %13 : vector<1x1x128xf32>
    %15 = vector.broadcast %14 : vector<1x1x128xf32> to vector<1x256x128xf32>
    %16 = arith.mulf %6, %15 : vector<1x256x128xf32>
    %c0_6 = arith.constant 0 : index
    %c0_7 = arith.constant 0 : index
    %c0_8 = arith.constant 0 : index
    %17 = vector.load %arg3[%c0_6, %c0_7, %c0_8] : memref<1x256x128xf32, #tpu.memory_space<vmem>>, vector<1x256x128xf32>
    %18 = arith.addf %16, %17 : vector<1x256x128xf32>
    %c0_9 = arith.constant 0 : index
    %c0_10 = arith.constant 0 : index
    %c0_11 = arith.constant 0 : index
    %19 = vector.load %arg4[%c0_9, %c0_10, %c0_11] : memref<1x256x128xf32, #tpu.memory_space<vmem>>, vector<1x256x128xf32>
    tpu.vector_store %arg4[%c0_9, %c0_10, %c0_11], %18 {strides = array<i32>} : memref<1x256x128xf32, #tpu.memory_space<vmem>>, vector<1x256x128xf32>,
    return
  }
  func.func @transform_0(%arg0: i32, %arg1: i32) -> (i32, i32, i32) {
    %c0_i32 = arith.constant 0 : i32
    %c0_i32_0 = arith.constant 0 : i32
    return %arg0, %c0_i32, %arg1 : i32, i32, i32
  }
  func.func @transform_1(%arg0: i32, %arg1: i32) -> (i32, i32, i32) {
    %c0_i32 = arith.constant 0 : i32
    %c0_i32_0 = arith.constant 0 : i32
    return %arg0, %c0_i32, %arg1 : i32, i32, i32
  }
  func.func @transform_2(%arg0: i32, %arg1: i32) -> (i32, i32, i32) {
    %c0_i32 = arith.constant 0 : i32
    %c0_i32_0 = arith.constant 0 : i32
    return %arg0, %c0_i32, %arg1 : i32, i32, i32
  }
}

</mosaic_0001>

<bundles_post_ra>
// kernel: _lambda_.5
= control target key start
LH: loop header
LB: loop body
LE: loop exit
PB: predicated region body
PF: predicated region fallthrough
CT: control target
= control target key end

     0   :  { %s594_s6 = smov 0   ;;  %s596_s7 = smov 0   ;;  %s1062_s0 = inlined_call_operand.vmem [shape: f32[2,256,128], index: 0, kind: input, shape index: {}]   ;;  %s1063_s1 = inlined_call_operand.vmem [shape: f32[2,256,128], index: 1, kind: output, shape index: {}]  }
   0x1   :  { %s598_s8 = smov 0  }
   0x2 LB: > { %s23_s9 = sadd.s32 1, %s577_s7  ;;  %p521_p0 = scmp.ge.s32.totalorder %s581_s8, 1  ;;  %s581_s8 = sphi %s598_s8, %s11_s8   ;;  %s577_s7 = sphi %s596_s7, %s1065_s7   ;;  %s573_s6 = sphi %s594_s6, %s1064_s6  }
   0x3   : > { %p25_p1 = scmp.ge.s32.totalorder %s23_s9, 2  ;;  %p106_p2 = scmp.lt.s32.totalorder %s581_s8, 3 }
   0x5   : > { %s1067_s9 = smov (%p25_p1, %s23_s9), 0  ;;  %p107_p3 = pnand %p521_p0, %p106_p2 }
   0x6   : > { %p132_p4 = scmp.lt.s32.totalorder (!%p107_p3), %s573_s6, 1 }
   0x7   : > { %110 = sbr.rel (%p107_p3) target bundleno = 228 (0xe4), region = 24 }
   0xc   : > { %s1069_s6 = smov (!%p132_p4, %s573_s6), 1  ;;  %v583_v56 = vmov 256.0  }
   0xd   : > { %s528_s10 = sshll.u32 %s1069_s6, 8  ;;  %555 = vrcp.f32 %v583_v56 }
   0xe   : > { %s620_s13 = scalar_lea.vmem %s1062_s0, %s528_s10  ;;  %s963_s16 = scalar_lea.vmem %s1063_s1, %s528_s10 }
   0xf   : > { %v623_v0 = vld [vmem:[%s620_s13] sm:$0xff]  ;;  %v626_v1 = vld [vmem:[%s620_s13 + $0x8] sm:$0xff]  ;;  %v629_v2 = vld [vmem:[%s620_s13 + $0x10] sm:$0xff] }
  0x10   : > { %v180_v3 = vadd.f32 %v626_v1, %v623_v0  ;;  %v634_v4 = vld [vmem:[%s620_s13 + $0x18] sm:$0xff]  ;;  %v638_v6 = vld [vmem:[%s620_s13 + $0x20] sm:$0xff]  ;;  %v642_v8 = vld [vmem:[%s620_s13 + $0x28] sm:$0xff] }
  0x11   : > { %v646_v10 = vld [vmem:[%s620_s13 + $0x30] sm:$0xff]  ;;  %v650_v12 = vld [vmem:[%s620_s13 + $0x38] sm:$0xff]  ;;  %v654_v14 = vld [vmem:[%s620_s13 + $0x40] sm:$0xff] }
  0x12   : > { %v181_v5 = vadd.f32 %v180_v3, %v629_v2  ;;  %v658_v16 = vld [vmem:[%s620_s13 + $0x48] sm:$0xff]  ;;  %v662_v18 = vld [vmem:[%s620_s13 + $0x50] sm:$0xff]  ;;  %v666_v20 = vld [vmem:[%s620_s13 + $0x58] sm:$0xff] }
  0x13   : > { %v670_v22 = vld [vmem:[%s620_s13 + $0x60] sm:$0xff]  ;;  %v674_v24 = vld [vmem:[%s620_s13 + $0x68] sm:$0xff]  ;;  %v678_v26 = vld [vmem:[%s620_s13 + $0x70] sm:$0xff]  ;;  %v556_v62 = vpop.eup %555 }
  0x14   : > { %v182_v7 = vadd.f32 %v181_v5, %v634_v4  ;;  %v682_v28 = vld [vmem:[%s620_s13 + $0x78] sm:$0xff]  ;;  %v686_v30 = vld [vmem:[%s620_s13 + $0x80] sm:$0xff]  ;;  %v690_v32 = vld [vmem:[%s620_s13 + $0x88] sm:$0xff]  ;;  %v218_v5 = vmul.f32 256.0, %v556_v62  ;;  %vm222_vm0 = vweird.f32 %v556_v62 }
  0x15   : > { %v694_v34 = vld [vmem:[%s620_s13 + $0x90] sm:$0xff]  ;;  %v698_v36 = vld [vmem:[%s620_s13 + $0x98] sm:$0xff]  ;;  %v702_v38 = vld [vmem:[%s620_s13 + $0xa0] sm:$0xff] }
  0x16   : > { %v183_v9 = vadd.f32 %v182_v7, %v638_v6  ;;  %v706_v40 = vld [vmem:[%s620_s13 + $0xa8] sm:$0xff]  ;;  %v710_v42 = vld [vmem:[%s620_s13 + $0xb0] sm:$0xff]  ;;  %v714_v44 = vld [vmem:[%s620_s13 + $0xb8] sm:$0xff] }
  0x17   : > { %v718_v46 = vld [vmem:[%s620_s13 + $0xc0] sm:$0xff]  ;;  %v722_v48 = vld [vmem:[%s620_s13 + $0xc8] sm:$0xff]  ;;  %v726_v50 = vld [vmem:[%s620_s13 + $0xd0] sm:$0xff] }
  0x18   : > { %v184_v11 = vadd.f32 %v183_v9, %v642_v8  ;;  %v730_v52 = vld [vmem:[%s620_s13 + $0xd8] sm:$0xff]  ;;  %v734_v54 = vld [vmem:[%s620_s13 + $0xe0] sm:$0xff]  ;;  %v738_v57 = vld [vmem:[%s620_s13 + $0xe8] sm:$0xff] }
  0x19   : > { %v742_v59 = vld [vmem:[%s620_s13 + $0xf0] sm:$0xff]  ;;  %v746_v61 = vld [vmem:[%s620_s13 + $0xf8] sm:$0xff] }
  0x1a   : > { %v185_v13 = vadd.f32 %v184_v11, %v646_v10  ;;  %v219_v11 = vsub.f32 1.0, %v218_v5 }
  0x1c   : > { %v186_v15 = vadd.f32 %v185_v13, %v650_v12 }
  0x1e   : > { %v187_v17 = vadd.f32 %v186_v15, %v654_v14 }
  0x20   : > { %v188_v19 = vadd.f32 %v187_v17, %v658_v16  ;;  %v220_v17 = vmul.f32 %v556_v62, %v219_v11 }
  0x22   : > { %v189_v21 = vadd.f32 %v188_v19, %v662_v18 }
  0x24   : > { %v190_v23 = vadd.f32 %v189_v21, %v666_v20  ;;  %v221_v21 = vadd.f32 %v556_v62, %v220_v17 }
  0x26   : > { %v191_v25 = vadd.f32 %v190_v23, %v670_v22 }
  0x28   : > { %v192_v27 = vadd.f32 %v191_v25, %v674_v24  ;;  %v750_v25 = vsel %vm222_vm0, %v556_v62, %v221_v21 }
  0x2a   : > { %v193_v29 = vadd.f32 %v192_v27, %v678_v26 }
  0x2c   : > { %v194_v31 = vadd.f32 %v193_v29, %v682_v28 }
  0x2e   : > { %v195_v33 = vadd.f32 %v194_v31, %v686_v30 }
  0x30   : > { %v196_v35 = vadd.f32 %v195_v33, %v690_v32 }
  0x32   : > { %v197_v37 = vadd.f32 %v196_v35, %v694_v34 }
  0x34   : > { %v198_v39 = vadd.f32 %v197_v37, %v698_v36 }
  0x36   : > { %v199_v41 = vadd.f32 %v198_v39, %v702_v38 }
  0x38   : > { %v200_v43 = vadd.f32 %v199_v41, %v706_v40 }
  0x3a   : > { %v201_v45 = vadd.f32 %v200_v43, %v710_v42 }
  0x3c   : > { %v202_v47 = vadd.f32 %v201_v45, %v714_v44 }
  0x3e   : > { %v203_v49 = vadd.f32 %v202_v47, %v718_v46 }
  0x40   : > { %v204_v51 = vadd.f32 %v203_v49, %v722_v48 }
  0x42   : > { %v205_v53 = vadd.f32 %v204_v51, %v726_v50 }
  0x44   : > { %v206_v55 = vadd.f32 %v205_v53, %v730_v52 }
  0x46   : > { %v207_v58 = vadd.f32 %v206_v55, %v734_v54 }
  0x48   : > { %v208_v60 = vadd.f32 %v207_v58, %v738_v57 }
  0x4a   : > { %v209_v63 = vadd.f32 %v208_v60, %v742_v59 }
  0x4c   : > { %v210_v3 = vadd.f32 %v209_v63, %v746_v61 }
  0x4e   : > { %v211_v7 = vrot.slane %v210_v3, 4 }
  0x50   : > { %v212_v9 = vadd.f32 %v211_v7, %v210_v3 }
  0x52   : > { %v213_v13 = vrot.slane %v212_v9, 2 }
  0x54   : > { %v214_v15 = vadd.f32 %v213_v13, %v212_v9 }
  0x56   : > { %v215_v19 = vrot.slane %v214_v15, 1 }
  0x58   : > { %v216_v23 = vadd.f32 %v215_v19, %v214_v15 }
  0x5a   : > { %v753_v27 = vmul.f32 %v750_v25, %v216_v23 }
  0x5c   : > { %v757_v29 = vsub.f32 %v623_v0, %v753_v27  ;;  %v761_v31 = vsub.f32 %v626_v1, %v753_v27  ;;  %v765_v33 = vsub.f32 %v629_v2, %v753_v27  ;;  %v769_v35 = vsub.f32 %v634_v4, %v753_v27 }
  0x5d   : > { %v777_v0 = vsub.f32 %v638_v6, %v753_v27  ;;  %v783_v2 = vsub.f32 %v642_v8, %v753_v27  ;;  %v789_v43 = vsub.f32 %v646_v10, %v753_v27  ;;  %v795_v47 = vsub.f32 %v650_v12, %v753_v27 }
  0x5e   : > { %v257_v37 = vmul.f32 %v757_v29, %v757_v29  ;;  %v258_v39 = vmul.f32 %v761_v31, %v761_v31  ;;  %v259_v1 = vmul.f32 %v765_v33, %v765_v33  ;;  %v260_v4 = vmul.f32 %v769_v35, %v769_v35 }
  0x5f   : > { %v261_v45 = vmul.f32 %v777_v0, %v777_v0  ;;  %v262_v8 = vmul.f32 %v783_v2, %v783_v2  ;;  %v801_v51 = vsub.f32 %v654_v14, %v753_v27  ;;  %v263_v10 = vmul.f32 %v789_v43, %v789_v43 }
  0x60   : > { %v289_v41 = vadd.f32 %v258_v39, %v257_v37  ;;  %v807_v55 = vsub.f32 %v658_v16, %v753_v27  ;;  %v264_v12 = vmul.f32 %v795_v47, %v795_v47  ;;  %v813_v58 = vsub.f32 %v662_v18, %v753_v27 }
  0x61   : > { %v265_v14 = vmul.f32 %v801_v51, %v801_v51  ;;  %v819_v62 = vsub.f32 %v666_v20, %v753_v27  ;;  %v825_v3 = vsub.f32 %v670_v22, %v753_v27  ;;  %v831_v7 = vsub.f32 %v674_v24, %v753_v27 }
  0x62   : > { %v290_v6 = vadd.f32 %v289_v41, %v259_v1  ;;  %v266_v16 = vmul.f32 %v807_v55, %v807_v55  ;;  %v267_v18 = vmul.f32 %v813_v58, %v813_v58  ;;  %v837_v11 = vsub.f32 %v678_v26, %v753_v27 }
  0x63   : > { %v268_v20 = vmul.f32 %v819_v62, %v819_v62  ;;  %v269_v22 = vmul.f32 %v825_v3, %v825_v3  ;;  %v843_v15 = vsub.f32 %v682_v28, %v753_v27  ;;  %v270_v24 = vmul.f32 %v831_v7, %v831_v7 }
  0x64   : > { %v291_v49 = vadd.f32 %v290_v6, %v260_v4  ;;  %v849_v19 = vsub.f32 %v686_v30, %v753_v27  ;;  %v271_v26 = vmul.f32 %v837_v11, %v837_v11  ;;  %v855_v23 = vsub.f32 %v690_v32, %v753_v27 }
  0x65   : > { %v272_v28 = vmul.f32 %v843_v15, %v843_v15  ;;  %v861_v39 = vsub.f32 %v694_v34, %v753_v27  ;;  %v867_v4 = vsub.f32 %v698_v36, %v753_v27 }
  0x66   : > { %v292_v53 = vadd.f32 %v291_v49, %v261_v45  ;;  %v273_v30 = vmul.f32 %v849_v19, %v849_v19  ;;  %v274_v32 = vmul.f32 %v855_v23, %v855_v23  ;;  %v873_v45 = vsub.f32 %v702_v38, %v753_v27 }
  0x67   : > { %v275_v34 = vmul.f32 %v861_v39, %v861_v39  ;;  %v276_v36 = vmul.f32 %v867_v4, %v867_v4 }
  0x68   : > { %v293_v56 = vadd.f32 %v292_v53, %v262_v8  ;;  %v879_v8 = vsub.f32 %v706_v40, %v753_v27  ;;  %v277_v38 = vmul.f32 %v873_v45, %v873_v45 }
  0x6a   : > { %v294_v60 = vadd.f32 %v293_v56, %v263_v10  ;;  %v885_v10 = vsub.f32 %v710_v42, %v753_v27  ;;  %v278_v40 = vmul.f32 %v879_v8, %v879_v8 }
  0x6c   : > { %v295_v63 = vadd.f32 %v294_v60, %v264_v12  ;;  %v891_v12 = vsub.f32 %v714_v44, %v753_v27  ;;  %v279_v42 = vmul.f32 %v885_v10, %v885_v10 }
  0x6e   : > { %v296_v5 = vadd.f32 %v295_v63, %v265_v14  ;;  %v897_v14 = vsub.f32 %v718_v46, %v753_v27  ;;  %v280_v44 = vmul.f32 %v891_v12, %v891_v12 }
  0x70   : > { %v297_v9 = vadd.f32 %v296_v5, %v266_v16  ;;  %v903_v16 = vsub.f32 %v722_v48, %v753_v27  ;;  %v281_v46 = vmul.f32 %v897_v14, %v897_v14 }
  0x72   : > { %v298_v13 = vadd.f32 %v297_v9, %v267_v18  ;;  %v909_v18 = vsub.f32 %v726_v50, %v753_v27  ;;  %v282_v48 = vmul.f32 %v903_v16, %v903_v16 }
  0x74   : > { %v299_v17 = vadd.f32 %v298_v13, %v268_v20  ;;  %v915_v20 = vsub.f32 %v730_v52, %v753_v27  ;;  %v283_v50 = vmul.f32 %v909_v18, %v909_v18 }
  0x76   : > { %v300_v21 = vadd.f32 %v299_v17, %v269_v22  ;;  %v921_v22 = vsub.f32 %v734_v54, %v753_v27  ;;  %v284_v52 = vmul.f32 %v915_v20, %v915_v20 }
  0x78   : > { %v301_v37 = vadd.f32 %v300_v21, %v270_v24  ;;  %v927_v24 = vsub.f32 %v738_v57, %v753_v27  ;;  %v285_v54 = vmul.f32 %v921_v22, %v921_v22 }
  0x7a   : > { %v302_v1 = vadd.f32 %v301_v37, %v271_v26  ;;  %v933_v26 = vsub.f32 %v742_v59, %v753_v27  ;;  %v286_v57 = vmul.f32 %v927_v24, %v927_v24 }
  0x7c   : > { %v303_v41 = vadd.f32 %v302_v1, %v272_v28  ;;  %v939_v28 = vsub.f32 %v746_v61, %v753_v27 }
  0x7e   : > { %v304_v6 = vadd.f32 %v303_v41, %v273_v30  ;;  %v287_v30 = vmul.f32 %v933_v26, %v933_v26  ;;  %v288_v59 = vmul.f32 %v939_v28, %v939_v28 }
  0x80   : > { %v305_v49 = vadd.f32 %v304_v6, %v274_v32 }
  0x82   : > { %v306_v53 = vadd.f32 %v305_v49, %v275_v34 }
  0x84   : > { %v307_v56 = vadd.f32 %v306_v53, %v276_v36 }
  0x86   : > { %v308_v60 = vadd.f32 %v307_v56, %v277_v38 }
  0x88   : > { %v309_v63 = vadd.f32 %v308_v60, %v278_v40 }
  0x8a   : > { %v310_v5 = vadd.f32 %v309_v63, %v279_v42 }
  0x8c   : > { %v311_v9 = vadd.f32 %v310_v5, %v280_v44 }
  0x8e   : > { %v312_v13 = vadd.f32 %v311_v9, %v281_v46 }
  0x90   : > { %v313_v17 = vadd.f32 %v312_v13, %v282_v48 }
  0x92   : > { %v314_v21 = vadd.f32 %v313_v17, %v283_v50 }
  0x94   : > { %v315_v37 = vadd.f32 %v314_v21, %v284_v52 }
  0x96   : > { %v316_v1 = vadd.f32 %v315_v37, %v285_v54 }
  0x98   : > { %v317_v32 = vadd.f32 %v316_v1, %v286_v57 }
  0x9a   : > { %v318_v41 = vadd.f32 %v317_v32, %v287_v30 }
  0x9c   : > { %v319_v34 = vadd.f32 %v318_v41, %v288_v59 }
  0x9e   : > { %v320_v6 = vrot.slane %v319_v34, 4 }
  0xa0   : > { %v321_v36 = vadd.f32 %v320_v6, %v319_v34 }
  0xa2   : > { %v322_v49 = vrot.slane %v321_v36, 2 }
  0xa4   : > { %v323_v38 = vadd.f32 %v322_v49, %v321_v36 }
  0xa6   : > { %v324_v61 = vrot.slane %v323_v38, 1 }
  0xa8   : > { %v325_v27 = vadd.f32 %v324_v61, %v323_v38 }
  0xaa   : > { %v326_v53 = vmul.f32 %v325_v27, %v750_v25 }
  0xac   : > { %v327_v40 = vadd.f32 1e-05, %v326_v53 }
  0xae   : > { %557 = vrsqrt.f32 %v327_v40  ;;  %vm334_vm1 = vweird.f32 %v327_v40 }
  0xb4   : > { %v558_v56 = vpop.eup %557 }
  0xb5   : > { %v329_v42 = vmul.f32 %v558_v56, %v327_v40  ;;  %vm335_vm2 = vweird.f32 %v558_v56 }
  0xb6   : > { %vm336_vm3 = vmor %vm334_vm1, %vm335_vm2 }
  0xb7   : > { %v330_v60 = vmul.f32 %v558_v56, %v329_v42 }
  0xb9   : > { %v331_v44 = vmul.f32 0.5, %v330_v60 }
  0xbb   : > { %v332_v63 = vsub.f32 1.5, %v331_v44 }
  0xbd   : > { %v333_v46 = vmul.f32 %v558_v56, %v332_v63 }
  0xbf   : > { %v948_v5 = vsel %vm336_vm3, %v558_v56, %v333_v46 }
  0xc0   : > { %v338_v48 = vmul.f32 %v948_v5, %v757_v29  ;;  %v339_v25 = vmul.f32 %v948_v5, %v761_v31  ;;  %v340_v9 = vmul.f32 %v948_v5, %v765_v33  ;;  %v341_v50 = vmul.f32 %v948_v5, %v769_v35 }
  0xc1   : > { %v342_v29 = vmul.f32 %v948_v5, %v777_v0  ;;  %v343_v31 = vmul.f32 %v948_v5, %v783_v2  ;;  %v344_v35 = vmul.f32 %v948_v5, %v789_v43  ;;  %v345_v54 = vmul.f32 %v948_v5, %v795_v47 }
  0xc2   : > { %v370_v33 = vmax.f32 %v338_v48, 0.0  ;;  %v371_v13 = vmax.f32 %v339_v25, 0.0  ;;  %v372_v52 = vmax.f32 %v340_v9, 0.0  ;;  %v373_v17 = vmax.f32 %v341_v50, 0.0 }
  0xc3   : > { %v374_v21 = vmax.f32 %v342_v29, 0.0  ;;  %v346_v0 = vmul.f32 %v948_v5, %v801_v51  ;;  %v375_v2 = vmax.f32 %v343_v31, 0.0  ;;  %v347_v57 = vmul.f32 %v948_v5, %v807_v55 }
  0xc4   : > { %402 = vst [vmem:[%s963_s16] sm:$0xff] %v370_v33  ;;  %v376_v37 = vmax.f32 %v344_v35, 0.0  ;;  %v348_v43 = vmul.f32 %v948_v5, %v813_v58  ;;  %v377_v47 = vmax.f32 %v345_v54, 0.0  ;;  %v349_v30 = vmul.f32 %v948_v5, %v819_v62 }
  0xc5   : > { %403 = vst [vmem:[%s963_s16 + $0x8] sm:$0xff] %v371_v13  ;;  %v378_v51 = vmax.f32 %v346_v0, 0.0  ;;  %v350_v1 = vmul.f32 %v948_v5, %v825_v3  ;;  %v379_v55 = vmax.f32 %v347_v57, 0.0  ;;  %v351_v59 = vmul.f32 %v948_v5, %v831_v7 }
  0xc6   : > { %404 = vst [vmem:[%s963_s16 + $0x10] sm:$0xff] %v372_v52  ;;  %v380_v58 = vmax.f32 %v348_v43, 0.0  ;;  %v352_v32 = vmul.f32 %v948_v5, %v837_v11  ;;  %v381_v62 = vmax.f32 %v349_v30, 0.0  ;;  %v353_v41 = vmul.f32 %v948_v5, %v843_v15 }
  0xc7   : > { %405 = vst [vmem:[%s963_s16 + $0x18] sm:$0xff] %v373_v17  ;;  %v382_v3 = vmax.f32 %v350_v1, 0.0  ;;  %v354_v34 = vmul.f32 %v948_v5, %v849_v19  ;;  %v383_v7 = vmax.f32 %v351_v59, 0.0  ;;  %v355_v6 = vmul.f32 %v948_v5, %v855_v23 }
  0xc8   : > { %406 = vst [vmem:[%s963_s16 + $0x20] sm:$0xff] %v374_v21  ;;  %v384_v11 = vmax.f32 %v352_v32, 0.0  ;;  %v356_v36 = vmul.f32 %v948_v5, %v861_v39  ;;  %v385_v15 = vmax.f32 %v353_v41, 0.0  ;;  %v357_v49 = vmul.f32 %v948_v5, %v867_v4 }
  0xc9   : > { %407 = vst [vmem:[%s963_s16 + $0x28] sm:$0xff] %v375_v2  ;;  %v386_v19 = vmax.f32 %v354_v34, 0.0  ;;  %v358_v38 = vmul.f32 %v948_v5, %v873_v45  ;;  %v387_v23 = vmax.f32 %v355_v6, 0.0  ;;  %v359_v61 = vmul.f32 %v948_v5, %v879_v8 }
  0xca   : > { %408 = vst [vmem:[%s963_s16 + $0x30] sm:$0xff] %v376_v37  ;;  %v388_v39 = vmax.f32 %v356_v36, 0.0  ;;  %v360_v27 = vmul.f32 %v948_v5, %v885_v10  ;;  %v389_v4 = vmax.f32 %v357_v49, 0.0  ;;  %v361_v53 = vmul.f32 %v948_v5, %v891_v12 }
  0xcb   : > { %409 = vst [vmem:[%s963_s16 + $0x38] sm:$0xff] %v377_v47  ;;  %v390_v45 = vmax.f32 %v358_v38, 0.0  ;;  %v362_v40 = vmul.f32 %v948_v5, %v897_v14  ;;  %v391_v8 = vmax.f32 %v359_v61, 0.0  ;;  %v363_v56 = vmul.f32 %v948_v5, %v903_v16 }
  0xcc   : > { %410 = vst [vmem:[%s963_s16 + $0x40] sm:$0xff] %v378_v51  ;;  %v392_v10 = vmax.f32 %v360_v27, 0.0  ;;  %v364_v42 = vmul.f32 %v948_v5, %v909_v18  ;;  %v393_v12 = vmax.f32 %v361_v53, 0.0  ;;  %v365_v60 = vmul.f32 %v948_v5, %v915_v20 }
  0xcd   : > { %411 = vst [vmem:[%s963_s16 + $0x48] sm:$0xff] %v379_v55  ;;  %v394_v14 = vmax.f32 %v362_v40, 0.0  ;;  %v366_v44 = vmul.f32 %v948_v5, %v921_v22  ;;  %v395_v16 = vmax.f32 %v363_v56, 0.0  ;;  %v367_v18 = vmul.f32 %v948_v5, %v927_v24 }
  0xce   : > { %412 = vst [vmem:[%s963_s16 + $0x50] sm:$0xff] %v380_v58  ;;  %v396_v63 = vmax.f32 %v364_v42, 0.0  ;;  %v368_v20 = vmul.f32 %v948_v5, %v933_v26  ;;  %v397_v46 = vmax.f32 %v365_v60, 0.0  ;;  %v369_v22 = vmul.f32 %v948_v5, %v939_v28 }
  0xcf   : > { %413 = vst [vmem:[%s963_s16 + $0x58] sm:$0xff] %v381_v62  ;;  %v398_v48 = vmax.f32 %v366_v44, 0.0  ;;  %v399_v25 = vmax.f32 %v367_v18, 0.0 }
  0xd0   : > { %414 = vst [vmem:[%s963_s16 + $0x60] sm:$0xff] %v382_v3  ;;  %v400_v9 = vmax.f32 %v368_v20, 0.0  ;;  %v401_v24 = vmax.f32 %v369_v22, 0.0 }
  0xd1   : > { %415 = vst [vmem:[%s963_s16 + $0x68] sm:$0xff] %v383_v7 }
  0xd2   : > { %416 = vst [vmem:[%s963_s16 + $0x70] sm:$0xff] %v384_v11 }
  0xd3   : > { %417 = vst [vmem:[%s963_s16 + $0x78] sm:$0xff] %v385_v15 }
  0xd4   : > { %418 = vst [vmem:[%s963_s16 + $0x80] sm:$0xff] %v386_v19 }
  0xd5   : > { %419 = vst [vmem:[%s963_s16 + $0x88] sm:$0xff] %v387_v23 }
  0xd6   : > { %420 = vst [vmem:[%s963_s16 + $0x90] sm:$0xff] %v388_v39 }
  0xd7   : > { %421 = vst [vmem:[%s963_s16 + $0x98] sm:$0xff] %v389_v4 }
  0xd8   : > { %422 = vst [vmem:[%s963_s16 + $0xa0] sm:$0xff] %v390_v45 }
  0xd9   : > { %423 = vst [vmem:[%s963_s16 + $0xa8] sm:$0xff] %v391_v8 }
  0xda   : > { %424 = vst [vmem:[%s963_s16 + $0xb0] sm:$0xff] %v392_v10 }
  0xdb   : > { %425 = vst [vmem:[%s963_s16 + $0xb8] sm:$0xff] %v393_v12 }
  0xdc   : > { %426 = vst [vmem:[%s963_s16 + $0xc0] sm:$0xff] %v394_v14 }
  0xdd   : > { %427 = vst [vmem:[%s963_s16 + $0xc8] sm:$0xff] %v395_v16 }
  0xde   : > { %428 = vst [vmem:[%s963_s16 + $0xd0] sm:$0xff] %v396_v63 }
  0xdf   : > { %429 = vst [vmem:[%s963_s16 + $0xd8] sm:$0xff] %v397_v46 }
  0xe0   : > { %430 = vst [vmem:[%s963_s16 + $0xe0] sm:$0xff] %v398_v48 }
  0xe1   : > { %431 = vst [vmem:[%s963_s16 + $0xe8] sm:$0xff] %v399_v25 }
  0xe2   : > { %432 = vst [vmem:[%s963_s16 + $0xf0] sm:$0xff] %v400_v9 }
  0xe3   : > { %433 = vst [vmem:[%s963_s16 + $0xf8] sm:$0xff] %v401_v24 }
  0xe4 PF: > { %s11_s8 = sadd.s32 1, %s581_s8   ;;  %s1064_s6 = smov %s577_s7 }
  0xe5   : > { %p8_p5 = scmp.ge.s32.totalorder %s11_s8, 4   ;;  %s1065_s7 = smov %s1067_s9 }
  0xe7   :  { %10 = sbr.rel (!%p8_p5) target bundleno = 2 (0x2), region = 54 }

// kernel: _lambda_.7
= control target key start
LH: loop header
LB: loop body
LE: loop exit
PB: predicated region body
PF: predicated region fallthrough
CT: control target
= control target key end

     0   :  { %s710_s9 = smov 0   ;;  %s712_s10 = smov 0   ;;  %s1213_s0 = inlined_call_operand.vmem [shape: f32[2,256,128], index: 0, kind: input, shape index: {}]   ;;  %s1214_s1 = inlined_call_operand.vmem [shape: f32[2,256,128], index: 1, kind: input, shape index: {}]   ;;  %s1215_s2 = inlined_call_operand.vmem [shape: f32[2,256,128], index: 2, kind: output, shape index: {}]  }
   0x1   :  { %s714_s11 = smov 0  }
   0x2 LB: > { %s24_s12 = sadd.s32 1, %s688_s10  ;;  %p629_p0 = scmp.ge.s32.totalorder %s692_s11, 1  ;;  %s692_s11 = sphi %s714_s11, %s12_s11   ;;  %s688_s10 = sphi %s712_s10, %s1217_s10   ;;  %s684_s9 = sphi %s710_s9, %s1216_s9  }
   0x3   : > { %p26_p1 = scmp.ge.s32.totalorder %s24_s12, 2  ;;  %p146_p2 = scmp.lt.s32.totalorder %s692_s11, 3 }
   0x5   : > { %s1219_s12 = smov (%p26_p1, %s24_s12), 0  ;;  %p147_p3 = pnand %p629_p0, %p146_p2 }
   0x6   : > { %p182_p4 = scmp.lt.s32.totalorder (!%p147_p3), %s684_s9, 1 }
   0x7   : > { %150 = sbr.rel (%p147_p3) target bundleno = 228 (0xe4), region = 28 }
   0xc   : > { %s1221_s9 = smov (!%p182_p4, %s684_s9), 1  ;;  %v694_v56 = vmov 256.0  }
   0xd   : > { %s728_s13 = sshll.u32 %s1221_s9, 8  ;;  %666 = vrcp.f32 %v694_v56 }
   0xe   : > { %s734_s16 = scalar_lea.vmem %s1213_s0, %s728_s13  ;;  %s1066_s19 = scalar_lea.vmem %s1214_s1, %s728_s13 }
   0xf   : > { %v737_v0 = vld [vmem:[%s734_s16] sm:$0xff]  ;;  %v740_v1 = vld [vmem:[%s734_s16 + $0x8] sm:$0xff]  ;;  %v743_v2 = vld [vmem:[%s734_s16 + $0x10] sm:$0xff]  ;;  %s1086_s22 = scalar_lea.vmem %s1215_s2, %s728_s13 }
  0x10   : > { %v238_v3 = vadd.f32 %v740_v1, %v737_v0  ;;  %v748_v4 = vld [vmem:[%s734_s16 + $0x18] sm:$0xff]  ;;  %v752_v6 = vld [vmem:[%s734_s16 + $0x20] sm:$0xff]  ;;  %v756_v8 = vld [vmem:[%s734_s16 + $0x28] sm:$0xff] }
  0x11   : > { %v760_v10 = vld [vmem:[%s734_s16 + $0x30] sm:$0xff]  ;;  %v764_v12 = vld [vmem:[%s734_s16 + $0x38] sm:$0xff]  ;;  %v768_v14 = vld [vmem:[%s734_s16 + $0x40] sm:$0xff] }
  0x12   : > { %v239_v5 = vadd.f32 %v238_v3, %v743_v2  ;;  %v772_v16 = vld [vmem:[%s734_s16 + $0x48] sm:$0xff]  ;;  %v776_v18 = vld [vmem:[%s734_s16 + $0x50] sm:$0xff]  ;;  %v780_v20 = vld [vmem:[%s734_s16 + $0x58] sm:$0xff] }
  0x13   : > { %v784_v22 = vld [vmem:[%s734_s16 + $0x60] sm:$0xff]  ;;  %v788_v24 = vld [vmem:[%s734_s16 + $0x68] sm:$0xff]  ;;  %v792_v26 = vld [vmem:[%s734_s16 + $0x70] sm:$0xff]  ;;  %v667_v62 = vpop.eup %666 }
  0x14   : > { %v240_v7 = vadd.f32 %v239_v5, %v748_v4  ;;  %v796_v28 = vld [vmem:[%s734_s16 + $0x78] sm:$0xff]  ;;  %v800_v30 = vld [vmem:[%s734_s16 + $0x80] sm:$0xff]  ;;  %v804_v32 = vld [vmem:[%s734_s16 + $0x88] sm:$0xff]  ;;  %v276_v5 = vmul.f32 256.0, %v667_v62  ;;  %vm280_vm0 = vweird.f32 %v667_v62 }
  0x15   : > { %v808_v34 = vld [vmem:[%s734_s16 + $0x90] sm:$0xff]  ;;  %v812_v36 = vld [vmem:[%s734_s16 + $0x98] sm:$0xff]  ;;  %v816_v38 = vld [vmem:[%s734_s16 + $0xa0] sm:$0xff] }
  0x16   : > { %v241_v9 = vadd.f32 %v240_v7, %v752_v6  ;;  %v820_v40 = vld [vmem:[%s734_s16 + $0xa8] sm:$0xff]  ;;  %v824_v42 = vld [vmem:[%s734_s16 + $0xb0] sm:$0xff]  ;;  %v828_v44 = vld [vmem:[%s734_s16 + $0xb8] sm:$0xff] }
  0x17   : > { %v832_v46 = vld [vmem:[%s734_s16 + $0xc0] sm:$0xff]  ;;  %v836_v48 = vld [vmem:[%s734_s16 + $0xc8] sm:$0xff]  ;;  %v840_v50 = vld [vmem:[%s734_s16 + $0xd0] sm:$0xff] }
  0x18   : > { %v242_v11 = vadd.f32 %v241_v9, %v756_v8  ;;  %v844_v52 = vld [vmem:[%s734_s16 + $0xd8] sm:$0xff]  ;;  %v848_v54 = vld [vmem:[%s734_s16 + $0xe0] sm:$0xff]  ;;  %v852_v57 = vld [vmem:[%s734_s16 + $0xe8] sm:$0xff] }
  0x19   : > { %v856_v59 = vld [vmem:[%s734_s16 + $0xf0] sm:$0xff]  ;;  %v860_v61 = vld [vmem:[%s734_s16 + $0xf8] sm:$0xff] }
  0x1a   : > { %v243_v13 = vadd.f32 %v242_v11, %v760_v10  ;;  %v277_v11 = vsub.f32 1.0, %v276_v5 }
  0x1c   : > { %v244_v15 = vadd.f32 %v243_v13, %v764_v12 }
  0x1e   : > { %v245_v17 = vadd.f32 %v244_v15, %v768_v14 }
  0x20   : > { %v246_v19 = vadd.f32 %v245_v17, %v772_v16  ;;  %v278_v17 = vmul.f32 %v667_v62, %v277_v11 }
  0x22   : > { %v247_v21 = vadd.f32 %v246_v19, %v776_v18 }
  0x24   : > { %v248_v23 = vadd.f32 %v247_v21, %v780_v20  ;;  %v279_v21 = vadd.f32 %v667_v62, %v278_v17 }
  0x26   : > { %v249_v25 = vadd.f32 %v248_v23, %v784_v22 }
  0x28   : > { %v250_v27 = vadd.f32 %v249_v25, %v788_v24  ;;  %v864_v25 = vsel %vm280_vm0, %v667_v62, %v279_v21 }
  0x2a   : > { %v251_v29 = vadd.f32 %v250_v27, %v792_v26 }
  0x2c   : > { %v252_v31 = vadd.f32 %v251_v29, %v796_v28 }
  0x2e   : > { %v253_v33 = vadd.f32 %v252_v31, %v800_v30 }
  0x30   : > { %v254_v35 = vadd.f32 %v253_v33, %v804_v32 }
  0x32   : > { %v255_v37 = vadd.f32 %v254_v35, %v808_v34 }
  0x34   : > { %v256_v39 = vadd.f32 %v255_v37, %v812_v36 }
  0x36   : > { %v257_v41 = vadd.f32 %v256_v39, %v816_v38 }
  0x38   : > { %v258_v43 = vadd.f32 %v257_v41, %v820_v40 }
  0x3a   : > { %v259_v45 = vadd.f32 %v258_v43, %v824_v42 }
  0x3c   : > { %v260_v47 = vadd.f32 %v259_v45, %v828_v44 }
  0x3e   : > { %v261_v49 = vadd.f32 %v260_v47, %v832_v46 }
  0x40   : > { %v262_v51 = vadd.f32 %v261_v49, %v836_v48 }
  0x42   : > { %v263_v53 = vadd.f32 %v262_v51, %v840_v50 }
  0x44   : > { %v264_v55 = vadd.f32 %v263_v53, %v844_v52 }
  0x46   : > { %v265_v58 = vadd.f32 %v264_v55, %v848_v54 }
  0x48   : > { %v266_v60 = vadd.f32 %v265_v58, %v852_v57 }
  0x4a   : > { %v267_v63 = vadd.f32 %v266_v60, %v856_v59 }
  0x4c   : > { %v268_v3 = vadd.f32 %v267_v63, %v860_v61 }
  0x4e   : > { %v269_v7 = vrot.slane %v268_v3, 4 }
  0x50   : > { %v270_v9 = vadd.f32 %v269_v7, %v268_v3 }
  0x52   : > { %v271_v13 = vrot.slane %v270_v9, 2 }
  0x54   : > { %v272_v15 = vadd.f32 %v271_v13, %v270_v9 }
  0x56   : > { %v273_v19 = vrot.slane %v272_v15, 1 }
  0x58   : > { %v274_v23 = vadd.f32 %v273_v19, %v272_v15 }
  0x5a   : > { %v867_v27 = vmul.f32 %v864_v25, %v274_v23 }
  0x5c   : > { %v871_v29 = vsub.f32 %v737_v0, %v867_v27  ;;  %v875_v31 = vsub.f32 %v740_v1, %v867_v27  ;;  %v879_v33 = vsub.f32 %v743_v2, %v867_v27  ;;  %v883_v35 = vsub.f32 %v748_v4, %v867_v27 }
  0x5d   : > { %v891_v0 = vsub.f32 %v752_v6, %v867_v27  ;;  %v897_v2 = vsub.f32 %v756_v8, %v867_v27  ;;  %v903_v43 = vsub.f32 %v760_v10, %v867_v27  ;;  %v909_v47 = vsub.f32 %v764_v12, %v867_v27 }
  0x5e   : > { %v315_v37 = vmul.f32 %v871_v29, %v871_v29  ;;  %v316_v39 = vmul.f32 %v875_v31, %v875_v31  ;;  %v317_v1 = vmul.f32 %v879_v33, %v879_v33  ;;  %v318_v4 = vmul.f32 %v883_v35, %v883_v35 }
  0x5f   : > { %v319_v45 = vmul.f32 %v891_v0, %v891_v0  ;;  %v320_v8 = vmul.f32 %v897_v2, %v897_v2  ;;  %v915_v51 = vsub.f32 %v768_v14, %v867_v27  ;;  %v321_v10 = vmul.f32 %v903_v43, %v903_v43 }
  0x60   : > { %v347_v41 = vadd.f32 %v316_v39, %v315_v37  ;;  %v921_v55 = vsub.f32 %v772_v16, %v867_v27  ;;  %v322_v12 = vmul.f32 %v909_v47, %v909_v47  ;;  %v927_v58 = vsub.f32 %v776_v18, %v867_v27 }
  0x61   : > { %v323_v14 = vmul.f32 %v915_v51, %v915_v51  ;;  %v933_v62 = vsub.f32 %v780_v20, %v867_v27  ;;  %v939_v3 = vsub.f32 %v784_v22, %v867_v27  ;;  %v945_v7 = vsub.f32 %v788_v24, %v867_v27 }
  0x62   : > { %v348_v6 = vadd.f32 %v347_v41, %v317_v1  ;;  %v324_v16 = vmul.f32 %v921_v55, %v921_v55  ;;  %v325_v18 = vmul.f32 %v927_v58, %v927_v58  ;;  %v951_v11 = vsub.f32 %v792_v26, %v867_v27 }
  0x63   : > { %v326_v20 = vmul.f32 %v933_v62, %v933_v62  ;;  %v327_v22 = vmul.f32 %v939_v3, %v939_v3  ;;  %v957_v15 = vsub.f32 %v796_v28, %v867_v27  ;;  %v328_v24 = vmul.f32 %v945_v7, %v945_v7 }
  0x64   : > { %v349_v49 = vadd.f32 %v348_v6, %v318_v4  ;;  %v963_v19 = vsub.f32 %v800_v30, %v867_v27  ;;  %v329_v26 = vmul.f32 %v951_v11, %v951_v11  ;;  %v969_v23 = vsub.f32 %v804_v32, %v867_v27 }
  0x65   : > { %v330_v28 = vmul.f32 %v957_v15, %v957_v15  ;;  %v975_v39 = vsub.f32 %v808_v34, %v867_v27  ;;  %v981_v4 = vsub.f32 %v812_v36, %v867_v27 }
  0x66   : > { %v350_v53 = vadd.f32 %v349_v49, %v319_v45  ;;  %v331_v30 = vmul.f32 %v963_v19, %v963_v19  ;;  %v332_v32 = vmul.f32 %v969_v23, %v969_v23  ;;  %v987_v45 = vsub.f32 %v816_v38, %v867_v27 }
  0x67   : > { %v333_v34 = vmul.f32 %v975_v39, %v975_v39  ;;  %v334_v36 = vmul.f32 %v981_v4, %v981_v4 }
  0x68   : > { %v351_v56 = vadd.f32 %v350_v53, %v320_v8  ;;  %v993_v8 = vsub.f32 %v820_v40, %v867_v27  ;;  %v335_v38 = vmul.f32 %v987_v45, %v987_v45 }
  0x6a   : > { %v352_v60 = vadd.f32 %v351_v56, %v321_v10  ;;  %v999_v10 = vsub.f32 %v824_v42, %v867_v27  ;;  %v336_v40 = vmul.f32 %v993_v8, %v993_v8 }
  0x6c   : > { %v353_v63 = vadd.f32 %v352_v60, %v322_v12  ;;  %v1005_v12 = vsub.f32 %v828_v44, %v867_v27  ;;  %v337_v42 = vmul.f32 %v999_v10, %v999_v10 }
  0x6e   : > { %v354_v5 = vadd.f32 %v353_v63, %v323_v14  ;;  %v1011_v14 = vsub.f32 %v832_v46, %v867_v27  ;;  %v338_v44 = vmul.f32 %v1005_v12, %v1005_v12 }
  0x70   : > { %v355_v9 = vadd.f32 %v354_v5, %v324_v16  ;;  %v1017_v16 = vsub.f32 %v836_v48, %v867_v27  ;;  %v339_v46 = vmul.f32 %v1011_v14, %v1011_v14 }
  0x72   : > { %v356_v13 = vadd.f32 %v355_v9, %v325_v18  ;;  %v1023_v18 = vsub.f32 %v840_v50, %v867_v27  ;;  %v340_v48 = vmul.f32 %v1017_v16, %v1017_v16 }
  0x74   : > { %v357_v17 = vadd.f32 %v356_v13, %v326_v20  ;;  %v1029_v20 = vsub.f32 %v844_v52, %v867_v27  ;;  %v341_v50 = vmul.f32 %v1023_v18, %v1023_v18 }
  0x76   : > { %v358_v21 = vadd.f32 %v357_v17, %v327_v22  ;;  %v1035_v22 = vsub.f32 %v848_v54, %v867_v27  ;;  %v342_v52 = vmul.f32 %v1029_v20, %v1029_v20 }
  0x78   : > { %v359_v37 = vadd.f32 %v358_v21, %v328_v24  ;;  %v1041_v24 = vsub.f32 %v852_v57, %v867_v27  ;;  %v343_v54 = vmul.f32 %v1035_v22, %v1035_v22 }
  0x7a   : > { %v360_v1 = vadd.f32 %v359_v37, %v329_v26  ;;  %v1047_v26 = vsub.f32 %v856_v59, %v867_v27  ;;  %v344_v57 = vmul.f32 %v1041_v24, %v1041_v24 }
  0x7c   : > { %v361_v41 = vadd.f32 %v360_v1, %v330_v28  ;;  %v1053_v28 = vsub.f32 %v860_v61, %v867_v27 }
  0x7e   : > { %v362_v6 = vadd.f32 %v361_v41, %v331_v30  ;;  %v345_v30 = vmul.f32 %v1047_v26, %v1047_v26  ;;  %v346_v59 = vmul.f32 %v1053_v28, %v1053_v28 }
  0x80   : > { %v363_v49 = vadd.f32 %v362_v6, %v332_v32 }
  0x82   : > { %v364_v53 = vadd.f32 %v363_v49, %v333_v34 }
  0x84   : > { %v365_v56 = vadd.f32 %v364_v53, %v334_v36 }
  0x86   : > { %v366_v60 = vadd.f32 %v365_v56, %v335_v38 }
  0x88   : > { %v367_v63 = vadd.f32 %v366_v60, %v336_v40 }
  0x8a   : > { %v368_v5 = vadd.f32 %v367_v63, %v337_v42 }
  0x8c   : > { %v369_v9 = vadd.f32 %v368_v5, %v338_v44  ;;  %v428_v5 = vld [vmem:[%s1066_s19] sm:$0xff] }
  0x8e   : > { %v370_v13 = vadd.f32 %v369_v9, %v339_v46  ;;  %v430_v9 = vld [vmem:[%s1066_s19 + $0x10] sm:$0xff] }
  0x90   : > { %v371_v17 = vadd.f32 %v370_v13, %v340_v48  ;;  %v429_v48 = vld [vmem:[%s1066_s19 + $0x8] sm:$0xff] }
  0x92   : > { %v372_v21 = vadd.f32 %v371_v17, %v341_v50 }
  0x94   : > { %v373_v37 = vadd.f32 %v372_v21, %v342_v52  ;;  %v432_v21 = vld [vmem:[%s1066_s19 + $0x20] sm:$0xff] }
  0x96   : > { %v374_v1 = vadd.f32 %v373_v37, %v343_v54  ;;  %v431_v54 = vld [vmem:[%s1066_s19 + $0x18] sm:$0xff]  ;;  %v433_v37 = vld [vmem:[%s1066_s19 + $0x28] sm:$0xff] }
  0x98   : > { %v375_v32 = vadd.f32 %v374_v1, %v344_v57 }
  0x9a   : > { %v376_v41 = vadd.f32 %v375_v32, %v345_v30 }
  0x9c   : > { %v377_v34 = vadd.f32 %v376_v41, %v346_v59  ;;  %v434_v59 = vld [vmem:[%s1066_s19 + $0x30] sm:$0xff] }
  0x9e   : > { %v378_v6 = vrot.slane %v377_v34, 4 }
  0xa0   : > { %v379_v36 = vadd.f32 %v378_v6, %v377_v34  ;;  %v436_v6 = vld [vmem:[%s1066_s19 + $0x40] sm:$0xff] }
  0xa2   : > { %v380_v49 = vrot.slane %v379_v36, 2 }
  0xa4   : > { %v381_v61 = vadd.f32 %v380_v49, %v379_v36 }
  0xa6   : > { %v382_v27 = vrot.slane %v381_v61, 1 }
  0xa8   : > { %v383_v38 = vadd.f32 %v382_v27, %v381_v61 }
  0xaa   : > { %v384_v53 = vmul.f32 %v383_v38, %v864_v25 }
  0xac   : > { %v385_v40 = vadd.f32 1e-05, %v384_v53 }
  0xae   : > { %668 = vrsqrt.f32 %v385_v40  ;;  %vm392_vm1 = vweird.f32 %v385_v40 }
  0xb4   : > { %v669_v56 = vpop.eup %668 }
  0xb5   : > { %v387_v42 = vmul.f32 %v669_v56, %v385_v40  ;;  %vm393_vm2 = vweird.f32 %v669_v56 }
  0xb6   : > { %vm394_vm3 = vmor %vm392_vm1, %vm393_vm2 }
  0xb7   : > { %v388_v60 = vmul.f32 %v669_v56, %v387_v42 }
  0xb9   : > { %v389_v44 = vmul.f32 0.5, %v388_v60 }
  0xbb   : > { %v390_v63 = vsub.f32 1.5, %v389_v44 }
  0xbd   : > { %v391_v25 = vmul.f32 %v669_v56, %v390_v63 }
  0xbf   : > { %v1068_v46 = vsel %vm394_vm3, %v669_v56, %v391_v25 }
  0xc0   : > { %v396_v50 = vmul.f32 %v1068_v46, %v871_v29  ;;  %v397_v13 = vmul.f32 %v1068_v46, %v875_v31  ;;  %v398_v52 = vmul.f32 %v1068_v46, %v879_v33  ;;  %v399_v17 = vmul.f32 %v1068_v46, %v883_v35 }
  0xc1   : > { %v400_v29 = vmul.f32 %v1068_v46, %v891_v0  ;;  %v401_v31 = vmul.f32 %v1068_v46, %v897_v2  ;;  %v402_v30 = vmul.f32 %v1068_v46, %v903_v43  ;;  %v403_v0 = vmul.f32 %v1068_v46, %v909_v47  ;;  %v435_v2 = vld [vmem:[%s1066_s19 + $0x38] sm:$0xff]  ;;  %v437_v47 = vld [vmem:[%s1066_s19 + $0x48] sm:$0xff] }
  0xc2   : > { %v460_v33 = vadd.f32 %v428_v5, %v396_v50  ;;  %v461_v35 = vadd.f32 %v429_v48, %v397_v13  ;;  %v462_v57 = vadd.f32 %v430_v9, %v398_v52  ;;  %v463_v1 = vadd.f32 %v431_v54, %v399_v17 }
  0xc3   : > { %v464_v32 = vadd.f32 %v432_v21, %v400_v29  ;;  %v404_v41 = vmul.f32 %v1068_v46, %v915_v51  ;;  %v465_v34 = vadd.f32 %v433_v37, %v401_v31  ;;  %v405_v43 = vmul.f32 %v1068_v46, %v921_v55  ;;  %v438_v51 = vld [vmem:[%s1066_s19 + $0x50] sm:$0xff]  ;;  %v439_v55 = vld [vmem:[%s1066_s19 + $0x58] sm:$0xff] }
  0xc4   : > { %492 = vst [vmem:[%s1086_s22] sm:$0xff] %v460_v33  ;;  %v466_v36 = vadd.f32 %v434_v59, %v402_v30  ;;  %v406_v49 = vmul.f32 %v1068_v46, %v927_v58  ;;  %v467_v61 = vadd.f32 %v435_v2, %v403_v0  ;;  %v407_v27 = vmul.f32 %v1068_v46, %v933_v62  ;;  %v440_v58 = vld [vmem:[%s1066_s19 + $0x60] sm:$0xff]  ;;  %v441_v62 = vld [vmem:[%s1066_s19 + $0x68] sm:$0xff] }
  0xc5   : > { %493 = vst [vmem:[%s1086_s22 + $0x8] sm:$0xff] %v461_v35  ;;  %v468_v38 = vadd.f32 %v436_v6, %v404_v41  ;;  %v408_v53 = vmul.f32 %v1068_v46, %v939_v3  ;;  %v469_v40 = vadd.f32 %v437_v47, %v405_v43  ;;  %v409_v56 = vmul.f32 %v1068_v46, %v945_v7  ;;  %v442_v3 = vld [vmem:[%s1066_s19 + $0x70] sm:$0xff]  ;;  %v443_v7 = vld [vmem:[%s1066_s19 + $0x78] sm:$0xff] }
  0xc6   : > { %494 = vst [vmem:[%s1086_s22 + $0x10] sm:$0xff] %v462_v57  ;;  %v470_v42 = vadd.f32 %v438_v51, %v406_v49  ;;  %v410_v60 = vmul.f32 %v1068_v46, %v951_v11  ;;  %v471_v44 = vadd.f32 %v439_v55, %v407_v27  ;;  %v411_v63 = vmul.f32 %v1068_v46, %v957_v15  ;;  %v444_v11 = vld [vmem:[%s1066_s19 + $0x80] sm:$0xff]  ;;  %v445_v15 = vld [vmem:[%s1066_s19 + $0x88] sm:$0xff]  ;;  %v458_v51 = vld [vmem:[%s1066_s19 + $0xf0] sm:$0xff] }
  0xc7   : > { %495 = vst [vmem:[%s1086_s22 + $0x18] sm:$0xff] %v463_v1  ;;  %v472_v25 = vadd.f32 %v440_v58, %v408_v53  ;;  %v412_v5 = vmul.f32 %v1068_v46, %v963_v19  ;;  %v473_v48 = vadd.f32 %v441_v62, %v409_v56  ;;  %v413_v9 = vmul.f32 %v1068_v46, %v969_v23  ;;  %v446_v19 = vld [vmem:[%s1066_s19 + $0x90] sm:$0xff]  ;;  %v447_v23 = vld [vmem:[%s1066_s19 + $0x98] sm:$0xff] }
  0xc8   : > { %496 = vst [vmem:[%s1086_s22 + $0x20] sm:$0xff] %v464_v32  ;;  %v474_v50 = vadd.f32 %v442_v3, %v410_v60  ;;  %v414_v13 = vmul.f32 %v1068_v46, %v975_v39  ;;  %v475_v52 = vadd.f32 %v443_v7, %v411_v63  ;;  %v415_v17 = vmul.f32 %v1068_v46, %v981_v4  ;;  %v448_v39 = vld [vmem:[%s1066_s19 + $0xa0] sm:$0xff]  ;;  %v449_v4 = vld [vmem:[%s1066_s19 + $0xa8] sm:$0xff] }
  0xc9   : > { %497 = vst [vmem:[%s1086_s22 + $0x28] sm:$0xff] %v465_v34  ;;  %v476_v54 = vadd.f32 %v444_v11, %v412_v5  ;;  %v416_v29 = vmul.f32 %v1068_v46, %v987_v45  ;;  %v477_v21 = vadd.f32 %v445_v15, %v413_v9  ;;  %v417_v31 = vmul.f32 %v1068_v46, %v993_v8  ;;  %v450_v45 = vld [vmem:[%s1066_s19 + $0xb0] sm:$0xff]  ;;  %v451_v8 = vld [vmem:[%s1066_s19 + $0xb8] sm:$0xff] }
  0xca   : > { %498 = vst [vmem:[%s1086_s22 + $0x30] sm:$0xff] %v466_v36  ;;  %v478_v33 = vadd.f32 %v446_v19, %v414_v13  ;;  %v418_v35 = vmul.f32 %v1068_v46, %v999_v10  ;;  %v479_v57 = vadd.f32 %v447_v23, %v415_v17  ;;  %v419_v37 = vmul.f32 %v1068_v46, %v1005_v12  ;;  %v452_v10 = vld [vmem:[%s1066_s19 + $0xc0] sm:$0xff]  ;;  %v453_v12 = vld [vmem:[%s1066_s19 + $0xc8] sm:$0xff] }
  0xcb   : > { %499 = vst [vmem:[%s1086_s22 + $0x38] sm:$0xff] %v467_v61  ;;  %v480_v30 = vadd.f32 %v448_v39, %v416_v29  ;;  %v420_v1 = vmul.f32 %v1068_v46, %v1011_v14  ;;  %v481_v59 = vadd.f32 %v449_v4, %v417_v31  ;;  %v421_v0 = vmul.f32 %v1068_v46, %v1017_v16  ;;  %v454_v14 = vld [vmem:[%s1066_s19 + $0xd0] sm:$0xff]  ;;  %v455_v16 = vld [vmem:[%s1066_s19 + $0xd8] sm:$0xff] }
  0xcc   : > { %500 = vst [vmem:[%s1086_s22 + $0x40] sm:$0xff] %v468_v38  ;;  %v482_v32 = vadd.f32 %v450_v45, %v418_v35  ;;  %v422_v2 = vmul.f32 %v1068_v46, %v1023_v18  ;;  %v483_v41 = vadd.f32 %v451_v8, %v419_v37  ;;  %v423_v34 = vmul.f32 %v1068_v46, %v1029_v20  ;;  %v456_v18 = vld [vmem:[%s1066_s19 + $0xe0] sm:$0xff]  ;;  %v457_v20 = vld [vmem:[%s1066_s19 + $0xe8] sm:$0xff] }
  0xcd   : > { %501 = vst [vmem:[%s1086_s22 + $0x48] sm:$0xff] %v469_v40  ;;  %v484_v6 = vadd.f32 %v452_v10, %v420_v1  ;;  %v424_v43 = vmul.f32 %v1068_v46, %v1035_v22  ;;  %v485_v36 = vadd.f32 %v453_v12, %v421_v0  ;;  %v425_v47 = vmul.f32 %v1068_v46, %v1041_v24  ;;  %v459_v24 = vld [vmem:[%s1066_s19 + $0xf8] sm:$0xff] }
  0xce   : > { %502 = vst [vmem:[%s1086_s22 + $0x50] sm:$0xff] %v470_v42  ;;  %v486_v49 = vadd.f32 %v454_v14, %v422_v2  ;;  %v426_v61 = vmul.f32 %v1068_v46, %v1047_v26  ;;  %v487_v22 = vadd.f32 %v455_v16, %v423_v34  ;;  %v427_v27 = vmul.f32 %v1068_v46, %v1053_v28 }
  0xcf   : > { %503 = vst [vmem:[%s1086_s22 + $0x58] sm:$0xff] %v471_v44  ;;  %v488_v38 = vadd.f32 %v456_v18, %v424_v43  ;;  %v489_v55 = vadd.f32 %v457_v20, %v425_v47 }
  0xd0   : > { %504 = vst [vmem:[%s1086_s22 + $0x60] sm:$0xff] %v472_v25  ;;  %v490_v53 = vadd.f32 %v458_v51, %v426_v61  ;;  %v491_v40 = vadd.f32 %v459_v24, %v427_v27 }
  0xd1   : > { %505 = vst [vmem:[%s1086_s22 + $0x68] sm:$0xff] %v473_v48 }
  0xd2   : > { %506 = vst [vmem:[%s1086_s22 + $0x70] sm:$0xff] %v474_v50 }
  0xd3   : > { %507 = vst [vmem:[%s1086_s22 + $0x78] sm:$0xff] %v475_v52 }
  0xd4   : > { %508 = vst [vmem:[%s1086_s22 + $0x80] sm:$0xff] %v476_v54 }
  0xd5   : > { %509 = vst [vmem:[%s1086_s22 + $0x88] sm:$0xff] %v477_v21 }
  0xd6   : > { %510 = vst [vmem:[%s1086_s22 + $0x90] sm:$0xff] %v478_v33 }
  0xd7   : > { %511 = vst [vmem:[%s1086_s22 + $0x98] sm:$0xff] %v479_v57 }
  0xd8   : > { %512 = vst [vmem:[%s1086_s22 + $0xa0] sm:$0xff] %v480_v30 }
  0xd9   : > { %513 = vst [vmem:[%s1086_s22 + $0xa8] sm:$0xff] %v481_v59 }
  0xda   : > { %514 = vst [vmem:[%s1086_s22 + $0xb0] sm:$0xff] %v482_v32 }
  0xdb   : > { %515 = vst [vmem:[%s1086_s22 + $0xb8] sm:$0xff] %v483_v41 }
  0xdc   : > { %516 = vst [vmem:[%s1086_s22 + $0xc0] sm:$0xff] %v484_v6 }
  0xdd   : > { %517 = vst [vmem:[%s1086_s22 + $0xc8] sm:$0xff] %v485_v36 }
  0xde   : > { %518 = vst [vmem:[%s1086_s22 + $0xd0] sm:$0xff] %v486_v49 }
  0xdf   : > { %519 = vst [vmem:[%s1086_s22 + $0xd8] sm:$0xff] %v487_v22 }
  0xe0   : > { %520 = vst [vmem:[%s1086_s22 + $0xe0] sm:$0xff] %v488_v38 }
  0xe1   : > { %521 = vst [vmem:[%s1086_s22 + $0xe8] sm:$0xff] %v489_v55 }
  0xe2   : > { %522 = vst [vmem:[%s1086_s22 + $0xf0] sm:$0xff] %v490_v53 }
  0xe3   : > { %523 = vst [vmem:[%s1086_s22 + $0xf8] sm:$0xff] %v491_v40 }
  0xe4 PF: > { %s12_s11 = sadd.s32 1, %s692_s11   ;;  %s1216_s9 = smov %s688_s10 }
  0xe5   : > { %p9_p5 = scmp.ge.s32.totalorder %s12_s11, 4   ;;  %s1217_s10 = smov %s1219_s12 }
  0xe7   :  { %11 = sbr.rel (!%p9_p5) target bundleno = 2 (0x2), region = 61 }

// kernel: _lambda_.4
= control target key start
LH: loop header
LB: loop body
LE: loop exit
PB: predicated region body
PF: predicated region fallthrough
CT: control target
= control target key end

     0   :  { %s1970_s12 = smov 0   ;;  %s1972_s13 = smov 0   ;;  %s3032_s0 = inlined_call_operand.vmem [shape: f32[2,18,18,128], index: 0, kind: input, shape index: {}]   ;;  %s3033_s1 = inlined_call_operand.vmem [shape: f32[9,128,128], index: 1, kind: input, shape index: {}]   ;;  %s3034_s2 = inlined_call_operand.vmem [shape: f32[1,128], index: 2, kind: input, shape index: {}]   ;;  %s3035_s3 = inlined_call_operand.vmem [shape: f32[2,256,128], index: 3, kind: output, shape index: {}]  }
   0x1   :  { %s1974_s14 = smov 0   ;;  %s1976_s15 = smov 0  }
   0x2   :  { %s1978_s16 = smov 0  }
   0x3 LB: > { %s22_s17 = sadd.s32 1, %s1940_s14  ;;  %s25_s18 = sadd.s32 1, %s1944_s15  ;;  %s1948_s16 = sphi %s1978_s16, %s13_s16   ;;  %s1944_s15 = sphi %s1976_s15, %s3039_s15   ;;  %s1940_s14 = sphi %s1974_s14, %s3038_s14   ;;  %s1936_s13 = sphi %s1972_s13, %s3037_s13   ;;  %s1932_s12 = sphi %s1970_s12, %s3036_s12  }
   0x4   : > { %p23_p0 = scmp.ge.s32.totalorder %s22_s17, 2  ;;  %p1520_p1 = scmp.ge.s32.totalorder %s1948_s16, 1 }
   0x5   : > { %p117_p2 = scmp.lt.s32.totalorder %s1948_s16, 5 }
   0x6   : > { %s3041_s17 = smov (%p23_p0, %s22_s17), 0  ;;  %s3043_s18 = smov (!%p23_p0, %s25_s18), %s1944_s15 }
   0x7   : > { %p118_p3 = pnand %p1520_p1, %p117_p2  ;;  %p27_p4 = scmp.ge.s32.totalorder %s3043_s18, 2 }
   0x8   : > { %s1521_s19 = sshll.u32 (!%p118_p3), %s1932_s12, 4  ;;  %p139_p5 = scmp.lt.s32.totalorder (!%p118_p3), %s1936_s13, 1 }
   0x9   : > { %s3045_s18 = smov (%p27_p4, %s3043_s18), 0  ;;  %121 = sbr.rel (%p118_p3) target bundleno = 561 (0x231), region = 28 }
   0xa   : > { %p141_p6 = scmp.lt.s32.totalorder (!%p118_p3), %s1521_s19, 31  ;;  %p148_p7 = scmp.lt.s32.totalorder (!%p118_p3), %s1932_s12, 0 }
   0xb   : > { %s149_s22 = ssub.s32 (!%p118_p3), 0, %s1932_s12  ;;  %p1527_p9 = scmp.ne.s32.totalorder (!%p118_p3), %s1932_s12, 0 }
   0xc   : > { %s1524_s24 = smin.u32 (!%p118_p3), %s1932_s12, %s149_s22 }
   0xd   : > { %s151_s26 = sand.u32 (!%p118_p3), 1, %s1524_s24  }
   0xe   : > { %s140_s20 = scalar_select %p139_p5, %s1936_s13, 1 }
   0xf   : > { %s3047_s19 = smov (!%p141_p6, %s1521_s19), 31  ;;  %s152_s30 = ssub.s32 0, %s151_s26 }
  0x10   : > { %s1522_s21 = sshll.u32 %s140_s20, 5  ;;  %s3049_s30 = smov (!%p148_p7, %s152_s30), %s151_s26 }
  0x11   : > { %s144_s23 = sadd.s32 %s1522_s21, %s3047_s19  ;;  %p1526_p8 = scmp.lt.s32.totalorder %s3049_s30, 0 }
  0x12   : > { %s1523_s25 = sshll.u32 %s144_s23, 3  ;;  %s158_s4 = sadd.s32 2, %s3049_s30 }
  0x13   : > { %s2013_s29 = scalar_lea.vmem %s3035_s3, %s1523_s25  ;;  %s3051_s4 = smov (!%p1526_p8, %s158_s4), %s3049_s30 }
  0x14   : > { %163 = sbr.rel (%p1527_p9) target bundleno = 58 (0x3a), region = 32  ;;  %s171_s20 = scalar_lea.sflag (!%p1527_p9), [#allocation3], %s3051_s4 }
  0x15   : > { %s1529_s5 = smul.u32 (!%p1527_p9), 192, %s1932_s12 }
  0x16   : > { %s166_s6 = smul.u32 (!%p1527_p9), 432, %s1936_s13 }
  0x17   : > { %s169_s7 = smul.u32 (!%p1527_p9), 240, %s3051_s4 }
  0x18   : > { %s167_s8 = sadd.s32 (!%p1527_p9), %s1529_s5, %s166_s6 }
  0x19   : > { %s2024_s11 = scalar_lea.vmem %s3032_s0, %s167_s8  ;;  %s2029_s19 = scalar_lea.vmem [#allocation2], %s169_s7 }
  0x1a   : > { %v184_v0 = vld [vmem:[%s2024_s11] sm:$0xff]  ;;  %v186_v1 = vld [vmem:[%s2024_s11 + $0x8] sm:$0xff]  ;;  %v188_v2 = vld [vmem:[%s2024_s11 + $0x18] sm:$0xff] }
  0x1b   : > { %185 = vst [vmem:[%s2029_s19] sm:$0xff] %v184_v0  ;;  %v190_v3 = vld [vmem:[%s2024_s11 + $0x20] sm:$0xff]  ;;  %v192_v4 = vld [vmem:[%s2024_s11 + $0x30] sm:$0xff]  ;;  %v194_v5 = vld [vmem:[%s2024_s11 + $0x38] sm:$0xff] }
  0x1c   : > { %187 = vst [vmem:[%s2029_s19 + $0x8] sm:$0xff] %v186_v1  ;;  %v196_v6 = vld [vmem:[%s2024_s11 + $0x48] sm:$0xff]  ;;  %v198_v7 = vld [vmem:[%s2024_s11 + $0x50] sm:$0xff]  ;;  %v200_v8 = vld [vmem:[%s2024_s11 + $0x60] sm:$0xff] }
  0x1d   : > { %189 = vst [vmem:[%s2029_s19 + $0x18] sm:$0xff] %v188_v2  ;;  %v202_v9 = vld [vmem:[%s2024_s11 + $0x68] sm:$0xff]  ;;  %v204_v10 = vld [vmem:[%s2024_s11 + $0x78] sm:$0xff]  ;;  %v206_v11 = vld [vmem:[%s2024_s11 + $0x80] sm:$0xff] }
  0x1e   : > { %191 = vst [vmem:[%s2029_s19 + $0x20] sm:$0xff] %v190_v3  ;;  %v208_v12 = vld [vmem:[%s2024_s11 + $0x90] sm:$0xff]  ;;  %v210_v13 = vld [vmem:[%s2024_s11 + $0x98] sm:$0xff]  ;;  %v212_v14 = vld [vmem:[%s2024_s11 + $0xa8] sm:$0xff] }
  0x1f   : > { %193 = vst [vmem:[%s2029_s19 + $0x30] sm:$0xff] %v192_v4  ;;  %v214_v15 = vld [vmem:[%s2024_s11 + $0xb0] sm:$0xff]  ;;  %v216_v16 = vld [vmem:[%s2024_s11 + $0xc0] sm:$0xff]  ;;  %v218_v17 = vld [vmem:[%s2024_s11 + $0xc8] sm:$0xff] }
  0x20   : > { %195 = vst [vmem:[%s2029_s19 + $0x38] sm:$0xff] %v194_v5  ;;  %v220_v18 = vld [vmem:[%s2024_s11 + $0xd8] sm:$0xff]  ;;  %v222_v19 = vld [vmem:[%s2024_s11 + $0xe0] sm:$0xff]  ;;  %v1530_v20 = vld [vmem:[%s2024_s11 + $0x10] sm:$0x3] }
  0x21   : > { %197 = vst [vmem:[%s2029_s19 + $0x48] sm:$0xff] %v196_v6  ;;  %v1532_v21 = vld [vmem:[%s2024_s11 + $0x28] sm:$0x3]  ;;  %v1534_v22 = vld [vmem:[%s2024_s11 + $0x40] sm:$0x3] }
  0x22   : > { %199 = vst [vmem:[%s2029_s19 + $0x50] sm:$0xff] %v198_v7  ;;  %v1536_v23 = vld [vmem:[%s2024_s11 + $0x58] sm:$0x3]  ;;  %v1538_v24 = vld [vmem:[%s2024_s11 + $0x70] sm:$0x3] }
  0x23   : > { %201 = vst [vmem:[%s2029_s19 + $0x60] sm:$0xff] %v200_v8  ;;  %v1540_v25 = vld [vmem:[%s2024_s11 + $0x88] sm:$0x3]  ;;  %v1542_v26 = vld [vmem:[%s2024_s11 + $0xa0] sm:$0x3] }
  0x24   : > { %203 = vst [vmem:[%s2029_s19 + $0x68] sm:$0xff] %v202_v9  ;;  %v1544_v27 = vld [vmem:[%s2024_s11 + $0xb8] sm:$0x3]  ;;  %v1546_v28 = vld [vmem:[%s2024_s11 + $0xd0] sm:$0x3] }
  0x25   : > { %205 = vst [vmem:[%s2029_s19 + $0x78] sm:$0xff] %v204_v10  ;;  %v1548_v29 = vld [vmem:[%s2024_s11 + $0xe8] sm:$0x3] }
  0x26   : > { %207 = vst [vmem:[%s2029_s19 + $0x80] sm:$0xff] %v206_v11 }
  0x27   : > { %209 = vst [vmem:[%s2029_s19 + $0x90] sm:$0xff] %v208_v12 }
  0x28   : > { %211 = vst [vmem:[%s2029_s19 + $0x98] sm:$0xff] %v210_v13 }
  0x29   : > { %213 = vst [vmem:[%s2029_s19 + $0xa8] sm:$0xff] %v212_v14 }
  0x2a   : > { %215 = vst [vmem:[%s2029_s19 + $0xb0] sm:$0xff] %v214_v15 }
  0x2b   : > { %217 = vst [vmem:[%s2029_s19 + $0xc0] sm:$0xff] %v216_v16 }
  0x2c   : > { %219 = vst [vmem:[%s2029_s19 + $0xc8] sm:$0xff] %v218_v17 }
  0x2d   : > { %221 = vst [vmem:[%s2029_s19 + $0xd8] sm:$0xff] %v220_v18 }
  0x2e   : > { %223 = vst [vmem:[%s2029_s19 + $0xe0] sm:$0xff] %v222_v19 }
  0x2f   : > { %1531 = vst [vmem:[%s2029_s19 + $0x10] sm:$0x3] %v1530_v20 }
  0x30   : > { %1533 = vst [vmem:[%s2029_s19 + $0x28] sm:$0x3] %v1532_v21 }
  0x31   : > { %1535 = vst [vmem:[%s2029_s19 + $0x40] sm:$0x3] %v1534_v22 }
  0x32   : > { %1537 = vst [vmem:[%s2029_s19 + $0x58] sm:$0x3] %v1536_v23 }
  0x33   : > { %1539 = vst [vmem:[%s2029_s19 + $0x70] sm:$0x3] %v1538_v24 }
  0x34   : > { %1541 = vst [vmem:[%s2029_s19 + $0x88] sm:$0x3] %v1540_v25 }
  0x35   : > { %1543 = vst [vmem:[%s2029_s19 + $0xa0] sm:$0x3] %v1542_v26 }
  0x36   : > { %1545 = vst [vmem:[%s2029_s19 + $0xb8] sm:$0x3] %v1544_v27 }
  0x37   : > { %1547 = vst [vmem:[%s2029_s19 + $0xd0] sm:$0x3] %v1546_v28 }
  0x38   : > { %1549 = vst [vmem:[%s2029_s19 + $0xe8] sm:$0x3] %v1548_v29 }
  0x39   : > { %257 = vsyncadd %s171_s20, 2880 }
  0x3a PF: > { %s259_s21 = smul.u32 240, %s3051_s4  ;;  %s261_s23 = scalar_lea.sflag [#allocation3], %s3051_s4 }
  0x3c   : > { %s2090_s22 = scalar_lea.vmem [#allocation2], %s259_s21 }
  0x3d   : > { %1928 = dma.done.wait %s261_s23, 2880 }
  0x3e   : > { %1929 = vsyncadd %s261_s23, 4294964416  ;;  %s266_s24 = sadd.s32 1, %s1932_s12 }
  0x3f   : > { %p1550_p10 = scmp.ge.s32.totalorder %s266_s24, 2 }
  0x40   : > { %s271_s25 = ssub.s32 (!%p1550_p10), 1, %s3051_s4  ;;  %s1458_s26 = smul.u32 (!%p1550_p10), 192, %s1932_s12 }
  0x41   : > { %270 = sbr.rel (%p1550_p10) target bundleno = 102 (0x66), region = 58 }
  0x42   : > { %s1459_s27 = smul.u32 (!%p1550_p10), 432, %s1936_s13  ;;  %s279_s13 = scalar_lea.sflag (!%p1550_p10), [#allocation3], %s271_s25 }
  0x43   : > { %s277_s28 = smul.u32 (!%p1550_p10), 240, %s271_s25 }
  0x44   : > { %s1460_s30 = sadd.s32 (!%p1550_p10), %s1459_s27, %s1458_s26 }
  0x45   : > { %s2102_s7 = scalar_lea.vmem (!%p1550_p10), %s3032_s0, %s1460_s30  ;;  %s2107_s12 = scalar_lea.vmem (!%p1550_p10), [#allocation2], %s277_s28 }
  0x46   : > { %v1551_v30 = vld [vmem:[%s2102_s7 + $0xc0] sm:$0xff]  ;;  %v1552_v31 = vld [vmem:[%s2102_s7 + $0xc8] sm:$0xff]  ;;  %v1553_v32 = vld [vmem:[%s2102_s7 + $0xd8] sm:$0xff] }
  0x47   : > { %293 = vst [vmem:[%s2107_s12] sm:$0xff] %v1551_v30  ;;  %v1554_v33 = vld [vmem:[%s2102_s7 + $0xe0] sm:$0xff]  ;;  %v1555_v34 = vld [vmem:[%s2102_s7 + $0xf0] sm:$0xff]  ;;  %v1556_v35 = vld [vmem:[%s2102_s7 + $0xf8] sm:$0xff] }
  0x48   : > { %295 = vst [vmem:[%s2107_s12 + $0x8] sm:$0xff] %v1552_v31  ;;  %v1557_v36 = vld [vmem:[%s2102_s7 + $0x108] sm:$0xff]  ;;  %v1558_v37 = vld [vmem:[%s2102_s7 + $0x110] sm:$0xff]  ;;  %v1559_v38 = vld [vmem:[%s2102_s7 + $0x120] sm:$0xff] }
  0x49   : > { %297 = vst [vmem:[%s2107_s12 + $0x18] sm:$0xff] %v1553_v32  ;;  %v1560_v39 = vld [vmem:[%s2102_s7 + $0x128] sm:$0xff]  ;;  %v1561_v40 = vld [vmem:[%s2102_s7 + $0x138] sm:$0xff]  ;;  %v1562_v41 = vld [vmem:[%s2102_s7 + $0x140] sm:$0xff] }
  0x4a   : > { %299 = vst [vmem:[%s2107_s12 + $0x20] sm:$0xff] %v1554_v33  ;;  %v1563_v42 = vld [vmem:[%s2102_s7 + $0x150] sm:$0xff]  ;;  %v1564_v43 = vld [vmem:[%s2102_s7 + $0x158] sm:$0xff]  ;;  %v1565_v44 = vld [vmem:[%s2102_s7 + $0x168] sm:$0xff] }
  0x4b   : > { %301 = vst [vmem:[%s2107_s12 + $0x30] sm:$0xff] %v1555_v34  ;;  %v1566_v45 = vld [vmem:[%s2102_s7 + $0x170] sm:$0xff]  ;;  %v1567_v46 = vld [vmem:[%s2102_s7 + $0x180] sm:$0xff]  ;;  %v1568_v47 = vld [vmem:[%s2102_s7 + $0x188] sm:$0xff] }
  0x4c   : > { %303 = vst [vmem:[%s2107_s12 + $0x38] sm:$0xff] %v1556_v35  ;;  %v1569_v48 = vld [vmem:[%s2102_s7 + $0x198] sm:$0xff]  ;;  %v1570_v49 = vld [vmem:[%s2102_s7 + $0x1a0] sm:$0xff]  ;;  %v1571_v50 = vld [vmem:[%s2102_s7 + $0xd0] sm:$0x3] }
  0x4d   : > { %305 = vst [vmem:[%s2107_s12 + $0x48] sm:$0xff] %v1557_v36  ;;  %v1573_v51 = vld [vmem:[%s2102_s7 + $0xe8] sm:$0x3]  ;;  %v1575_v52 = vld [vmem:[%s2102_s7 + $0x100] sm:$0x3] }
  0x4e   : > { %307 = vst [vmem:[%s2107_s12 + $0x50] sm:$0xff] %v1558_v37  ;;  %v1577_v53 = vld [vmem:[%s2102_s7 + $0x118] sm:$0x3]  ;;  %v1579_v54 = vld [vmem:[%s2102_s7 + $0x130] sm:$0x3] }
  0x4f   : > { %309 = vst [vmem:[%s2107_s12 + $0x60] sm:$0xff] %v1559_v38  ;;  %v1581_v55 = vld [vmem:[%s2102_s7 + $0x148] sm:$0x3]  ;;  %v1583_v56 = vld [vmem:[%s2102_s7 + $0x160] sm:$0x3] }
  0x50   : > { %311 = vst [vmem:[%s2107_s12 + $0x68] sm:$0xff] %v1560_v39  ;;  %v1585_v57 = vld [vmem:[%s2102_s7 + $0x178] sm:$0x3]  ;;  %v1587_v58 = vld [vmem:[%s2102_s7 + $0x190] sm:$0x3] }
  0x51   : > { %313 = vst [vmem:[%s2107_s12 + $0x78] sm:$0xff] %v1561_v40  ;;  %v1589_v59 = vld [vmem:[%s2102_s7 + $0x1a8] sm:$0x3] }
  0x52   : > { %315 = vst [vmem:[%s2107_s12 + $0x80] sm:$0xff] %v1562_v41 }
  0x53   : > { %317 = vst [vmem:[%s2107_s12 + $0x90] sm:$0xff] %v1563_v42 }
  0x54   : > { %319 = vst [vmem:[%s2107_s12 + $0x98] sm:$0xff] %v1564_v43 }
  0x55   : > { %321 = vst [vmem:[%s2107_s12 + $0xa8] sm:$0xff] %v1565_v44 }
  0x56   : > { %323 = vst [vmem:[%s2107_s12 + $0xb0] sm:$0xff] %v1566_v45 }
  0x57   : > { %325 = vst [vmem:[%s2107_s12 + $0xc0] sm:$0xff] %v1567_v46 }
  0x58   : > { %327 = vst [vmem:[%s2107_s12 + $0xc8] sm:$0xff] %v1568_v47 }
  0x59   : > { %329 = vst [vmem:[%s2107_s12 + $0xd8] sm:$0xff] %v1569_v48 }
  0x5a   : > { %331 = vst [vmem:[%s2107_s12 + $0xe0] sm:$0xff] %v1570_v49 }
  0x5b   : > { %1572 = vst [vmem:[%s2107_s12 + $0x10] sm:$0x3] %v1571_v50 }
  0x5c   : > { %1574 = vst [vmem:[%s2107_s12 + $0x28] sm:$0x3] %v1573_v51 }
  0x5d   : > { %1576 = vst [vmem:[%s2107_s12 + $0x40] sm:$0x3] %v1575_v52 }
  0x5e   : > { %1578 = vst [vmem:[%s2107_s12 + $0x58] sm:$0x3] %v1577_v53 }
  0x5f   : > { %1580 = vst [vmem:[%s2107_s12 + $0x70] sm:$0x3] %v1579_v54 }
  0x60   : > { %1582 = vst [vmem:[%s2107_s12 + $0x88] sm:$0x3] %v1581_v55 }
  0x61   : > { %1584 = vst [vmem:[%s2107_s12 + $0xa0] sm:$0x3] %v1583_v56 }
  0x62   : > { %1586 = vst [vmem:[%s2107_s12 + $0xb8] sm:$0x3] %v1585_v57 }
  0x63   : > { %1588 = vst [vmem:[%s2107_s12 + $0xd0] sm:$0x3] %v1587_v58 }
  0x64   : > { %1590 = vst [vmem:[%s2107_s12 + $0xe8] sm:$0x3] %v1589_v59 }
  0x65   : > { %365 = vsyncadd %s279_s13, 2880 }
  0x66 PF: > { %v1606_v60 = vld [vmem:[%s3033_s1 + $0xf8] sm:$0xff]  ;;  %v1605_v61 = vld [vmem:[%s3033_s1 + $0xf0] sm:$0xff]  ;;  %v1604_v62 = vld [vmem:[%s3033_s1 + $0xe8] sm:$0xff] }
  0x67   : > { %1819 = vmatpush.msra.mxu1 %v1606_v60  ;;  %1820 = vmatpush.msra.mxu2 %v1606_v60  ;;  %v1603_v63 = vld [vmem:[%s3033_s1 + $0xe0] sm:$0xff]  ;;  %v1602_v0 = vld [vmem:[%s3033_s1 + $0xd8] sm:$0xff]  ;;  %v1601_v1 = vld [vmem:[%s3033_s1 + $0xd0] sm:$0xff] }
  0x68   : > { %1821 = vmatpush.msra.mxu3 %v1606_v60  ;;  %431 = vmatpush.msra.mxu0 %v1606_v60  ;;  %v1600_v2 = vld [vmem:[%s3033_s1 + $0xc8] sm:$0xff]  ;;  %v1599_v3 = vld [vmem:[%s3033_s1 + $0xc0] sm:$0xff]  ;;  %v1598_v4 = vld [vmem:[%s3033_s1 + $0xb8] sm:$0xff] }
  0x69   : > { %1822 = vmatpush.msra.mxu1 %v1605_v61  ;;  %1823 = vmatpush.msra.mxu2 %v1605_v61  ;;  %v1597_v5 = vld [vmem:[%s3033_s1 + $0xb0] sm:$0xff]  ;;  %v1596_v6 = vld [vmem:[%s3033_s1 + $0xa8] sm:$0xff]  ;;  %v1595_v7 = vld [vmem:[%s3033_s1 + $0xa0] sm:$0xff] }
  0x6a   : > { %1824 = vmatpush.msra.mxu3 %v1605_v61  ;;  %432 = vmatpush.msra.mxu0 %v1605_v61  ;;  %v1594_v8 = vld [vmem:[%s3033_s1 + $0x98] sm:$0xff]  ;;  %v1593_v9 = vld [vmem:[%s3033_s1 + $0x90] sm:$0xff]  ;;  %v1592_v10 = vld [vmem:[%s3033_s1 + $0x88] sm:$0xff] }
  0x6b   : > { %1825 = vmatpush.msra.mxu1 %v1604_v62  ;;  %1826 = vmatpush.msra.mxu2 %v1604_v62  ;;  %v1591_v11 = vld [vmem:[%s3033_s1 + $0x80] sm:$0xff]  ;;  %v1622_v14 = vld [vmem:[%s3033_s1 + $0x178] sm:$0xff]  ;;  %v1621_v17 = vld [vmem:[%s3033_s1 + $0x170] sm:$0xff] }
  0x6c   : > { %1827 = vmatpush.msra.mxu3 %v1604_v62  ;;  %433 = vmatpush.msra.mxu0 %v1604_v62  ;;  %v2217_v12 = vld [vmem:[%s2090_s22 + $0x31] sm:$0xff]  ;;  %v2220_v13 = vld [vmem:[%s2090_s22 + $0x61] sm:$0xff]  ;;  %v2263_v27 = vld [vmem:[%s2090_s22 + $0x69] sm:$0xff] }
  0x6d   : > { %1828 = vmatpush.msra.mxu1 %v1603_v63  ;;  %1829 = vmatpush.msra.mxu2 %v1603_v63  ;;  %v397_v15 = vld [vmem:[%s3033_s1 + $0x78] sm:$0xff]  ;;  %v396_v19 = vld [vmem:[%s3033_s1 + $0x70] sm:$0xff]  ;;  %v1620_v20 = vld [vmem:[%s3033_s1 + $0x168] sm:$0xff] }
  0x6e   : > { %1830 = vmatpush.msra.mxu3 %v1603_v63  ;;  %434 = vmatpush.msra.mxu0 %v1603_v63  ;;  %v2229_v16 = vld [vmem:[%s2090_s22 + $0x91] sm:$0xff]  ;;  %v398_v23 = vld [vmem:[%s2090_s22 + $0x1] sm:$0xff]  ;;  %v2266_v28 = vld [vmem:[%s2090_s22 + $0x39] sm:$0xff] }
  0x6f   : > { %1831 = vmatpush.msra.mxu1 %v1602_v0  ;;  %1832 = vmatpush.msra.mxu2 %v1602_v0  ;;  %v1654_v18 = vld [vmem:[%s3033_s1 + $0x1f8] sm:$0xff]  ;;  %v1653_v21 = vld [vmem:[%s3033_s1 + $0x1f0] sm:$0xff]  ;;  %v395_v22 = vld [vmem:[%s3033_s1 + $0x68] sm:$0xff] }
  0x70   : > { %1833 = vmatpush.msra.mxu3 %v1602_v0  ;;  %435 = vmatpush.msra.mxu0 %v1602_v0  ;;  %v1619_v24 = vld [vmem:[%s3033_s1 + $0x160] sm:$0xff]  ;;  %v1652_v25 = vld [vmem:[%s3033_s1 + $0x1e8] sm:$0xff]  ;;  %v1618_v29 = vld [vmem:[%s3033_s1 + $0x158] sm:$0xff] }
  0x71   : > { %1834 = vmatpush.msra.mxu1 %v1601_v1  ;;  %1835 = vmatpush.msra.mxu2 %v1601_v1  ;;  %v394_v26 = vld [vmem:[%s3033_s1 + $0x60] sm:$0xff]  ;;  %v393_v31 = vld [vmem:[%s3033_s1 + $0x58] sm:$0xff]  ;;  %v1617_v33 = vld [vmem:[%s3033_s1 + $0x150] sm:$0xff] }
  0x72   : > { %1836 = vmatpush.msra.mxu3 %v1601_v1  ;;  %436 = vmatpush.msra.mxu0 %v1601_v1  ;;  %v1651_v30 = vld [vmem:[%s3033_s1 + $0x1e0] sm:$0xff]  ;;  %v1650_v34 = vld [vmem:[%s3033_s1 + $0x1d8] sm:$0xff]  ;;  %v392_v36 = vld [vmem:[%s3033_s1 + $0x50] sm:$0xff] }
  0x73   : > { %1837 = vmatpush.msra.mxu1 %v1600_v2  ;;  %1838 = vmatpush.msra.mxu2 %v1600_v2  ;;  %v2279_v32 = vld [vmem:[%s2090_s22 + $0x99] sm:$0xff]  ;;  %v2323_v46 = vld [vmem:[%s2090_s22 + $0x49] sm:$0xff]  ;;  %v2381_v1 = vld [vmem:[%s2090_s22 + $0x81] sm:$0xff] }
  0x74   : > { %1839 = vmatpush.msra.mxu3 %v1600_v2  ;;  %437 = vmatpush.msra.mxu0 %v1600_v2  ;;  %v1686_v35 = vld [vmem:[%s3033_s1 + $0x278] sm:$0xff]  ;;  %v1616_v37 = vld [vmem:[%s3033_s1 + $0x148] sm:$0xff]  ;;  %v1649_v38 = vld [vmem:[%s3033_s1 + $0x1d0] sm:$0xff] }
  0x75   : > { %1840 = vmatpush.msra.mxu1 %v1599_v3  ;;  %1841 = vmatpush.msra.mxu2 %v1599_v3  ;;  %v1685_v39 = vld [vmem:[%s3033_s1 + $0x270] sm:$0xff]  ;;  %v391_v40 = vld [vmem:[%s3033_s1 + $0x48] sm:$0xff]  ;;  %v1615_v41 = vld [vmem:[%s3033_s1 + $0x140] sm:$0xff] }
  0x76   : > { %1842 = vmatpush.msra.mxu3 %v1599_v3  ;;  %438 = vmatpush.msra.mxu0 %v1599_v3  ;;  %v1648_v42 = vld [vmem:[%s3033_s1 + $0x1c8] sm:$0xff]  ;;  %v390_v44 = vld [vmem:[%s3033_s1 + $0x40] sm:$0xff]  ;;  %v1614_v47 = vld [vmem:[%s3033_s1 + $0x138] sm:$0xff] }
  0x77   : > { %1843 = vmatpush.msra.mxu1 %v1598_v4  ;;  %1844 = vmatpush.msra.mxu2 %v1598_v4  ;;  %v1684_v43 = vld [vmem:[%s3033_s1 + $0x268] sm:$0xff]  ;;  %v1647_v48 = vld [vmem:[%s3033_s1 + $0x1c0] sm:$0xff]  ;;  %v389_v50 = vld [vmem:[%s3033_s1 + $0x38] sm:$0xff] }
  0x78   : > { %1845 = vmatpush.msra.mxu3 %v1598_v4  ;;  %439 = vmatpush.msra.mxu0 %v1598_v4  ;;  %v2320_v45 = vld [vmem:[%s2090_s22 + $0x79] sm:$0xff]  ;;  %v399_v51 = vld [vmem:[%s2090_s22 + $0x9] sm:$0xff]  ;;  %v2384_v2 = vld [vmem:[%s2090_s22 + $0x51] sm:$0xff] }
  0x79   : > { %1846 = vmatpush.msra.mxu1 %v1597_v5  ;;  %1847 = vmatpush.msra.mxu2 %v1597_v5  ;;  %v1683_v49 = vld [vmem:[%s3033_s1 + $0x260] sm:$0xff]  ;;  %v1613_v53 = vld [vmem:[%s3033_s1 + $0x130] sm:$0xff]  ;;  %v1646_v54 = vld [vmem:[%s3033_s1 + $0x1b8] sm:$0xff] }
  0x7a   : > { %1848 = vmatpush.msra.mxu3 %v1597_v5  ;;  %440 = vmatpush.msra.mxu0 %v1597_v5  ;;  %v2341_v52 = vld [vmem:[%s2090_s22 + $0xa9] sm:$0xff] }
  0x7b   : > { %1849 = vmatpush.msra.mxu1 %v1596_v6  ;;  %1850 = vmatpush.msra.mxu2 %v1596_v6  ;;  %v1682_v55 = vld [vmem:[%s3033_s1 + $0x258] sm:$0xff]  ;;  %v388_v56 = vld [vmem:[%s3033_s1 + $0x30] sm:$0xff]  ;;  %v1612_v57 = vld [vmem:[%s3033_s1 + $0x128] sm:$0xff] }
  0x7c   : > { %1851 = vmatpush.msra.mxu3 %v1596_v6  ;;  %441 = vmatpush.msra.mxu0 %v1596_v6  ;;  %v1645_v58 = vld [vmem:[%s3033_s1 + $0x1b0] sm:$0xff]  ;;  %v387_v60 = vld [vmem:[%s3033_s1 + $0x28] sm:$0xff]  ;;  %v1611_v61 = vld [vmem:[%s3033_s1 + $0x120] sm:$0xff] }
  0x7d   : > { %1852 = vmatpush.msra.mxu1 %v1595_v7  ;;  %1853 = vmatpush.msra.mxu2 %v1595_v7  ;;  %v1681_v59 = vld [vmem:[%s3033_s1 + $0x250] sm:$0xff]  ;;  %v1644_v62 = vld [vmem:[%s3033_s1 + $0x1a8] sm:$0xff]  ;;  %v386_v0 = vld [vmem:[%s3033_s1 + $0x20] sm:$0xff] }
  0x7e   : > { %1854 = vmatpush.msra.mxu3 %v1595_v7  ;;  %442 = vmatpush.msra.mxu0 %v1595_v7  ;;  %v1680_v63 = vld [vmem:[%s3033_s1 + $0x248] sm:$0xff]  ;;  %v1610_v3 = vld [vmem:[%s3033_s1 + $0x118] sm:$0xff]  ;;  %v1643_v4 = vld [vmem:[%s3033_s1 + $0x1a0] sm:$0xff] }
  0x7f   : > { %1855 = vmatpush.msra.mxu1 %v1594_v8  ;;  %1856 = vmatpush.msra.mxu2 %v1594_v8  ;;  %v1679_v5 = vld [vmem:[%s3033_s1 + $0x240] sm:$0xff]  ;;  %v385_v6 = vld [vmem:[%s3033_s1 + $0x18] sm:$0xff] }
  0x80   : > { %1857 = vmatpush.msra.mxu3 %v1594_v8  ;;  %443 = vmatpush.msra.mxu0 %v1594_v8  ;;  %v2400_v7 = vld [vmem:[%s2090_s22 + $0x19] sm:$0xff]  ;;  %v2404_v8 = vld [vmem:[%s2090_s22 + $0xb1] sm:$0xff] }
  0x81   : > { %1858 = vmatpush.msra.mxu1 %v1593_v9  ;;  %1859 = vmatpush.msra.mxu2 %v1593_v9 }
  0x82   : > { %1860 = vmatpush.msra.mxu3 %v1593_v9  ;;  %444 = vmatpush.msra.mxu0 %v1593_v9  ;;  %v1609_v9 = vld [vmem:[%s3033_s1 + $0x110] sm:$0xff] }
  0x83   : > { %1861 = vmatpush.msra.mxu1 %v1592_v10  ;;  %1862 = vmatpush.msra.mxu2 %v1592_v10 }
  0x84   : > { %1863 = vmatpush.msra.mxu3 %v1592_v10  ;;  %445 = vmatpush.msra.mxu0 %v1592_v10  ;;  %v1642_v10 = vld [vmem:[%s3033_s1 + $0x198] sm:$0xff] }
  0x85   : > { %1864 = vmatpush.msra.mxu1 %v1591_v11  ;;  %1865 = vmatpush.msra.mxu2 %v1591_v11 }
  0x86   : > { %459 = vmatmul.f32.vlgmr.msra.gmra.mxu1 %v2217_v12  ;;  %471 = vmatmul.f32.vlgmr.msra.gmra.mxu2 %v2220_v13 }
  0x87   : > { %594 = vmatpush.msrb.mxu2 %v1622_v14  ;;  %1866 = vmatpush.msra.mxu3 %v1591_v11  ;;  %v384_v14 = vld [vmem:[%s3033_s1 + $0x10] sm:$0xff] }
  0x88   : > { %496 = vmatpush.msrb.mxu1 %v397_v15  ;;  %483 = vmatmul.f32.vlgmr.msra.gmra.mxu3 %v2229_v16  ;;  %v1608_v15 = vld [vmem:[%s3033_s1 + $0x108] sm:$0xff] }
  0x89   : > { %595 = vmatpush.msrb.mxu2 %v1621_v17  ;;  %709 = vmatpush.msrb.mxu3 %v1654_v18  ;;  %v1641_v17 = vld [vmem:[%s3033_s1 + $0x190] sm:$0xff] }
  0x8a   : > { %497 = vmatpush.msrb.mxu1 %v396_v19  ;;  %446 = vmatpush.msra.mxu0 %v1591_v11  ;;  %v1678_v11 = vld [vmem:[%s3033_s1 + $0x238] sm:$0xff]  ;;  %v1677_v18 = vld [vmem:[%s3033_s1 + $0x230] sm:$0xff]  ;;  %v383_v19 = vld [vmem:[%s3033_s1 + $0x8] sm:$0xff] }
  0x8b   : > { %596 = vmatpush.msrb.mxu2 %v1620_v20  ;;  %710 = vmatpush.msrb.mxu3 %v1653_v21  ;;  %v1607_v20 = vld [vmem:[%s3033_s1 + $0x100] sm:$0xff]  ;;  %v1640_v21 = vld [vmem:[%s3033_s1 + $0x188] sm:$0xff] }
  0x8c   : > { %498 = vmatpush.msrb.mxu1 %v395_v22  ;;  %447 = vmatmul.f32.vlgmr.msra.gmra.mxu0 %v398_v23  ;;  %v1676_v22 = vld [vmem:[%s3033_s1 + $0x228] sm:$0xff]  ;;  %v382_v23 = vld [vmem:[%s3033_s1] sm:$0xff] }
  0x8d   : > { %597 = vmatpush.msrb.mxu2 %v1619_v24  ;;  %711 = vmatpush.msrb.mxu3 %v1652_v25  ;;  %v561_v24 = vld [vmem:[%s2090_s22 + $0x2] sm:$0xff] }
  0x8e   : > { %499 = vmatpush.msrb.mxu1 %v394_v26  ;;  %474 = vmatmul.f32.gmra.mxu2 %v2263_v27  ;;  %v366_v25 = vld [vmem:[%s2090_s22] sm:$0xff] }
  0x8f   : > { %462 = vmatmul.f32.gmra.mxu1 %v2266_v28  ;;  %598 = vmatpush.msrb.mxu2 %v1618_v29  ;;  %v1639_v26 = vld [vmem:[%s3033_s1 + $0x180] sm:$0xff] }
  0x90   : > { %712 = vmatpush.msrb.mxu3 %v1651_v30  ;;  %500 = vmatpush.msrb.mxu1 %v393_v31  ;;  %v1675_v29 = vld [vmem:[%s3033_s1 + $0x220] sm:$0xff]  ;;  %v1750_v30 = vld [vmem:[%s3033_s1 + $0x378] sm:$0xff] }
  0x91   : > { %486 = vmatmul.f32.gmra.mxu3 %v2279_v32  ;;  %599 = vmatpush.msrb.mxu2 %v1617_v33  ;;  %v2456_v31 = vld [vmem:[%s2090_s22 + $0x21] sm:$0xff]  ;;  %v1623_v33 = vld [vmem:[%s2090_s22 + $0x18] sm:$0xff] }
  0x92   : > { %713 = vmatpush.msrb.mxu3 %v1650_v34  ;;  %823 = vmatpush.msrb.mxu0 %v1686_v35  ;;  %v1674_v34 = vld [vmem:[%s3033_s1 + $0x218] sm:$0xff] }
  0x93   : > { %501 = vmatpush.msrb.mxu1 %v392_v36  ;;  %600 = vmatpush.msrb.mxu2 %v1616_v37  ;;  %v1782_v35 = vld [vmem:[%s3033_s1 + $0x3f8] sm:$0xff]  ;;  %v1749_v37 = vld [vmem:[%s3033_s1 + $0x370] sm:$0xff] }
  0x94   : > { %714 = vmatpush.msrb.mxu3 %v1649_v38  ;;  %824 = vmatpush.msrb.mxu0 %v1685_v39  ;;  %v1718_v36 = vld [vmem:[%s3033_s1 + $0x2f8] sm:$0xff]  ;;  %v1673_v38 = vld [vmem:[%s3033_s1 + $0x210] sm:$0xff] }
  0x95   : > { %502 = vmatpush.msrb.mxu1 %v391_v40  ;;  %601 = vmatpush.msrb.mxu2 %v1615_v41  ;;  %v1781_v39 = vld [vmem:[%s3033_s1 + $0x3f0] sm:$0xff]  ;;  %v1748_v41 = vld [vmem:[%s3033_s1 + $0x368] sm:$0xff] }
  0x96   : > { %715 = vmatpush.msrb.mxu3 %v1648_v42  ;;  %825 = vmatpush.msrb.mxu0 %v1684_v43  ;;  %v1717_v40 = vld [vmem:[%s3033_s1 + $0x2f0] sm:$0xff]  ;;  %v1672_v42 = vld [vmem:[%s3033_s1 + $0x208] sm:$0xff] }
  0x97   : > { %503 = vmatpush.msrb.mxu1 %v390_v44  ;;  %477 = vmatmul.f32.gmra.mxu2 %v2320_v45  ;;  %v562_v43 = vld [vmem:[%s2090_s22 + $0xa] sm:$0xff] }
  0x98   : > { %465 = vmatmul.f32.gmra.mxu1 %v2323_v46  ;;  %602 = vmatpush.msrb.mxu2 %v1614_v47  ;;  %v367_v44 = vld [vmem:[%s2090_s22 + $0x8] sm:$0xff] }
  0x99   : > { %716 = vmatpush.msrb.mxu3 %v1647_v48  ;;  %826 = vmatpush.msrb.mxu0 %v1683_v49  ;;  %v1780_v47 = vld [vmem:[%s3033_s1 + $0x3e8] sm:$0xff]  ;;  %v1671_v48 = vld [vmem:[%s3033_s1 + $0x200] sm:$0xff] }
  0x9a   : > { %504 = vmatpush.msrb.mxu1 %v389_v50  ;;  %450 = vmatmul.f32.gmra.mxu0 %v399_v51  ;;  %v1716_v49 = vld [vmem:[%s3033_s1 + $0x2e8] sm:$0xff]  ;;  %v1624_v50 = vld [vmem:[%s2090_s22 + $0x20] sm:$0xff]  ;;  %v1814_v51 = vld [vmem:[%s3033_s1 + $0x478] sm:$0xff] }
  0x9b   : > { %489 = vmatmul.f32.gmra.mxu3 %v2341_v52  ;;  %603 = vmatpush.msrb.mxu2 %v1613_v53  ;;  %v1747_v53 = vld [vmem:[%s3033_s1 + $0x360] sm:$0xff] }
  0x9c   : > { %717 = vmatpush.msrb.mxu3 %v1646_v54  ;;  %827 = vmatpush.msrb.mxu0 %v1682_v55  ;;  %v1779_v54 = vld [vmem:[%s3033_s1 + $0x3e0] sm:$0xff] }
  0x9d   : > { %505 = vmatpush.msrb.mxu1 %v388_v56  ;;  %604 = vmatpush.msrb.mxu2 %v1612_v57  ;;  %v1715_v55 = vld [vmem:[%s3033_s1 + $0x2e0] sm:$0xff]  ;;  %v1813_v56 = vld [vmem:[%s3033_s1 + $0x470] sm:$0xff]  ;;  %v1746_v57 = vld [vmem:[%s3033_s1 + $0x358] sm:$0xff] }
  0x9e   : > { %718 = vmatpush.msrb.mxu3 %v1645_v58  ;;  %828 = vmatpush.msrb.mxu0 %v1681_v59  ;;  %v1778_v58 = vld [vmem:[%s3033_s1 + $0x3d8] sm:$0xff] }
  0x9f   : > { %506 = vmatpush.msrb.mxu1 %v387_v60  ;;  %605 = vmatpush.msrb.mxu2 %v1611_v61  ;;  %v1714_v59 = vld [vmem:[%s3033_s1 + $0x2d8] sm:$0xff]  ;;  %v1812_v61 = vld [vmem:[%s3033_s1 + $0x468] sm:$0xff] }
  0xa0   : > { %719 = vmatpush.msrb.mxu3 %v1644_v62  ;;  %829 = vmatpush.msrb.mxu0 %v1680_v63  ;;  %v2525_v60 = vld [vmem:[%s2090_s22 + $0x1a] sm:$0xff] }
  0xa1   : > { %507 = vmatpush.msrb.mxu1 %v386_v0  ;;  %480 = vmatmul.f32.gmra.mxu2 %v2381_v1  ;;  %v1745_v62 = vld [vmem:[%s3033_s1 + $0x350] sm:$0xff]  ;;  %v1811_v63 = vld [vmem:[%s3033_s1 + $0x460] sm:$0xff] }
  0xa2   : > { %468 = vmatmul.f32.gmra.mxu1 %v2384_v2  ;;  %606 = vmatpush.msrb.mxu2 %v1610_v3  ;;  %v1777_v0 = vld [vmem:[%s3033_s1 + $0x3d0] sm:$0xff] }
  0xa3   : > { %720 = vmatpush.msrb.mxu3 %v1643_v4  ;;  %830 = vmatpush.msrb.mxu0 %v1679_v5  ;;  %v2541_v3 = vld [vmem:[%s2090_s22 + $0x30] sm:$0xff]  ;;  %v1810_v4 = vld [vmem:[%s3033_s1 + $0x458] sm:$0xff] }
  0xa4   : > { %508 = vmatpush.msrb.mxu1 %v385_v6  ;;  %453 = vmatmul.f32.gmra.mxu0 %v2400_v7  ;;  %v1713_v5 = vld [vmem:[%s3033_s1 + $0x2d0] sm:$0xff]  ;;  %v1744_v6 = vld [vmem:[%s3033_s1 + $0x348] sm:$0xff] }
  0xa5   : > { %492 = vmatmul.f32.gmra.mxu3 %v2404_v8  ;;  %607 = vmatpush.msrb.mxu2 %v1609_v9  ;;  %v1809_v9 = vld [vmem:[%s3033_s1 + $0x450] sm:$0xff] }
  0xa6   : > { %721 = vmatpush.msrb.mxu3 %v1642_v10  ;;  %831 = vmatpush.msrb.mxu0 %v1678_v11  ;;  %v1712_v10 = vld [vmem:[%s3033_s1 + $0x2c8] sm:$0xff] }
  0xa7   : > { %509 = vmatpush.msrb.mxu1 %v384_v14  ;;  %608 = vmatpush.msrb.mxu2 %v1608_v15  ;;  %v2564_v11 = vld [vmem:[%s2090_s22 + $0x22] sm:$0xff]  ;;  %v2568_v14 = vld [vmem:[%s2090_s22 + $0x38] sm:$0xff] }
  0xa8   : > { %722 = vmatpush.msrb.mxu3 %v1641_v17  ;;  %832 = vmatpush.msrb.mxu0 %v1677_v18  ;;  %v1743_v15 = vld [vmem:[%s3033_s1 + $0x340] sm:$0xff]  ;;  %v1808_v18 = vld [vmem:[%s3033_s1 + $0x448] sm:$0xff] }
  0xa9   : > { %510 = vmatpush.msrb.mxu1 %v383_v19  ;;  %609 = vmatpush.msrb.mxu2 %v1607_v20  ;;  %v1775_v17 = vld [vmem:[%s3033_s1 + $0x3c0] sm:$0xff] }
  0xaa   : > { %723 = vmatpush.msrb.mxu3 %v1640_v21  ;;  %833 = vmatpush.msrb.mxu0 %v1676_v22  ;;  %v1711_v19 = vld [vmem:[%s3033_s1 + $0x2c0] sm:$0xff]  ;;  %v2589_v21 = vld [vmem:[%s2090_s22 + $0x48] sm:$0xff] }
  0xab   : > { %511 = vmatpush.msrb.mxu1 %v382_v23  ;;  %610 = vmatmul.f32.vlgmr.msrb.gmra.mxu2 %v561_v24  ;;  %v2585_v20 = vld [vmem:[%s2090_s22 + $0x32] sm:$0xff] }
  0xac   : > { %512 = vmatmul.f32.vlgmr.msrb.gmra.mxu1 %v366_v25  ;;  %724 = vmatpush.msrb.mxu3 %v1639_v26  ;;  %v1742_v22 = vld [vmem:[%s3033_s1 + $0x338] sm:$0xff]  ;;  %v1807_v24 = vld [vmem:[%s3033_s1 + $0x440] sm:$0xff] }
  0xad   : > { %834 = vmatpush.msrb.mxu0 %v1675_v29  ;;  %1052 = vmatpush.msra.mxu2 %v1750_v30  ;;  %v1774_v23 = vld [vmem:[%s3033_s1 + $0x3b8] sm:$0xff]  ;;  %v2611_v29 = vld [vmem:[%s2090_s22 + $0x50] sm:$0xff] }
  0xae   : > { %456 = vmatmul.f32.gmra.mxu0 %v2456_v31  ;;  %725 = vmatmul.f32.vlgmr.msrb.gmra.mxu3 %v1623_v33  ;;  %v1710_v25 = vld [vmem:[%s3033_s1 + $0x2b8] sm:$0xff]  ;;  %v1741_v30 = vld [vmem:[%s3033_s1 + $0x330] sm:$0xff] }
  0xaf   : > { %835 = vmatpush.msrb.mxu0 %v1674_v34  ;;  %1166 = vmatpush.msra.mxu3 %v1782_v35  ;;  %v2607_v26 = vld [vmem:[%s2090_s22 + $0x3a] sm:$0xff]  ;;  %v2629_v35 = vld [vmem:[%s2090_s22 + $0x4a] sm:$0xff] }
  0xb0   : > { %937 = vmatpush.msra.mxu1 %v1718_v36  ;;  %1053 = vmatpush.msra.mxu2 %v1749_v37  ;;  %v1709_v34 = vld [vmem:[%s3033_s1 + $0x2b0] sm:$0xff]  ;;  %v1740_v37 = vld [vmem:[%s3033_s1 + $0x328] sm:$0xff] }
  0xb1   : > { %836 = vmatpush.msrb.mxu0 %v1673_v38  ;;  %1167 = vmatpush.msra.mxu3 %v1781_v39  ;;  %v2633_v36 = vld [vmem:[%s2090_s22 + $0x60] sm:$0xff]  ;;  %v1772_v38 = vld [vmem:[%s3033_s1 + $0x3a8] sm:$0xff] }
  0xb2   : > { %938 = vmatpush.msra.mxu1 %v1717_v40  ;;  %1054 = vmatpush.msra.mxu2 %v1748_v41  ;;  %v1805_v39 = vld [vmem:[%s3033_s1 + $0x430] sm:$0xff]  ;;  %v1708_v40 = vld [vmem:[%s3033_s1 + $0x2a8] sm:$0xff] }
  0xb3   : > { %837 = vmatpush.msrb.mxu0 %v1672_v42  ;;  %613 = vmatmul.f32.gmra.mxu2 %v562_v43  ;;  %v2651_v41 = vld [vmem:[%s2090_s22 + $0x52] sm:$0xff]  ;;  %v2655_v42 = vld [vmem:[%s2090_s22 + $0x68] sm:$0xff] }
  0xb4   : > { %515 = vmatmul.f32.gmra.mxu1 %v367_v44  ;;  %1168 = vmatpush.msra.mxu3 %v1780_v47  ;;  %v1739_v43 = vld [vmem:[%s3033_s1 + $0x320] sm:$0xff]  ;;  %v1804_v47 = vld [vmem:[%s3033_s1 + $0x428] sm:$0xff] }
  0xb5   : > { %838 = vmatpush.msrb.mxu0 %v1671_v48  ;;  %939 = vmatpush.msra.mxu1 %v1716_v49  ;;  %v1771_v44 = vld [vmem:[%s3033_s1 + $0x3a0] sm:$0xff] }
  0xb6   : > { %728 = vmatmul.f32.gmra.mxu3 %v1624_v50  ;;  %839 = vmatmul.f32.vlgmr.msrb.gmra.mxu0 %v2400_v7  ;;  %v1776_v7 = vld [vmem:[%s3033_s1 + $0x3c8] sm:$0xff]  ;;  %v1707_v48 = vld [vmem:[%s3033_s1 + $0x2a0] sm:$0xff] }
  0xb7   : > { %1280 = vmatpush.msra.mxu0 %v1814_v51  ;;  %1055 = vmatpush.msra.mxu2 %v1747_v53  ;;  %v2673_v49 = vld [vmem:[%s2090_s22 + $0x62] sm:$0xff] }
  0xb8   : > { %1169 = vmatpush.msra.mxu3 %v1779_v54  ;;  %940 = vmatpush.msra.mxu1 %v1715_v55  ;;  %v1738_v51 = vld [vmem:[%s3033_s1 + $0x318] sm:$0xff]  ;;  %v1803_v54 = vld [vmem:[%s3033_s1 + $0x420] sm:$0xff] }
  0xb9   : > { %1281 = vmatpush.msra.mxu0 %v1813_v56  ;;  %1056 = vmatpush.msra.mxu2 %v1746_v57  ;;  %v1770_v53 = vld [vmem:[%s3033_s1 + $0x398] sm:$0xff]  ;;  %v2699_v57 = vld [vmem:[%s2090_s22 + $0x80] sm:$0xff] }
  0xba   : > { %1170 = vmatpush.msra.mxu3 %v1778_v58  ;;  %941 = vmatpush.msra.mxu1 %v1714_v59  ;;  %v1706_v55 = vld [vmem:[%s3033_s1 + $0x298] sm:$0xff]  ;;  %v1737_v58 = vld [vmem:[%s3033_s1 + $0x310] sm:$0xff] }
  0xbb   : > { %616 = vmatmul.f32.gmra.mxu2 %v2525_v60  ;;  %1282 = vmatpush.msra.mxu0 %v1812_v61  ;;  %v2695_v56 = vld [vmem:[%s2090_s22 + $0x6a] sm:$0xff] }
  0xbc   : > { %518 = vmatmul.f32.gmra.mxu1 %v1623_v33  ;;  %1057 = vmatpush.msra.mxu2 %v1745_v62  ;;  %v1806_v33 = vld [vmem:[%s3033_s1 + $0x438] sm:$0xff]  ;;  %v1769_v59 = vld [vmem:[%s3033_s1 + $0x390] sm:$0xff] }
  0xbd   : > { %1283 = vmatpush.msra.mxu0 %v1811_v63  ;;  %1171 = vmatpush.msra.mxu3 %v1777_v0  ;;  %v1802_v61 = vld [vmem:[%s3033_s1 + $0x418] sm:$0xff]  ;;  %v1705_v62 = vld [vmem:[%s3033_s1 + $0x290] sm:$0xff] }
  0xbe   : > { %731 = vmatmul.f32.gmra.mxu3 %v2541_v3  ;;  %842 = vmatmul.f32.gmra.mxu0 %v2456_v31  ;;  %v1773_v31 = vld [vmem:[%s3033_s1 + $0x3b0] sm:$0xff] }
  0xbf   : > { %1284 = vmatpush.msra.mxu0 %v1810_v4  ;;  %942 = vmatpush.msra.mxu1 %v1713_v5  ;;  %v2717_v63 = vld [vmem:[%s2090_s22 + $0x7a] sm:$0xff]  ;;  %v2721_v0 = vld [vmem:[%s2090_s22 + $0x90] sm:$0xff] }
  0xc0   : > { %1058 = vmatpush.msra.mxu2 %v1744_v6  ;;  %1172 = vmatpush.msra.mxu3 %v1776_v7  ;;  %v1736_v4 = vld [vmem:[%s3033_s1 + $0x308] sm:$0xff]  ;;  %v1801_v6 = vld [vmem:[%s3033_s1 + $0x410] sm:$0xff] }
  0xc1   : > { %1285 = vmatpush.msra.mxu0 %v1809_v9  ;;  %943 = vmatpush.msra.mxu1 %v1712_v10  ;;  %v1768_v5 = vld [vmem:[%s3033_s1 + $0x388] sm:$0xff] }
  0xc2   : > { %1059 = vmatpush.msra.mxu2 %v1743_v15  ;;  %1173 = vmatpush.msra.mxu3 %v1775_v17  ;;  %v1704_v7 = vld [vmem:[%s3033_s1 + $0x288] sm:$0xff]  ;;  %v1735_v17 = vld [vmem:[%s3033_s1 + $0x300] sm:$0xff] }
  0xc3   : > { %619 = vmatmul.f32.gmra.mxu2 %v2564_v11  ;;  %1286 = vmatpush.msra.mxu0 %v1808_v18  ;;  %v2739_v9 = vld [vmem:[%s2090_s22 + $0x82] sm:$0xff]  ;;  %v2743_v10 = vld [vmem:[%s2090_s22 + $0x98] sm:$0xff] }
  0xc4   : > { %521 = vmatmul.f32.gmra.mxu1 %v1624_v50  ;;  %1060 = vmatpush.msra.mxu2 %v1742_v22  ;;  %v2677_v50 = vld [vmem:[%s2090_s22 + $0x78] sm:$0xff]  ;;  %v1767_v18 = vld [vmem:[%s3033_s1 + $0x380] sm:$0xff] }
  0xc5   : > { %944 = vmatpush.msra.mxu1 %v1711_v19  ;;  %1174 = vmatpush.msra.mxu3 %v1774_v23  ;;  %v1800_v19 = vld [vmem:[%s3033_s1 + $0x408] sm:$0xff]  ;;  %v1703_v22 = vld [vmem:[%s3033_s1 + $0x280] sm:$0xff] }
  0xc6   : > { %734 = vmatmul.f32.gmra.mxu3 %v2568_v14  ;;  %845 = vmatmul.f32.gmra.mxu0 %v2217_v12  ;;  %v2763_v23 = vld [vmem:[%s2090_s22 + $0x92] sm:$0xff] }
  0xc7   : > { %1287 = vmatpush.msra.mxu0 %v1807_v24  ;;  %945 = vmatpush.msra.mxu1 %v1710_v25  ;;  %v2769_v24 = vld [vmem:[%s2090_s22 + $0xa8] sm:$0xff] }
  0xc8   : > { %1061 = vmatpush.msra.mxu2 %v1741_v30  ;;  %1175 = vmatpush.msra.mxu3 %v1773_v31 }
  0xc9   : > { %1288 = vmatpush.msra.mxu0 %v1806_v33  ;;  %946 = vmatpush.msra.mxu1 %v1709_v34  ;;  %v1799_v33 = vld [vmem:[%s3033_s1 + $0x400] sm:$0xff] }
  0xca   : > { %1062 = vmatpush.msra.mxu2 %v1740_v37  ;;  %1176 = vmatpush.msra.mxu3 %v1772_v38  ;;  %v2782_v34 = vld [vmem:[%s2090_s22 + $0x9a] sm:$0xff]  ;;  %v2788_v38 = vld [vmem:[%s2090_s22 + $0xb0] sm:$0xff] }
  0xcb   : > { %622 = vmatmul.f32.gmra.mxu2 %v2585_v20  ;;  %1289 = vmatpush.msra.mxu0 %v1805_v39 }
  0xcc   : > { %524 = vmatmul.f32.gmra.mxu1 %v2541_v3  ;;  %1063 = vmatpush.msra.mxu2 %v1739_v43  ;;  %v2798_v43 = vld [vmem:[%s2090_s22 + $0xaa] sm:$0xff] }
  0xcd   : > { %947 = vmatpush.msra.mxu1 %v1708_v40  ;;  %1177 = vmatpush.msra.mxu3 %v1771_v44 }
  0xce   : > { %737 = vmatmul.f32.gmra.mxu3 %v2589_v21  ;;  %848 = vmatmul.f32.gmra.mxu0 %v2266_v28 }
  0xcf   : > { %1290 = vmatpush.msra.mxu0 %v1804_v47  ;;  %948 = vmatpush.msra.mxu1 %v1707_v48  ;;  %v2804_v47 = vld [vmem:[%s2090_s22 + $0xc0] sm:$0xff] }
  0xd0   : > { %1064 = vmatpush.msra.mxu2 %v1738_v51  ;;  %1178 = vmatpush.msra.mxu3 %v1770_v53 }
  0xd1   : > { %1291 = vmatpush.msra.mxu0 %v1803_v54  ;;  %949 = vmatpush.msra.mxu1 %v1706_v55  ;;  %v2818_v54 = vld [vmem:[%s2090_s22 + $0xc8] sm:$0xff] }
  0xd2   : > { %1065 = vmatpush.msra.mxu2 %v1737_v58  ;;  %1179 = vmatpush.msra.mxu3 %v1769_v59  ;;  %v2821_v55 = vld [vmem:[%s2090_s22 + $0xc1] sm:$0xff] }
  0xd3   : > { %625 = vmatmul.f32.gmra.mxu2 %v2607_v26  ;;  %1292 = vmatpush.msra.mxu0 %v1802_v61 }
  0xd4   : > { %527 = vmatmul.f32.gmra.mxu1 %v2568_v14  ;;  %1066 = vmatpush.msra.mxu2 %v1736_v4  ;;  %v2832_v4 = vld [vmem:[%s2090_s22 + $0xc9] sm:$0xff] }
  0xd5   : > { %950 = vmatpush.msra.mxu1 %v1705_v62  ;;  %1180 = vmatpush.msra.mxu3 %v1768_v5 }
  0xd6   : > { %740 = vmatmul.f32.gmra.mxu3 %v2611_v29  ;;  %851 = vmatmul.f32.gmra.mxu0 %v2323_v46 }
  0xd7   : > { %1293 = vmatpush.msra.mxu0 %v1801_v6  ;;  %951 = vmatpush.msra.mxu1 %v1704_v7 }
  0xd8   : > { %1067 = vmatpush.msra.mxu2 %v1735_v17  ;;  %1181 = vmatpush.msra.mxu3 %v1767_v18 }
  0xd9   : > { %1294 = vmatpush.msra.mxu0 %v1800_v19  ;;  %952 = vmatpush.msra.mxu1 %v1703_v22 }
  0xdb   : > { %628 = vmatmul.f32.gmra.mxu2 %v2629_v35  ;;  %1295 = vmatpush.msra.mxu0 %v1799_v33 }
  0xdc   : > { %530 = vmatmul.f32.gmra.mxu1 %v2589_v21 }
  0xde   : > { %743 = vmatmul.f32.gmra.mxu3 %v2633_v36  ;;  %854 = vmatmul.f32.gmra.mxu0 %v2384_v2 }
  0xe3   : > { %631 = vmatmul.f32.gmra.mxu2 %v2651_v41 }
  0xe4   : > { %533 = vmatmul.f32.gmra.mxu1 %v2611_v29 }
  0xe6   : > { %746 = vmatmul.f32.gmra.mxu3 %v2655_v42  ;;  %857 = vmatmul.f32.gmra.mxu0 %v2220_v13 }
  0xeb   : > { %634 = vmatmul.f32.gmra.mxu2 %v2673_v49 }
  0xec   : > { %536 = vmatmul.f32.gmra.mxu1 %v2633_v36 }
  0xee   : > { %749 = vmatmul.f32.gmra.mxu3 %v2677_v50  ;;  %860 = vmatmul.f32.gmra.mxu0 %v2263_v27 }
  0xf3   : > { %637 = vmatmul.f32.gmra.mxu2 %v2695_v56 }
  0xf4   : > { %539 = vmatmul.f32.gmra.mxu1 %v2655_v42 }
  0xf6   : > { %752 = vmatmul.f32.gmra.mxu3 %v2699_v57  ;;  %863 = vmatmul.f32.gmra.mxu0 %v2320_v45 }
  0xfb   : > { %640 = vmatmul.f32.gmra.mxu2 %v2717_v63 }
  0xfc   : > { %542 = vmatmul.f32.gmra.mxu1 %v2677_v50 }
  0xfe   : > { %755 = vmatmul.f32.gmra.mxu3 %v2721_v0  ;;  %866 = vmatmul.f32.gmra.mxu0 %v2381_v1 }
 0x103   : > { %643 = vmatmul.f32.gmra.mxu2 %v2739_v9  ;;  %v2745_v15 = vpop.f32.mrf.mxu1 }
 0x104   : > { %545 = vmatmul.f32.gmra.mxu1 %v2699_v57 }
 0x106   : > { %758 = vmatmul.f32.gmra.mxu3 %v2743_v10  ;;  %869 = vmatmul.f32.gmra.mxu0 %v2229_v16 }
 0x109   : > { %v2765_v16 = vpop.f32.mrf.mxu2  ;;  %v448_v31 = vpop.f32.mrf.mxu0 }
 0x10b   : > { %646 = vmatmul.f32.gmra.mxu2 %v2763_v23  ;;  %v2771_v25 = vpop.f32.mrf.mxu3 }
 0x10c   : > { %548 = vmatmul.f32.gmra.mxu1 %v2721_v0  ;;  %v2774_v30 = vpop.f32.mrf.mxu1 }
 0x10e   : > { %761 = vmatmul.f32.gmra.mxu3 %v2769_v24  ;;  %872 = vmatmul.f32.gmra.mxu0 %v2279_v32 }
 0x111   : > { %v2784_v37 = vpop.f32.mrf.mxu2 }
 0x113   : > { %649 = vmatmul.f32.gmra.mxu2 %v2782_v34 }
 0x114   : > { %551 = vmatmul.f32.gmra.mxu1 %v2743_v10  ;;  %v2791_v39 = vpop.f32.mrf.mxu3 }
 0x115   : > { %v2793_v32 = vpop.f32.mrf.mxu1 }
 0x116   : > { %764 = vmatmul.f32.gmra.mxu3 %v2788_v38  ;;  %875 = vmatmul.f32.gmra.mxu0 %v2341_v52  ;;  %v2814_v52 = vld [vmem:[%s2090_s22 + $0xb2] sm:$0xff] }
 0x117   : > { %v451_v40 = vpop.f32.mrf.mxu0 }
 0x11a   : > { %v2800_v44 = vpop.f32.mrf.mxu2 }
 0x11b   : > { %652 = vmatmul.f32.gmra.mxu2 %v2798_v43 }
 0x11c   : > { %554 = vmatmul.f32.gmra.mxu1 %v2769_v24 }
 0x11e   : > { %767 = vmatmul.f32.gmra.mxu3 %v2804_v47  ;;  %878 = vmatmul.f32.gmra.mxu0 %v2404_v8  ;;  %v2809_v48 = vpop.f32.mrf.mxu3 }
 0x11f   : > { %v2811_v51 = vpop.f32.mrf.mxu1 }
 0x121   : > { %v454_v53 = vpop.f32.mrf.mxu0 }
 0x123   : > { %655 = vmatmul.f32.gmra.mxu2 %v2814_v52 }
 0x124   : > { %557 = vmatmul.f32.gmra.mxu1 %v2788_v38  ;;  %v2824_v58 = vpop.f32.mrf.mxu2 }
 0x126   : > { %770 = vmatmul.f32.gmra.mxu3 %v2818_v54  ;;  %881 = vmatmul.f32.gmra.mxu0 %v2821_v55 }
 0x128   : > { %v2828_v59 = vpop.f32.mrf.mxu3 }
 0x129   : > { %v513_v61 = vpop.f32.mrf.mxu1 }
 0x12a   : > { %v514_v5 = vadd.f32 %v513_v61, %v448_v31 }
 0x12b   : > { %v457_v62 = vpop.f32.mrf.mxu0  ;;  %1068 = vmatmul.f32.vlgmr.msra.gmra.mxu2 %v2541_v3 }
 0x12c   : > { %953 = vmatmul.f32.vlgmr.msra.gmra.mxu1 %v2525_v60 }
 0x12e   : > { %884 = vmatmul.f32.gmra.mxu0 %v2832_v4  ;;  %1182 = vmatmul.f32.vlgmr.msra.gmra.mxu3 %v2217_v12  ;;  %v611_v6 = vpop.f32.mrf.mxu2 }
 0x12f   : > { %v659_v7 = vadd.f32 %v611_v6, %v514_v5 }
 0x131   : > { %v516_v17 = vpop.f32.mrf.mxu1  ;;  %v726_v18 = vpop.f32.mrf.mxu3 }
 0x132   : > { %v2837_v19 = vadd.f32 %v726_v18, %v659_v7  ;;  %v517_v3 = vadd.f32 %v516_v17, %v451_v40 }
 0x133   : > { %v2839_v22 = vpop.f32.mrf.mxu0  ;;  %1071 = vmatmul.f32.gmra.mxu2 %v2568_v14 }
 0x134   : > { %956 = vmatmul.f32.gmra.mxu1 %v2564_v11 }
 0x136   : > { %1185 = vmatmul.f32.gmra.mxu3 %v2266_v28  ;;  %1296 = vmatmul.f32.vlgmr.msra.gmra.mxu0 %v2585_v20  ;;  %v614_v60 = vpop.f32.mrf.mxu2 }
 0x137   : > { %v660_v31 = vadd.f32 %v614_v60, %v517_v3 }
 0x139   : > { %v519_v12 = vpop.f32.mrf.mxu1  ;;  %v729_v33 = vpop.f32.mrf.mxu3 }
 0x13a   : > { %v2845_v61 = vadd.f32 %v729_v33, %v660_v31  ;;  %v520_v14 = vadd.f32 %v519_v12, %v454_v53 }
 0x13b   : > { %v2847_v5 = vpop.f32.mrf.mxu0  ;;  %1074 = vmatmul.f32.gmra.mxu2 %v2589_v21 }
 0x13c   : > { %959 = vmatmul.f32.gmra.mxu1 %v2585_v20 }
 0x13e   : > { %1188 = vmatmul.f32.gmra.mxu3 %v2323_v46  ;;  %1299 = vmatmul.f32.gmra.mxu0 %v2607_v26  ;;  %v617_v28 = vpop.f32.mrf.mxu2 }
 0x13f   : > { %v661_v11 = vadd.f32 %v617_v28, %v520_v14 }
 0x141   : > { %v522_v40 = vpop.f32.mrf.mxu1  ;;  %v732_v6 = vpop.f32.mrf.mxu3 }
 0x142   : > { %v2853_v7 = vadd.f32 %v732_v6, %v661_v11  ;;  %v523_v21 = vadd.f32 %v522_v40, %v457_v62 }
 0x143   : > { %v2855_v17 = vpop.f32.mrf.mxu0  ;;  %1077 = vmatmul.f32.gmra.mxu2 %v2611_v29 }
 0x144   : > { %962 = vmatmul.f32.gmra.mxu1 %v2607_v26 }
 0x146   : > { %1191 = vmatmul.f32.gmra.mxu3 %v2384_v2  ;;  %1302 = vmatmul.f32.gmra.mxu0 %v2629_v35  ;;  %v620_v46 = vpop.f32.mrf.mxu2 }
 0x147   : > { %v662_v20 = vadd.f32 %v620_v46, %v523_v21 }
 0x149   : > { %v525_v53 = vpop.f32.mrf.mxu1  ;;  %v735_v18 = vpop.f32.mrf.mxu3 }
 0x14a   : > { %v2861_v3 = vadd.f32 %v735_v18, %v662_v20  ;;  %v526_v29 = vadd.f32 %v525_v53, %v2745_v15 }
 0x14b   : > { %v2863_v60 = vpop.f32.mrf.mxu0  ;;  %1080 = vmatmul.f32.gmra.mxu2 %v2633_v36 }
 0x14c   : > { %965 = vmatmul.f32.gmra.mxu1 %v2629_v35 }
 0x14e   : > { %1194 = vmatmul.f32.gmra.mxu3 %v2220_v13  ;;  %1305 = vmatmul.f32.gmra.mxu0 %v2651_v41  ;;  %v623_v2 = vpop.f32.mrf.mxu2 }
 0x14f   : > { %v663_v26 = vadd.f32 %v623_v2, %v526_v29 }
 0x151   : > { %v528_v62 = vpop.f32.mrf.mxu1  ;;  %v738_v31 = vpop.f32.mrf.mxu3 }
 0x152   : > { %v2870_v12 = vadd.f32 %v738_v31, %v663_v26  ;;  %v529_v35 = vadd.f32 %v528_v62, %v2774_v30  ;;  %v1760_v62 = vld [vmem:[%s2090_s22 + $0x99] sm:$0xff] }
 0x153   : > { %v2872_v33 = vpop.f32.mrf.mxu0  ;;  %1083 = vmatmul.f32.gmra.mxu2 %v2655_v42 }
 0x154   : > { %968 = vmatmul.f32.gmra.mxu1 %v2651_v41 }
 0x156   : > { %1197 = vmatmul.f32.gmra.mxu3 %v2263_v27  ;;  %1308 = vmatmul.f32.gmra.mxu0 %v2673_v49  ;;  %v626_v13 = vpop.f32.mrf.mxu2 }
 0x157   : > { %v664_v36 = vadd.f32 %v626_v13, %v529_v35 }
 0x159   : > { %v531_v15 = vpop.f32.mrf.mxu1  ;;  %v741_v14 = vpop.f32.mrf.mxu3 }
 0x15a   : > { %v2879_v28 = vadd.f32 %v741_v14, %v664_v36  ;;  %v532_v41 = vadd.f32 %v531_v15, %v2793_v32  ;;  %v1761_v14 = vld [vmem:[%s2090_s22 + $0xa9] sm:$0xff] }
 0x15b   : > { %v2881_v11 = vpop.f32.mrf.mxu0  ;;  %1086 = vmatmul.f32.gmra.mxu2 %v2677_v50 }
 0x15c   : > { %971 = vmatmul.f32.gmra.mxu1 %v2673_v49 }
 0x15e   : > { %1200 = vmatmul.f32.gmra.mxu3 %v2320_v45  ;;  %1311 = vmatmul.f32.gmra.mxu0 %v2695_v56  ;;  %v629_v27 = vpop.f32.mrf.mxu2 }
 0x15f   : > { %v665_v42 = vadd.f32 %v629_v27, %v532_v41 }
 0x161   : > { %v534_v30 = vpop.f32.mrf.mxu1  ;;  %v744_v40 = vpop.f32.mrf.mxu3 }
 0x162   : > { %v2888_v6 = vadd.f32 %v744_v40, %v665_v42  ;;  %v535_v49 = vadd.f32 %v534_v30, %v2811_v51 }
 0x163   : > { %v2890_v21 = vpop.f32.mrf.mxu0  ;;  %1089 = vmatmul.f32.gmra.mxu2 %v2699_v57  ;;  %v1759_v57 = vld [vmem:[%s2090_s22 + $0x91] sm:$0xff] }
 0x164   : > { %974 = vmatmul.f32.gmra.mxu1 %v2695_v56 }
 0x166   : > { %1203 = vmatmul.f32.gmra.mxu3 %v2381_v1  ;;  %1314 = vmatmul.f32.gmra.mxu0 %v2717_v63  ;;  %v632_v45 = vpop.f32.mrf.mxu2 }
 0x167   : > { %v666_v50 = vadd.f32 %v632_v45, %v535_v49 }
 0x169   : > { %v537_v32 = vpop.f32.mrf.mxu1  ;;  %v747_v46 = vpop.f32.mrf.mxu3 }
 0x16a   : > { %v2897_v20 = vadd.f32 %v747_v46, %v666_v50  ;;  %v538_v56 = vadd.f32 %v537_v32, %v2765_v16 }
 0x16b   : > { %v2899_v53 = vpop.f32.mrf.mxu0  ;;  %1092 = vmatmul.f32.gmra.mxu2 %v2721_v0 }
 0x16c   : > { %977 = vmatmul.f32.gmra.mxu1 %v2717_v63 }
 0x16e   : > { %1206 = vmatmul.f32.gmra.mxu3 %v1759_v57  ;;  %1317 = vmatmul.f32.gmra.mxu0 %v2739_v9  ;;  %v635_v1 = vpop.f32.mrf.mxu2 }
 0x16f   : > { %v667_v51 = vadd.f32 %v635_v1, %v538_v56 }
 0x171   : > { %v540_v18 = vpop.f32.mrf.mxu1  ;;  %v750_v29 = vpop.f32.mrf.mxu3 }
 0x172   : > { %v782_v2 = vadd.f32 %v750_v29, %v667_v51  ;;  %v541_v63 = vadd.f32 %v540_v18, %v2784_v37  ;;  %v1733_v29 = vld [vmem:[%s2090_s22 + $0xd8] sm:$0xff] }
 0x173   : > { %v864_v26 = vpop.f32.mrf.mxu0  ;;  %1095 = vmatmul.f32.gmra.mxu2 %v2743_v10 }
 0x174   : > { %v2908_v31 = vadd.f32 %v864_v26, %v782_v2  ;;  %980 = vmatmul.f32.gmra.mxu1 %v2739_v9 }
 0x176   : > { %1209 = vmatmul.f32.gmra.mxu3 %v1760_v62  ;;  %1320 = vmatmul.f32.gmra.mxu0 %v2763_v23  ;;  %v638_v0 = vpop.f32.mrf.mxu2 }
 0x177   : > { %v668_v16 = vadd.f32 %v638_v0, %v541_v63  ;;  %v1796_v0 = vld [vmem:[%s2090_s22 + $0xca] sm:$0xff] }
 0x179   : > { %v543_v35 = vpop.f32.mrf.mxu1  ;;  %v753_v13 = vpop.f32.mrf.mxu3 }
 0x17a   : > { %v783_v36 = vadd.f32 %v753_v13, %v668_v16  ;;  %v544_v9 = vadd.f32 %v543_v35, %v2800_v44  ;;  %v1734_v35 = vld [vmem:[%s2090_s22 + $0xe0] sm:$0xff] }
 0x17b   : > { %v867_v15 = vpop.f32.mrf.mxu0  ;;  %1098 = vmatmul.f32.gmra.mxu2 %v2769_v24 }
 0x17c   : > { %v2915_v10 = vadd.f32 %v867_v15, %v783_v36  ;;  %983 = vmatmul.f32.gmra.mxu1 %v2763_v23 }
 0x17e   : > { %1212 = vmatmul.f32.gmra.mxu3 %v1761_v14  ;;  %1323 = vmatmul.f32.gmra.mxu0 %v2782_v34  ;;  %v641_v37 = vpop.f32.mrf.mxu2 }
 0x17f   : > { %v669_v41 = vadd.f32 %v641_v37, %v544_v9  ;;  %v1766_v9 = vld [vmem:[%s2090_s22 + $0xe1] sm:$0xff] }
 0x180   : > { %v1797_v37 = vld [vmem:[%s2090_s22 + $0xda] sm:$0xff] }
 0x181   : > { %v546_v27 = vpop.f32.mrf.mxu1  ;;  %v756_v42 = vpop.f32.mrf.mxu3 }
 0x182   : > { %v784_v30 = vadd.f32 %v756_v42, %v669_v41  ;;  %v547_v24 = vadd.f32 %v546_v27, %v2824_v58 }
 0x183   : > { %v870_v40 = vpop.f32.mrf.mxu0  ;;  %1101 = vmatmul.f32.gmra.mxu2 %v2788_v38 }
 0x184   : > { %v2921_v49 = vadd.f32 %v870_v40, %v784_v30  ;;  %986 = vmatmul.f32.gmra.mxu1 %v2782_v34 }
 0x186   : > { %1215 = vmatmul.f32.gmra.mxu3 %v2404_v8  ;;  %1326 = vmatmul.f32.gmra.mxu0 %v2798_v43  ;;  %v644_v23 = vpop.f32.mrf.mxu2 }
 0x187   : > { %v670_v44 = vadd.f32 %v644_v23, %v547_v24  ;;  %v888_v23 = vadd.f32 %v2839_v22, %v2837_v19  ;;  %v889_v19 = vadd.f32 %v2847_v5, %v2845_v61 }
 0x189   : > { %v549_v45 = vpop.f32.mrf.mxu1  ;;  %v759_v50 = vpop.f32.mrf.mxu3 }
 0x18a   : > { %v785_v32 = vadd.f32 %v759_v50, %v670_v44  ;;  %v550_v34 = vadd.f32 %v549_v45, %v2771_v25  ;;  %v1798_v45 = vld [vmem:[%s2090_s22 + $0xe2] sm:$0xff] }
 0x18b   : > { %v873_v46 = vpop.f32.mrf.mxu0  ;;  %1104 = vmatmul.f32.gmra.mxu2 %v2804_v47  ;;  %v1795_v47 = vld [vmem:[%s2090_s22 + $0xc2] sm:$0xff] }
 0x18c   : > { %v2928_v38 = vadd.f32 %v873_v46, %v785_v32  ;;  %989 = vmatmul.f32.gmra.mxu1 %v2798_v43 }
 0x18e   : > { %1218 = vmatmul.f32.gmra.mxu3 %v2821_v55  ;;  %1329 = vmatmul.f32.gmra.mxu0 %v2814_v52  ;;  %v647_v8 = vpop.f32.mrf.mxu2 }
 0x18f   : > { %v671_v58 = vadd.f32 %v647_v8, %v550_v34 }
 0x191   : > { %v552_v57 = vpop.f32.mrf.mxu1  ;;  %v762_v56 = vpop.f32.mrf.mxu3 }
 0x192   : > { %v786_v1 = vadd.f32 %v762_v56, %v671_v58  ;;  %v553_v25 = vadd.f32 %v552_v57, %v2791_v39  ;;  %v2961_v57 = vld [vmem:[%s3034_s2] ss:$0 sm:$0xff] }
 0x193   : > { %v876_v51 = vpop.f32.mrf.mxu0  ;;  %1107 = vmatmul.f32.gmra.mxu2 %v2818_v54  ;;  %v1765_v54 = vld [vmem:[%s2090_s22 + $0xd9] sm:$0xff] }
 0x194   : > { %v2936_v18 = vadd.f32 %v876_v51, %v786_v1  ;;  %992 = vmatmul.f32.gmra.mxu1 %v2814_v52 }
 0x196   : > { %1221 = vmatmul.f32.gmra.mxu3 %v2832_v4  ;;  %1332 = vmatmul.f32.gmra.mxu0 %v1795_v47  ;;  %v650_v43 = vpop.f32.mrf.mxu2 }
 0x197   : > { %v672_v55 = vadd.f32 %v650_v43, %v553_v25 }
 0x199   : > { %v555_v2 = vpop.f32.mrf.mxu1  ;;  %v765_v26 = vpop.f32.mrf.mxu3 }
 0x19a   : > { %v787_v62 = vadd.f32 %v765_v26, %v672_v55  ;;  %v556_v39 = vadd.f32 %v555_v2, %v2809_v48  ;;  %v890_v2 = vadd.f32 %v2855_v17, %v2853_v7 }
 0x19b   : > { %v879_v63 = vpop.f32.mrf.mxu0  ;;  %1110 = vmatmul.f32.gmra.mxu2 %v1733_v29 }
 0x19c   : > { %v2944_v16 = vadd.f32 %v879_v63, %v787_v62  ;;  %995 = vmatmul.f32.gmra.mxu1 %v1795_v47 }
 0x19e   : > { %1224 = vmatmul.f32.gmra.mxu3 %v1765_v54  ;;  %1335 = vmatmul.f32.gmra.mxu0 %v1796_v0  ;;  %v653_v52 = vpop.f32.mrf.mxu2 }
 0x19f   : > { %v673_v4 = vadd.f32 %v653_v52, %v556_v39 }
 0x1a1   : > { %v558_v13 = vpop.f32.mrf.mxu1  ;;  %v768_v36 = vpop.f32.mrf.mxu3 }
 0x1a2   : > { %v788_v15 = vadd.f32 %v768_v36, %v673_v4  ;;  %v559_v27 = vadd.f32 %v558_v13, %v2828_v59  ;;  %v891_v4 = vadd.f32 %v2863_v60, %v2861_v3 }
 0x1a3   : > { %v882_v14 = vpop.f32.mrf.mxu0  ;;  %1113 = vmatmul.f32.gmra.mxu2 %v1734_v35 }
 0x1a4   : > { %v2950_v41 = vadd.f32 %v882_v14, %v788_v15  ;;  %998 = vmatmul.f32.gmra.mxu1 %v1796_v0 }
 0x1a6   : > { %1227 = vmatmul.f32.gmra.mxu3 %v1766_v9  ;;  %1338 = vmatmul.f32.gmra.mxu0 %v1797_v37  ;;  %v656_v48 = vpop.f32.mrf.mxu2 }
 0x1a7   : > { %v674_v42 = vadd.f32 %v656_v48, %v559_v27  ;;  %v892_v27 = vadd.f32 %v2872_v33, %v2870_v12 }
 0x1a9   : > { %v771_v30 = vpop.f32.mrf.mxu3  ;;  %v954_v40 = vpop.f32.mrf.mxu1 }
 0x1aa   : > { %v789_v24 = vadd.f32 %v771_v30, %v674_v42  ;;  %v1002_v32 = vadd.f32 %v954_v40, %v888_v23 }
 0x1ab   : > { %v885_v44 = vpop.f32.mrf.mxu0 }
 0x1ac   : > { %v2956_v50 = vadd.f32 %v885_v44, %v789_v24 }
 0x1ae   : > { %1341 = vmatmul.f32.gmra.mxu0 %v1798_v45  ;;  %v1069_v46 = vpop.f32.mrf.mxu2  ;;  %v893_v45 = vadd.f32 %v2881_v11, %v2879_v28 }
 0x1af   : > { %v1117_v34 = vadd.f32 %v1069_v46, %v1002_v32 }
 0x1b1   : > { %v957_v59 = vpop.f32.mrf.mxu1  ;;  %v1183_v8 = vpop.f32.mrf.mxu3 }
 0x1b2   : > { %v1231_v58 = vadd.f32 %v1183_v8, %v1117_v34  ;;  %v1003_v1 = vadd.f32 %v957_v59, %v889_v19 }
 0x1b3   : > { %v1297_v22 = vpop.f32.mrf.mxu0 }
 0x1b4   : > { %v1345_v56 = vadd.f32 %v1297_v22, %v1231_v58  ;;  %v894_v22 = vadd.f32 %v2890_v21, %v2888_v6 }
 0x1b6   : > { %v1365_v51 = vadd.f32 %v2961_v57, %v1345_v56  ;;  %v1072_v47 = vpop.f32.mrf.mxu2 }
 0x1b7   : > { %v1118_v25 = vadd.f32 %v1072_v47, %v1003_v1 }
 0x1b8   : > { %1381 = vst [vmem:[%s2013_s29] sm:$0xff] %v1365_v51 }
 0x1b9   : > { %v960_v43 = vpop.f32.mrf.mxu1  ;;  %v1186_v55 = vpop.f32.mrf.mxu3 }
 0x1ba   : > { %v1232_v29 = vadd.f32 %v1186_v55, %v1118_v25  ;;  %v1004_v63 = vadd.f32 %v960_v43, %v890_v2 }
 0x1bb   : > { %v1300_v26 = vpop.f32.mrf.mxu0 }
 0x1bc   : > { %v1346_v62 = vadd.f32 %v1300_v26, %v1232_v29  ;;  %v895_v29 = vadd.f32 %v2899_v53, %v2897_v20 }
 0x1be   : > { %v1366_v61 = vadd.f32 %v2961_v57, %v1346_v62  ;;  %v1075_v5 = vpop.f32.mrf.mxu2 }
 0x1bf   : > { %v1119_v54 = vadd.f32 %v1075_v5, %v1004_v63 }
 0x1c0   : > { %1382 = vst [vmem:[%s2013_s29 + $0x8] sm:$0xff] %v1366_v61 }
 0x1c1   : > { %v963_v0 = vpop.f32.mrf.mxu1  ;;  %v1189_v39 = vpop.f32.mrf.mxu3 }
 0x1c2   : > { %v1233_v52 = vadd.f32 %v1189_v39, %v1119_v54  ;;  %v1005_v36 = vadd.f32 %v963_v0, %v891_v4 }
 0x1c3   : > { %v1303_v35 = vpop.f32.mrf.mxu0 }
 0x1c4   : > { %v1347_v13 = vadd.f32 %v1303_v35, %v1233_v52 }
 0x1c6   : > { %v1367_v7 = vadd.f32 %v2961_v57, %v1347_v13  ;;  %v1078_v17 = vpop.f32.mrf.mxu2 }
 0x1c7   : > { %v1120_v15 = vadd.f32 %v1078_v17, %v1005_v36 }
 0x1c8   : > { %1383 = vst [vmem:[%s2013_s29 + $0x10] sm:$0xff] %v1367_v7 }
 0x1c9   : > { %v966_v14 = vpop.f32.mrf.mxu1  ;;  %v1192_v9 = vpop.f32.mrf.mxu3 }
 0x1ca   : > { %v1234_v37 = vadd.f32 %v1192_v9, %v1120_v15  ;;  %v1006_v30 = vadd.f32 %v966_v14, %v892_v27 }
 0x1cb   : > { %v1306_v48 = vpop.f32.mrf.mxu0 }
 0x1cc   : > { %v1348_v42 = vadd.f32 %v1306_v48, %v1234_v37 }
 0x1ce   : > { %v1368_v3 = vadd.f32 %v2961_v57, %v1348_v42  ;;  %v1081_v60 = vpop.f32.mrf.mxu2 }
 0x1cf   : > { %v1121_v40 = vadd.f32 %v1081_v60, %v1006_v30 }
 0x1d0   : > { %1384 = vst [vmem:[%s2013_s29 + $0x18] sm:$0xff] %v1368_v3 }
 0x1d1   : > { %v969_v24 = vpop.f32.mrf.mxu1  ;;  %v1195_v23 = vpop.f32.mrf.mxu3 }
 0x1d2   : > { %v1235_v44 = vadd.f32 %v1195_v23, %v1121_v40  ;;  %v1007_v34 = vadd.f32 %v969_v24, %v893_v45 }
 0x1d3   : > { %v1309_v32 = vpop.f32.mrf.mxu0 }
 0x1d4   : > { %v1349_v46 = vadd.f32 %v1309_v32, %v1235_v44 }
 0x1d6   : > { %v1369_v12 = vadd.f32 %v2961_v57, %v1349_v46  ;;  %v1084_v33 = vpop.f32.mrf.mxu2 }
 0x1d7   : > { %v1122_v59 = vadd.f32 %v1084_v33, %v1007_v34 }
 0x1d8   : > { %1385 = vst [vmem:[%s2013_s29 + $0x20] sm:$0xff] %v1369_v12 }
 0x1d9   : > { %v972_v8 = vpop.f32.mrf.mxu1  ;;  %v1198_v58 = vpop.f32.mrf.mxu3 }
 0x1da   : > { %v1236_v19 = vadd.f32 %v1198_v58, %v1122_v59  ;;  %v1008_v51 = vadd.f32 %v972_v8, %v894_v22 }
 0x1db   : > { %v1312_v56 = vpop.f32.mrf.mxu0 }
 0x1dc   : > { %v1350_v1 = vadd.f32 %v1312_v56, %v1236_v19 }
 0x1de   : > { %v1370_v28 = vadd.f32 %v2961_v57, %v1350_v1  ;;  %v1087_v11 = vpop.f32.mrf.mxu2 }
 0x1df   : > { %v1123_v47 = vadd.f32 %v1087_v11, %v1008_v51 }
 0x1e0   : > { %1386 = vst [vmem:[%s2013_s29 + $0x28] sm:$0xff] %v1370_v28 }
 0x1e1   : > { %v975_v25 = vpop.f32.mrf.mxu1  ;;  %v1201_v43 = vpop.f32.mrf.mxu3 }
 0x1e2   : > { %v1237_v55 = vadd.f32 %v1201_v43, %v1123_v47  ;;  %v1009_v62 = vadd.f32 %v975_v25, %v895_v29 }
 0x1e3   : > { %v1315_v2 = vpop.f32.mrf.mxu0 }
 0x1e4   : > { %v1351_v26 = vadd.f32 %v1315_v2, %v1237_v55 }
 0x1e6   : > { %v1371_v6 = vadd.f32 %v2961_v57, %v1351_v26  ;;  %v1090_v21 = vpop.f32.mrf.mxu2 }
 0x1e7   : > { %v1124_v63 = vadd.f32 %v1090_v21, %v1009_v62 }
 0x1e8   : > { %1387 = vst [vmem:[%s2013_s29 + $0x30] sm:$0xff] %v1371_v6 }
 0x1e9   : > { %v978_v61 = vpop.f32.mrf.mxu1  ;;  %v1204_v5 = vpop.f32.mrf.mxu3 }
 0x1ea   : > { %v1238_v54 = vadd.f32 %v1204_v5, %v1124_v63  ;;  %v1010_v52 = vadd.f32 %v978_v61, %v2908_v31 }
 0x1eb   : > { %v1318_v0 = vpop.f32.mrf.mxu0 }
 0x1ec   : > { %v1352_v39 = vadd.f32 %v1318_v0, %v1238_v54 }
 0x1ee   : > { %v1372_v4 = vadd.f32 %v2961_v57, %v1352_v39  ;;  %v1093_v20 = vpop.f32.mrf.mxu2 }
 0x1ef   : > { %v1125_v53 = vadd.f32 %v1093_v20, %v1010_v52 }
 0x1f0   : > { %1388 = vst [vmem:[%s2013_s29 + $0x38] sm:$0xff] %v1372_v4 }
 0x1f1   : > { %v981_v35 = vpop.f32.mrf.mxu1  ;;  %v1207_v13 = vpop.f32.mrf.mxu3 }
 0x1f2   : > { %v1239_v36 = vadd.f32 %v1207_v13, %v1125_v53  ;;  %v1011_v15 = vadd.f32 %v981_v35, %v2915_v10 }
 0x1f3   : > { %v1321_v7 = vpop.f32.mrf.mxu0 }
 0x1f4   : > { %v1353_v17 = vadd.f32 %v1321_v7, %v1239_v36 }
 0x1f6   : > { %v1373_v14 = vadd.f32 %v2961_v57, %v1353_v17  ;;  %v1096_v9 = vpop.f32.mrf.mxu2 }
 0x1f7   : > { %v1126_v37 = vadd.f32 %v1096_v9, %v1011_v15 }
 0x1f8   : > { %1389 = vst [vmem:[%s2013_s29 + $0x40] sm:$0xff] %v1373_v14 }
 0x1f9   : > { %v984_v27 = vpop.f32.mrf.mxu1  ;;  %v1210_v31 = vpop.f32.mrf.mxu3 }
 0x1fa   : > { %v1240_v48 = vadd.f32 %v1210_v31, %v1126_v37  ;;  %v1012_v3 = vadd.f32 %v984_v27, %v2921_v49 }
 0x1fb   : > { %v1324_v42 = vpop.f32.mrf.mxu0 }
 0x1fc   : > { %v1354_v30 = vadd.f32 %v1324_v42, %v1240_v48 }
 0x1fe   : > { %v1374_v60 = vadd.f32 %v2961_v57, %v1354_v30  ;;  %v1099_v40 = vpop.f32.mrf.mxu2 }
 0x1ff   : > { %v1127_v24 = vadd.f32 %v1099_v40, %v1012_v3 }
 0x200   : > { %1390 = vst [vmem:[%s2013_s29 + $0x48] sm:$0xff] %v1374_v60 }
 0x201   : > { %v987_v23 = vpop.f32.mrf.mxu1  ;;  %v1213_v10 = vpop.f32.mrf.mxu3 }
 0x202   : > { %v1241_v44 = vadd.f32 %v1213_v10, %v1127_v24  ;;  %v1013_v46 = vadd.f32 %v987_v23, %v2928_v38 }
 0x203   : > { %v1327_v45 = vpop.f32.mrf.mxu0 }
 0x204   : > { %v1355_v32 = vadd.f32 %v1327_v45, %v1241_v44 }
 0x206   : > { %v1375_v34 = vadd.f32 %v2961_v57, %v1355_v32  ;;  %v1102_v12 = vpop.f32.mrf.mxu2 }
 0x207   : > { %v1128_v33 = vadd.f32 %v1102_v12, %v1013_v46 }
 0x208   : > { %1391 = vst [vmem:[%s2013_s29 + $0x50] sm:$0xff] %v1375_v34 }
 0x209   : > { %v990_v59 = vpop.f32.mrf.mxu1  ;;  %v1216_v49 = vpop.f32.mrf.mxu3 }
 0x20a   : > { %v1242_v8 = vadd.f32 %v1216_v49, %v1128_v33  ;;  %v1014_v22 = vadd.f32 %v990_v59, %v2936_v18 }
 0x20b   : > { %v1330_v58 = vpop.f32.mrf.mxu0 }
 0x20c   : > { %v1356_v19 = vadd.f32 %v1330_v58, %v1242_v8 }
 0x20e   : > { %v1376_v56 = vadd.f32 %v2961_v57, %v1356_v19  ;;  %v1105_v1 = vpop.f32.mrf.mxu2 }
 0x20f   : > { %v1129_v51 = vadd.f32 %v1105_v1, %v1014_v22 }
 0x210   : > { %1392 = vst [vmem:[%s2013_s29 + $0x58] sm:$0xff] %v1376_v56 }
 0x211   : > { %v993_v28 = vpop.f32.mrf.mxu1  ;;  %v1219_v38 = vpop.f32.mrf.mxu3 }
 0x212   : > { %v1243_v11 = vadd.f32 %v1219_v38, %v1129_v51  ;;  %v1015_v43 = vadd.f32 %v993_v28, %v2944_v16 }
 0x213   : > { %v1333_v47 = vpop.f32.mrf.mxu0 }
 0x214   : > { %v1357_v25 = vadd.f32 %v1333_v47, %v1243_v11 }
 0x216   : > { %v1377_v55 = vadd.f32 %v2961_v57, %v1357_v25  ;;  %v1108_v29 = vpop.f32.mrf.mxu2 }
 0x217   : > { %v1130_v2 = vadd.f32 %v1108_v29, %v1015_v43 }
 0x218   : > { %1393 = vst [vmem:[%s2013_s29 + $0x60] sm:$0xff] %v1377_v55 }
 0x219   : > { %v996_v26 = vpop.f32.mrf.mxu1  ;;  %v1222_v18 = vpop.f32.mrf.mxu3 }
 0x21a   : > { %v1244_v62 = vadd.f32 %v1222_v18, %v1130_v2  ;;  %v1016_v63 = vadd.f32 %v996_v26, %v2950_v41 }
 0x21b   : > { %v1336_v6 = vpop.f32.mrf.mxu0 }
 0x21c   : > { %v1358_v21 = vadd.f32 %v1336_v6, %v1244_v62 }
 0x21e   : > { %v1378_v61 = vadd.f32 %v2961_v57, %v1358_v21  ;;  %v1111_v5 = vpop.f32.mrf.mxu2 }
 0x21f   : > { %v1131_v54 = vadd.f32 %v1111_v5, %v1016_v63 }
 0x220   : > { %1394 = vst [vmem:[%s2013_s29 + $0x68] sm:$0xff] %v1378_v61 }
 0x221   : > { %v1225_v16 = vpop.f32.mrf.mxu3  ;;  %v999_v0 = vpop.f32.mrf.mxu1 }
 0x222   : > { %v1245_v39 = vadd.f32 %v1225_v16, %v1131_v54  ;;  %v1017_v20 = vadd.f32 %v999_v0, %v2956_v50 }
 0x223   : > { %v1339_v52 = vpop.f32.mrf.mxu0 }
 0x224   : > { %v1359_v4 = vadd.f32 %v1339_v52, %v1245_v39 }
 0x226   : > { %v1379_v53 = vadd.f32 %v2961_v57, %v1359_v4  ;;  %v1114_v35 = vpop.f32.mrf.mxu2 }
 0x227   : > { %v1132_v13 = vadd.f32 %v1114_v35, %v1017_v20 }
 0x228   : > { %1395 = vst [vmem:[%s2013_s29 + $0x70] sm:$0xff] %v1379_v53 }
 0x229   : > { %v1228_v36 = vpop.f32.mrf.mxu3 }
 0x22a   : > { %v1246_v41 = vadd.f32 %v1228_v36, %v1132_v13 }
 0x22b   : > { %v1342_v7 = vpop.f32.mrf.mxu0 }
 0x22c   : > { %v1360_v17 = vadd.f32 %v1342_v7, %v1246_v41 }
 0x22e   : > { %v1380_v15 = vadd.f32 %v2961_v57, %v1360_v17 }
 0x230   : > { %1396 = vst [vmem:[%s2013_s29 + $0x78] sm:$0xff] %v1380_v15 }
 0x231 PF: > { %s13_s16 = sadd.s32 1, %s1948_s16   ;;  %s3036_s12 = smov %s1940_s14 }
 0x232   : > { %p10_p11 = scmp.ge.s32.totalorder %s13_s16, 6   ;;  %s3037_s13 = smov %s1944_s15 }
 0x233   : > { %s3038_s14 = smov %s3041_s17  ;;  %s3039_s15 = smov %s3045_s18 }
 0x234   :  { %12 = sbr.rel (!%p10_p11) target bundleno = 3 (0x3), region = 146 }
 0x239   :  { %1427 = vsyncmov [#allocation3] }
 0x23c   :  { %s1428_s29 = vpop.sfrf %1427 }
 0x23d   :  { %p1817_p12 = scmp.ne.s32.totalorder %s1428_s29, 0 }
 0x23f   :  { %1432 = shalt.err (%p1817_p12)  }
 0x240   :  { %1434 = vsyncmov [#allocation3 + $0x1] }
 0x243   :  { %s1435_s22 = vpop.sfrf %1434 }
 0x244   :  { %p1818_p13 = scmp.ne.s32.totalorder %s1435_s22, 0 }
 0x246   :  { %1439 = shalt.err (%p1818_p13)  }

</bundles_post_ra>
